<compile_context>
chip_gen: v7x
topology: tpu7x:2x2x1
jax: 0.10.0
libtpu: 0.0.40
codegen_flags: <defaults>
</compile_context>

<pallas_src>
import functools
import math

import jax
import jax.numpy as jnp
from jax.experimental import pallas as pl
from jax.experimental.pallas import tpu as pltpu


# ------------------------------ Fused kernel ----------------------------------

def _fused_lstm_encoder_kernel(*refs, num_layers, hidden_size, seq_len, batch):
    H, T, B = hidden_size, seq_len, batch

    x_ref = refs[0]                                   # (T*B, D0) f32
    layer_refs = refs[1:1 + 3 * num_layers]           # per layer: w_ih_t, w_hh_gates_t, bias
    fcw_ref = refs[1 + 3 * num_layers]                # (H, H) bf16  (W_fc^T)
    fcb_ref = refs[2 + 3 * num_layers]                # (1, H) f32
    out_ref = refs[3 + 3 * num_layers]                # (B, H) f32
    seq_scr = refs[4 + 3 * num_layers]                # (T*B, H) f32 scratch (next-layer input)

    x2d = x_ref[...].astype(jnp.bfloat16)             # MXU operand in bf16
    h_last = None

    for l in range(num_layers):
        wih = layer_refs[3 * l + 0][...]               # (D_in, 4H) bf16
        whh_ref = layer_refs[3 * l + 1]                # (4, H, H) bf16 (per-gate, transposed)
        bias = layer_refs[3 * l + 2][...]              # (1, 4H) f32  (b_ih + b_hh)

        # Hoisted input projection for all T steps (one MXU matmul), bias folded in.
        xp = jnp.dot(x2d, wih, preferred_element_type=jnp.float32) + bias   # (T*B, 4H) f32
        # Per-gate slabs: sliced ONCE per layer, outside the serial time loop.
        xp_g = [xp[:, g * H:(g + 1) * H] for g in range(4)]                 # 4 x (T*B, H)
        w_g = [whh_ref[g] for g in range(4)]                                # 4 x (H, H) bf16

        h = jnp.zeros((B, H), jnp.float32)
        c = jnp.zeros((B, H), jnp.float32)

        for t in range(T):          # serial recurrence, fully unrolled (T small, static)
            r = slice(t * B, (t + 1) * B)
            hb = h.astype(jnp.bfloat16)
            gi = xp_g[0][r] + jnp.dot(hb, w_g[0], preferred_element_type=jnp.float32)
            gf = xp_g[1][r] + jnp.dot(hb, w_g[1], preferred_element_type=jnp.float32)
            gg = xp_g[2][r] + jnp.dot(hb, w_g[2], preferred_element_type=jnp.float32)
            go = xp_g[3][r] + jnp.dot(hb, w_g[3], preferred_element_type=jnp.float32)

            i_t = jax.nn.sigmoid(gi)              # elementwise epilogue stays f32 (EUP slot)
            f_t = jax.nn.sigmoid(gf)
            g_t = jnp.tanh(gg)
            o_t = jax.nn.sigmoid(go)

            c = f_t * c + i_t * g_t
            h = o_t * jnp.tanh(c)

            if l + 1 < num_layers:                # stash sequence for next layer (VMEM only)
                seq_scr[r, :] = h

        h_last = h
        if l + 1 < num_layers:
            x2d = seq_scr[...].astype(jnp.bfloat16)     # (T*B, H)

    # FC head on the last layer's final hidden state (== hidden[-1]).
    out = (jnp.dot(h_last.astype(jnp.bfloat16), fcw_ref[...],
                   preferred_element_type=jnp.float32)
           + fcb_ref[...])
    out_ref[...] = out.astype(out_ref.dtype)


# ------------------------------ Parameter init --------------------------------

def init_params(key, input_size, hidden_size, num_layers):
    """Deterministic init mirroring PyTorch's uniform(-1/sqrt(H), 1/sqrt(H))."""
    bound = 1.0 / math.sqrt(hidden_size)
    H = hidden_size
    params = {"lstm": []}
    for layer in range(num_layers):
        d_in = input_size if layer == 0 else hidden_size
        key, k1, k2, k3, k4 = jax.random.split(key, 5)
        w_ih = jax.random.uniform(k1, (4 * H, d_in), jnp.float32, -bound, bound)
        w_hh = jax.random.uniform(k2, (4 * H, H), jnp.float32, -bound, bound)
        b_ih = jax.random.uniform(k3, (4 * H,), jnp.float32, -bound, bound)
        b_hh = jax.random.uniform(k4, (4 * H,), jnp.float32, -bound, bound)
        # MXU operands stored in bf16 (f32 accumulation in-kernel).
        # Recurrent weights stacked per gate so per-step tiles are lane-aligned.
        w_ih_t = jnp.transpose(w_ih).astype(jnp.bfloat16)                    # (d_in, 4H)
        w_hh_gates_t = jnp.transpose(
            w_hh.reshape(4, H, H), (0, 2, 1)).astype(jnp.bfloat16)           # (4, H_in, H_out)
        params["lstm"].append({
            "w_ih_t": w_ih_t,
            "w_hh_gates_t": w_hh_gates_t,
            "bias": (b_ih + b_hh).reshape(1, 4 * H),                         # f32
        })
    key, k5, k6 = jax.random.split(key, 3)
    fc_w = jax.random.uniform(k5, (H, H), jnp.float32, -bound, bound)
    fc_b = jax.random.uniform(k6, (H,), jnp.float32, -bound, bound)
    params["fc_w_t"] = jnp.transpose(fc_w).astype(jnp.bfloat16)              # (H, H)
    params["fc_b"] = fc_b.reshape(1, H)                                      # (1, H) f32
    return params


# --------------------------------- Forward ------------------------------------

@functools.partial(jax.jit, static_argnames=("hidden_size",))
def lstm_encoder_forward(params, x_btd, hidden_size):
    """x_btd: (B, T, D) batch_first. Returns (B, H), like the PyTorch module."""
    B, T, D = x_btd.shape
    H = hidden_size
    num_layers = len(params["lstm"])

    # Time-major, flattened to (T*B, D): row t*B + b holds (t, b).  This lets the
    # kernel do the whole-sequence input projection as one matmul with no in-kernel
    # reshapes; the per-step row slices are static.
    x2d = jnp.transpose(x_btd, (1, 0, 2)).reshape(T * B, D).astype(jnp.float32)

    inputs = [x2d]
    in_specs = [pl.BlockSpec((T * B, D), lambda: (0, 0))]
    for lp in params["lstm"]:
        inputs += [lp["w_ih_t"], lp["w_hh_gates_t"], lp["bias"]]
        in_specs += [
            pl.BlockSpec(lp["w_ih_t"].shape, lambda: (0, 0)),
            pl.BlockSpec(lp["w_hh_gates_t"].shape, lambda: (0, 0, 0)),
            pl.BlockSpec(lp["bias"].shape, lambda: (0, 0)),
        ]
    inputs += [params["fc_w_t"], params["fc_b"]]
    in_specs += [
        pl.BlockSpec(params["fc_w_t"].shape, lambda: (0, 0)),
        pl.BlockSpec(params["fc_b"].shape, lambda: (0, 0)),
    ]

    kernel = functools.partial(
        _fused_lstm_encoder_kernel,
        num_layers=num_layers, hidden_size=H, seq_len=T, batch=B)

    return pl.pallas_call(
        kernel,
        out_shape=jax.ShapeDtypeStruct((B, H), jnp.float32),
        in_specs=in_specs,
        out_specs=pl.BlockSpec((B, H), lambda: (0, 0)),
        scratch_shapes=[pltpu.VMEM((T * B, H), jnp.float32)],
        # No grid: single invocation, everything resident in VMEM.
        # NOTE(v7x): at much larger H, tile W_ih^T / W_hh^T along the gate axis and cap
        # with vmem_limit_bytes (64 MiB VMEM on v7x); moot at these sizes.
    )(*inputs)


# ----------------------------------- Main --------------------------------------

if __name__ == "__main__":
    B, T, D, H, L = 2, 8, 16, 32, 2

    key = jax.random.PRNGKey(0)
    key, kx = jax.random.split(key)
    x = jax.random.normal(kx, (B, T, D), jnp.float32)

    params = init_params(key, input_size=D, hidden_size=H, num_layers=L)

    out = lstm_encoder_forward(params, x, hidden_size=H)
    out = jax.block_until_ready(out)

    assert out.shape == (B, H), out.shape
    assert bool(jnp.all(jnp.isfinite(out)))
    print("KERNEL_OK")
</pallas_src>

<mosaic_0001>
module attributes {stable_mosaic.version = 11 : i64} {
  func.func @_fused_lstm_encoder_kernel(%arg0: memref<16x16xf32, #tpu.memory_space<vmem>>, %arg1: memref<16x128xbf16, #tpu.memory_space<vmem>>, %arg2: memref<4x32x32xbf16, #tpu.memory_space<vmem>>, %arg3: memref<1x128xf32, #tpu.memory_space<vmem>>, %arg4: memref<32x128xbf16, #tpu.memory_space<vmem>>, %arg5: memref<4x32x32xbf16, #tpu.memory_space<vmem>>, %arg6: memref<1x128xf32, #tpu.memory_space<vmem>>, %arg7: memref<32x32xbf16, #tpu.memory_space<vmem>>, %arg8: memref<1x32xf32, #tpu.memory_space<vmem>>, %arg9: memref<2x32xf32, #tpu.memory_space<vmem>>, %arg10: memref<16x32xf32, #tpu.memory_space<vmem>>) attributes {dimension_semantics = [], scalar_prefetch = 0 : i64, scratch_operands = 1 : i64, tpu.core_type = #tpu.core_type<tc>} {
    %c0 = arith.constant 0 : index
    %c0_0 = arith.constant 0 : index
    %0 = vector.load %arg0[%c0, %c0_0] : memref<16x16xf32, #tpu.memory_space<vmem>>, vector<16x16xf32>
    %1 = arith.truncf %0 : vector<16x16xf32> to vector<16x16xbf16>
    %c0_1 = arith.constant 0 : index
    %c0_2 = arith.constant 0 : index
    %2 = vector.load %arg1[%c0_1, %c0_2] : memref<16x128xbf16, #tpu.memory_space<vmem>>, vector<16x128xbf16>
    %c0_3 = arith.constant 0 : index
    %c0_4 = arith.constant 0 : index
    %3 = vector.load %arg3[%c0_3, %c0_4] : memref<1x128xf32, #tpu.memory_space<vmem>>, vector<1x128xf32>
    %cst = arith.constant dense<0.000000e+00> : vector<16x128xf32>
    %4 = tpu.matmul %1, %2, %cst {dimension_numbers = #tpu.dot_dimension_numbers<[1], [0], [0], [1], [0, 0, 1, 1], [], []>} : vector<16x16xbf16>, vector<16x128xbf16>, vector<16x128xf32> -> vector<16x128xf32>
    %5 = vector.broadcast %3 : vector<1x128xf32> to vector<16x128xf32>
    %6 = arith.addf %4, %5 : vector<16x128xf32>
    %7 = vector.extract_strided_slice %6 {offsets = [0, 0], sizes = [16, 32], strides = [1, 1]} : vector<16x128xf32> to vector<16x32xf32>
    %8 = vector.extract_strided_slice %6 {offsets = [0, 32], sizes = [16, 32], strides = [1, 1]} : vector<16x128xf32> to vector<16x32xf32>
    %9 = vector.extract_strided_slice %6 {offsets = [0, 64], sizes = [16, 32], strides = [1, 1]} : vector<16x128xf32> to vector<16x32xf32>
    %10 = vector.extract_strided_slice %6 {offsets = [0, 96], sizes = [16, 32], strides = [1, 1]} : vector<16x128xf32> to vector<16x32xf32>
    %c0_5 = arith.constant 0 : index
    %c0_6 = arith.constant 0 : index
    %c0_7 = arith.constant 0 : index
    %11 = vector.load %arg2[%c0_5, %c0_6, %c0_7] : memref<4x32x32xbf16, #tpu.memory_space<vmem>>, vector<1x32x32xbf16>
    %12 = vector.shape_cast %11 : vector<1x32x32xbf16> to vector<32x32xbf16>
    %c1 = arith.constant 1 : index
    %c0_8 = arith.constant 0 : index
    %c0_9 = arith.constant 0 : index
    %13 = vector.load %arg2[%c1, %c0_8, %c0_9] : memref<4x32x32xbf16, #tpu.memory_space<vmem>>, vector<1x32x32xbf16>
    %14 = vector.shape_cast %13 : vector<1x32x32xbf16> to vector<32x32xbf16>
    %c2 = arith.constant 2 : index
    %c0_10 = arith.constant 0 : index
    %c0_11 = arith.constant 0 : index
    %15 = vector.load %arg2[%c2, %c0_10, %c0_11] : memref<4x32x32xbf16, #tpu.memory_space<vmem>>, vector<1x32x32xbf16>
    %16 = vector.shape_cast %15 : vector<1x32x32xbf16> to vector<32x32xbf16>
    %c3 = arith.constant 3 : index
    %c0_12 = arith.constant 0 : index
    %c0_13 = arith.constant 0 : index
    %17 = vector.load %arg2[%c3, %c0_12, %c0_13] : memref<4x32x32xbf16, #tpu.memory_space<vmem>>, vector<1x32x32xbf16>
    %18 = vector.shape_cast %17 : vector<1x32x32xbf16> to vector<32x32xbf16>
    %cst_14 = arith.constant 0.000000e+00 : f32
    %19 = vector.broadcast %cst_14 : f32 to vector<2x32xf32>
    %cst_15 = arith.constant 0.000000e+00 : f32
    %20 = vector.broadcast %cst_15 : f32 to vector<2x32xf32>
    %21 = arith.truncf %19 : vector<2x32xf32> to vector<2x32xbf16>
    %22 = vector.extract_strided_slice %7 {offsets = [0, 0], sizes = [2, 32], strides = [1, 1]} : vector<16x32xf32> to vector<2x32xf32>
    %cst_16 = arith.constant dense<0.000000e+00> : vector<2x32xf32>
    %23 = tpu.matmul %21, %12, %cst_16 {dimension_numbers = #tpu.dot_dimension_numbers<[1], [0], [0], [1], [0, 0, 1, 1], [], []>} : vector<2x32xbf16>, vector<32x32xbf16>, vector<2x32xf32> -> vector<2x32xf32>
    %24 = arith.addf %22, %23 : vector<2x32xf32>
    %25 = vector.extract_strided_slice %8 {offsets = [0, 0], sizes = [2, 32], strides = [1, 1]} : vector<16x32xf32> to vector<2x32xf32>
    %cst_17 = arith.constant dense<0.000000e+00> : vector<2x32xf32>
    %26 = tpu.matmul %21, %14, %cst_17 {dimension_numbers = #tpu.dot_dimension_numbers<[1], [0], [0], [1], [0, 0, 1, 1], [], []>} : vector<2x32xbf16>, vector<32x32xbf16>, vector<2x32xf32> -> vector<2x32xf32>
    %27 = arith.addf %25, %26 : vector<2x32xf32>
    %28 = vector.extract_strided_slice %9 {offsets = [0, 0], sizes = [2, 32], strides = [1, 1]} : vector<16x32xf32> to vector<2x32xf32>
    %cst_18 = arith.constant dense<0.000000e+00> : vector<2x32xf32>
    %29 = tpu.matmul %21, %16, %cst_18 {dimension_numbers = #tpu.dot_dimension_numbers<[1], [0], [0], [1], [0, 0, 1, 1], [], []>} : vector<2x32xbf16>, vector<32x32xbf16>, vector<2x32xf32> -> vector<2x32xf32>
    %30 = arith.addf %28, %29 : vector<2x32xf32>
    %31 = vector.extract_strided_slice %10 {offsets = [0, 0], sizes = [2, 32], strides = [1, 1]} : vector<16x32xf32> to vector<2x32xf32>
    %cst_19 = arith.constant dense<0.000000e+00> : vector<2x32xf32>
    %32 = tpu.matmul %21, %18, %cst_19 {dimension_numbers = #tpu.dot_dimension_numbers<[1], [0], [0], [1], [0, 0, 1, 1], [], []>} : vector<2x32xbf16>, vector<32x32xbf16>, vector<2x32xf32> -> vector<2x32xf32>
    %33 = arith.addf %31, %32 : vector<2x32xf32>
    %34 = arith.negf %24 : vector<2x32xf32>
    %35 = math.exp %34 : vector<2x32xf32>
    %cst_20 = arith.constant 1.000000e+00 : f32
    %36 = vector.broadcast %cst_20 : f32 to vector<2x32xf32>
    %37 = arith.addf %36, %35 : vector<2x32xf32>
    %38 = arith.divf %36, %37 : vector<2x32xf32>
    %39 = arith.negf %27 : vector<2x32xf32>
    %40 = math.exp %39 : vector<2x32xf32>
    %cst_21 = arith.constant 1.000000e+00 : f32
    %41 = vector.broadcast %cst_21 : f32 to vector<2x32xf32>
    %42 = arith.addf %41, %40 : vector<2x32xf32>
    %43 = arith.divf %41, %42 : vector<2x32xf32>
    %44 = math.tanh %30 : vector<2x32xf32>
    %45 = arith.negf %33 : vector<2x32xf32>
    %46 = math.exp %45 : vector<2x32xf32>
    %cst_22 = arith.constant 1.000000e+00 : f32
    %47 = vector.broadcast %cst_22 : f32 to vector<2x32xf32>
    %48 = arith.addf %47, %46 : vector<2x32xf32>
    %49 = arith.divf %47, %48 : vector<2x32xf32>
    %50 = arith.mulf %43, %20 : vector<2x32xf32>
    %51 = arith.mulf %38, %44 : vector<2x32xf32>
    %52 = arith.addf %50, %51 : vector<2x32xf32>
    %53 = math.tanh %52 : vector<2x32xf32>
    %54 = arith.mulf %49, %53 : vector<2x32xf32>
    %c0_23 = arith.constant 0 : index
    %c0_24 = arith.constant 0 : index
    %55 = vector.load %arg10[%c0_23, %c0_24] : memref<16x32xf32, #tpu.memory_space<vmem>>, vector<2x32xf32>
    tpu.vector_store %arg10[%c0_23, %c0_24], %54 {strides = array<i32>} : memref<16x32xf32, #tpu.memory_space<vmem>>, vector<2x32xf32>,
    %56 = arith.truncf %54 : vector<2x32xf32> to vector<2x32xbf16>
    %57 = vector.extract_strided_slice %7 {offsets = [2, 0], sizes = [2, 32], strides = [1, 1]} : vector<16x32xf32> to vector<2x32xf32>
    %cst_25 = arith.constant dense<0.000000e+00> : vector<2x32xf32>
    %58 = tpu.matmul %56, %12, %cst_25 {dimension_numbers = #tpu.dot_dimension_numbers<[1], [0], [0], [1], [0, 0, 1, 1], [], []>} : vector<2x32xbf16>, vector<32x32xbf16>, vector<2x32xf32> -> vector<2x32xf32>
    %59 = arith.addf %57, %58 : vector<2x32xf32>
    %60 = vector.extract_strided_slice %8 {offsets = [2, 0], sizes = [2, 32], strides = [1, 1]} : vector<16x32xf32> to vector<2x32xf32>
    %cst_26 = arith.constant dense<0.000000e+00> : vector<2x32xf32>
    %61 = tpu.matmul %56, %14, %cst_26 {dimension_numbers = #tpu.dot_dimension_numbers<[1], [0], [0], [1], [0, 0, 1, 1], [], []>} : vector<2x32xbf16>, vector<32x32xbf16>, vector<2x32xf32> -> vector<2x32xf32>
    %62 = arith.addf %60, %61 : vector<2x32xf32>
    %63 = vector.extract_strided_slice %9 {offsets = [2, 0], sizes = [2, 32], strides = [1, 1]} : vector<16x32xf32> to vector<2x32xf32>
    %cst_27 = arith.constant dense<0.000000e+00> : vector<2x32xf32>
    %64 = tpu.matmul %56, %16, %cst_27 {dimension_numbers = #tpu.dot_dimension_numbers<[1], [0], [0], [1], [0, 0, 1, 1], [], []>} : vector<2x32xbf16>, vector<32x32xbf16>, vector<2x32xf32> -> vector<2x32xf32>
    %65 = arith.addf %63, %64 : vector<2x32xf32>
    %66 = vector.extract_strided_slice %10 {offsets = [2, 0], sizes = [2, 32], strides = [1, 1]} : vector<16x32xf32> to vector<2x32xf32>
    %cst_28 = arith.constant dense<0.000000e+00> : vector<2x32xf32>
    %67 = tpu.matmul %56, %18, %cst_28 {dimension_numbers = #tpu.dot_dimension_numbers<[1], [0], [0], [1], [0, 0, 1, 1], [], []>} : vector<2x32xbf16>, vector<32x32xbf16>, vector<2x32xf32> -> vector<2x32xf32>
    %68 = arith.addf %66, %67 : vector<2x32xf32>
    %69 = arith.negf %59 : vector<2x32xf32>
    %70 = math.exp %69 : vector<2x32xf32>
    %cst_29 = arith.constant 1.000000e+00 : f32
    %71 = vector.broadcast %cst_29 : f32 to vector<2x32xf32>
    %72 = arith.addf %71, %70 : vector<2x32xf32>
    %73 = arith.divf %71, %72 : vector<2x32xf32>
    %74 = arith.negf %62 : vector<2x32xf32>
    %75 = math.exp %74 : vector<2x32xf32>
    %cst_30 = arith.constant 1.000000e+00 : f32
    %76 = vector.broadcast %cst_30 : f32 to vector<2x32xf32>
    %77 = arith.addf %76, %75 : vector<2x32xf32>
    %78 = arith.divf %76, %77 : vector<2x32xf32>
    %79 = math.tanh %65 : vector<2x32xf32>
    %80 = arith.negf %68 : vector<2x32xf32>
    %81 = math.exp %80 : vector<2x32xf32>
    %cst_31 = arith.constant 1.000000e+00 : f32
    %82 = vector.broadcast %cst_31 : f32 to vector<2x32xf32>
    %83 = arith.addf %82, %81 : vector<2x32xf32>
    %84 = arith.divf %82, %83 : vector<2x32xf32>
    %85 = arith.mulf %78, %52 : vector<2x32xf32>
    %86 = arith.mulf %73, %79 : vector<2x32xf32>
    %87 = arith.addf %85, %86 : vector<2x32xf32>
    %88 = math.tanh %87 : vector<2x32xf32>
    %89 = arith.mulf %84, %88 : vector<2x32xf32>
    %c2_32 = arith.constant 2 : index
    %c0_33 = arith.constant 0 : index
    %90 = vector.load %arg10[%c2_32, %c0_33] : memref<16x32xf32, #tpu.memory_space<vmem>>, vector<2x32xf32>
    tpu.vector_store %arg10[%c2_32, %c0_33], %89 {strides = array<i32>} : memref<16x32xf32, #tpu.memory_space<vmem>>, vector<2x32xf32>,
    %91 = arith.truncf %89 : vector<2x32xf32> to vector<2x32xbf16>
    %92 = vector.extract_strided_slice %7 {offsets = [4, 0], sizes = [2, 32], strides = [1, 1]} : vector<16x32xf32> to vector<2x32xf32>
    %cst_34 = arith.constant dense<0.000000e+00> : vector<2x32xf32>
    %93 = tpu.matmul %91, %12, %cst_34 {dimension_numbers = #tpu.dot_dimension_numbers<[1], [0], [0], [1], [0, 0, 1, 1], [], []>} : vector<2x32xbf16>, vector<32x32xbf16>, vector<2x32xf32> -> vector<2x32xf32>
    %94 = arith.addf %92, %93 : vector<2x32xf32>
    %95 = vector.extract_strided_slice %8 {offsets = [4, 0], sizes = [2, 32], strides = [1, 1]} : vector<16x32xf32> to vector<2x32xf32>
    %cst_35 = arith.constant dense<0.000000e+00> : vector<2x32xf32>
    %96 = tpu.matmul %91, %14, %cst_35 {dimension_numbers = #tpu.dot_dimension_numbers<[1], [0], [0], [1], [0, 0, 1, 1], [], []>} : vector<2x32xbf16>, vector<32x32xbf16>, vector<2x32xf32> -> vector<2x32xf32>
    %97 = arith.addf %95, %96 : vector<2x32xf32>
    %98 = vector.extract_strided_slice %9 {offsets = [4, 0], sizes = [2, 32], strides = [1, 1]} : vector<16x32xf32> to vector<2x32xf32>
    %cst_36 = arith.constant dense<0.000000e+00> : vector<2x32xf32>
    %99 = tpu.matmul %91, %16, %cst_36 {dimension_numbers = #tpu.dot_dimension_numbers<[1], [0], [0], [1], [0, 0, 1, 1], [], []>} : vector<2x32xbf16>, vector<32x32xbf16>, vector<2x32xf32> -> vector<2x32xf32>
    %100 = arith.addf %98, %99 : vector<2x32xf32>
    %101 = vector.extract_strided_slice %10 {offsets = [4, 0], sizes = [2, 32], strides = [1, 1]} : vector<16x32xf32> to vector<2x32xf32>
    %cst_37 = arith.constant dense<0.000000e+00> : vector<2x32xf32>
    %102 = tpu.matmul %91, %18, %cst_37 {dimension_numbers = #tpu.dot_dimension_numbers<[1], [0], [0], [1], [0, 0, 1, 1], [], []>} : vector<2x32xbf16>, vector<32x32xbf16>, vector<2x32xf32> -> vector<2x32xf32>
    %103 = arith.addf %101, %102 : vector<2x32xf32>
    %104 = arith.negf %94 : vector<2x32xf32>
    %105 = math.exp %104 : vector<2x32xf32>
    %cst_38 = arith.constant 1.000000e+00 : f32
    %106 = vector.broadcast %cst_38 : f32 to vector<2x32xf32>
    %107 = arith.addf %106, %105 : vector<2x32xf32>
    %108 = arith.divf %106, %107 : vector<2x32xf32>
    %109 = arith.negf %97 : vector<2x32xf32>
    %110 = math.exp %109 : vector<2x32xf32>
    %cst_39 = arith.constant 1.000000e+00 : f32
    %111 = vector.broadcast %cst_39 : f32 to vector<2x32xf32>
    %112 = arith.addf %111, %110 : vector<2x32xf32>
    %113 = arith.divf %111, %112 : vector<2x32xf32>
    %114 = math.tanh %100 : vector<2x32xf32>
    %115 = arith.negf %103 : vector<2x32xf32>
    %116 = math.exp %115 : vector<2x32xf32>
    %cst_40 = arith.constant 1.000000e+00 : f32
    %117 = vector.broadcast %cst_40 : f32 to vector<2x32xf32>
    %118 = arith.addf %117, %116 : vector<2x32xf32>
    %119 = arith.divf %117, %118 : vector<2x32xf32>
    %120 = arith.mulf %113, %87 : vector<2x32xf32>
    %121 = arith.mulf %108, %114 : vector<2x32xf32>
    %122 = arith.addf %120, %121 : vector<2x32xf32>
    %123 = math.tanh %122 : vector<2x32xf32>
    %124 = arith.mulf %119, %123 : vector<2x32xf32>
    %c4 = arith.constant 4 : index
    %c0_41 = arith.constant 0 : index
    %125 = vector.load %arg10[%c4, %c0_41] : memref<16x32xf32, #tpu.memory_space<vmem>>, vector<2x32xf32>
    tpu.vector_store %arg10[%c4, %c0_41], %124 {strides = array<i32>} : memref<16x32xf32, #tpu.memory_space<vmem>>, vector<2x32xf32>,
    %126 = arith.truncf %124 : vector<2x32xf32> to vector<2x32xbf16>
    %127 = vector.extract_strided_slice %7 {offsets = [6, 0], sizes = [2, 32], strides = [1, 1]} : vector<16x32xf32> to vector<2x32xf32>
    %cst_42 = arith.constant dense<0.000000e+00> : vector<2x32xf32>
    %128 = tpu.matmul %126, %12, %cst_42 {dimension_numbers = #tpu.dot_dimension_numbers<[1], [0], [0], [1], [0, 0, 1, 1], [], []>} : vector<2x32xbf16>, vector<32x32xbf16>, vector<2x32xf32> -> vector<2x32xf32>
    %129 = arith.addf %127, %128 : vector<2x32xf32>
    %130 = vector.extract_strided_slice %8 {offsets = [6, 0], sizes = [2, 32], strides = [1, 1]} : vector<16x32xf32> to vector<2x32xf32>
    %cst_43 = arith.constant dense<0.000000e+00> : vector<2x32xf32>
    %131 = tpu.matmul %126, %14, %cst_43 {dimension_numbers = #tpu.dot_dimension_numbers<[1], [0], [0], [1], [0, 0, 1, 1], [], []>} : vector<2x32xbf16>, vector<32x32xbf16>, vector<2x32xf32> -> vector<2x32xf32>
    %132 = arith.addf %130, %131 : vector<2x32xf32>
    %133 = vector.extract_strided_slice %9 {offsets = [6, 0], sizes = [2, 32], strides = [1, 1]} : vector<16x32xf32> to vector<2x32xf32>
    %cst_44 = arith.constant dense<0.000000e+00> : vector<2x32xf32>
    %134 = tpu.matmul %126, %16, %cst_44 {dimension_numbers = #tpu.dot_dimension_numbers<[1], [0], [0], [1], [0, 0, 1, 1], [], []>} : vector<2x32xbf16>, vector<32x32xbf16>, vector<2x32xf32> -> vector<2x32xf32>
    %135 = arith.addf %133, %134 : vector<2x32xf32>
    %136 = vector.extract_strided_slice %10 {offsets = [6, 0], sizes = [2, 32], strides = [1, 1]} : vector<16x32xf32> to vector<2x32xf32>
    %cst_45 = arith.constant dense<0.000000e+00> : vector<2x32xf32>
    %137 = tpu.matmul %126, %18, %cst_45 {dimension_numbers = #tpu.dot_dimension_numbers<[1], [0], [0], [1], [0, 0, 1, 1], [], []>} : vector<2x32xbf16>, vector<32x32xbf16>, vector<2x32xf32> -> vector<2x32xf32>
    %138 = arith.addf %136, %137 : vector<2x32xf32>
    %139 = arith.negf %129 : vector<2x32xf32>
    %140 = math.exp %139 : vector<2x32xf32>
    %cst_46 = arith.constant 1.000000e+00 : f32
    %141 = vector.broadcast %cst_46 : f32 to vector<2x32xf32>
    %142 = arith.addf %141, %140 : vector<2x32xf32>
    %143 = arith.divf %141, %142 : vector<2x32xf32>
    %144 = arith.negf %132 : vector<2x32xf32>
    %145 = math.exp %144 : vector<2x32xf32>
    %cst_47 = arith.constant 1.000000e+00 : f32
    %146 = vector.broadcast %cst_47 : f32 to vector<2x32xf32>
    %147 = arith.addf %146, %145 : vector<2x32xf32>
    %148 = arith.divf %146, %147 : vector<2x32xf32>
    %149 = math.tanh %135 : vector<2x32xf32>
    %150 = arith.negf %138 : vector<2x32xf32>
    %151 = math.exp %150 : vector<2x32xf32>
    %cst_48 = arith.constant 1.000000e+00 : f32
    %152 = vector.broadcast %cst_48 : f32 to vector<2x32xf32>
    %153 = arith.addf %152, %151 : vector<2x32xf32>
    %154 = arith.divf %152, %153 : vector<2x32xf32>
    %155 = arith.mulf %148, %122 : vector<2x32xf32>
    %156 = arith.mulf %143, %149 : vector<2x32xf32>
    %157 = arith.addf %155, %156 : vector<2x32xf32>
    %158 = math.tanh %157 : vector<2x32xf32>
    %159 = arith.mulf %154, %158 : vector<2x32xf32>
    %c6 = arith.constant 6 : index
    %c0_49 = arith.constant 0 : index
    %160 = vector.load %arg10[%c6, %c0_49] : memref<16x32xf32, #tpu.memory_space<vmem>>, vector<2x32xf32>
    tpu.vector_store %arg10[%c6, %c0_49], %159 {strides = array<i32>} : memref<16x32xf32, #tpu.memory_space<vmem>>, vector<2x32xf32>,
    %161 = arith.truncf %159 : vector<2x32xf32> to vector<2x32xbf16>
    %162 = vector.extract_strided_slice %7 {offsets = [8, 0], sizes = [2, 32], strides = [1, 1]} : vector<16x32xf32> to vector<2x32xf32>
    %cst_50 = arith.constant dense<0.000000e+00> : vector<2x32xf32>
    %163 = tpu.matmul %161, %12, %cst_50 {dimension_numbers = #tpu.dot_dimension_numbers<[1], [0], [0], [1], [0, 0, 1, 1], [], []>} : vector<2x32xbf16>, vector<32x32xbf16>, vector<2x32xf32> -> vector<2x32xf32>
    %164 = arith.addf %162, %163 : vector<2x32xf32>
    %165 = vector.extract_strided_slice %8 {offsets = [8, 0], sizes = [2, 32], strides = [1, 1]} : vector<16x32xf32> to vector<2x32xf32>
    %cst_51 = arith.constant dense<0.000000e+00> : vector<2x32xf32>
    %166 = tpu.matmul %161, %14, %cst_51 {dimension_numbers = #tpu.dot_dimension_numbers<[1], [0], [0], [1], [0, 0, 1, 1], [], []>} : vector<2x32xbf16>, vector<32x32xbf16>, vector<2x32xf32> -> vector<2x32xf32>
    %167 = arith.addf %165, %166 : vector<2x32xf32>
    %168 = vector.extract_strided_slice %9 {offsets = [8, 0], sizes = [2, 32], strides = [1, 1]} : vector<16x32xf32> to vector<2x32xf32>
    %cst_52 = arith.constant dense<0.000000e+00> : vector<2x32xf32>
    %169 = tpu.matmul %161, %16, %cst_52 {dimension_numbers = #tpu.dot_dimension_numbers<[1], [0], [0], [1], [0, 0, 1, 1], [], []>} : vector<2x32xbf16>, vector<32x32xbf16>, vector<2x32xf32> -> vector<2x32xf32>
    %170 = arith.addf %168, %169 : vector<2x32xf32>
    %171 = vector.extract_strided_slice %10 {offsets = [8, 0], sizes = [2, 32], strides = [1, 1]} : vector<16x32xf32> to vector<2x32xf32>
    %cst_53 = arith.constant dense<0.000000e+00> : vector<2x32xf32>
    %172 = tpu.matmul %161, %18, %cst_53 {dimension_numbers = #tpu.dot_dimension_numbers<[1], [0], [0], [1], [0, 0, 1, 1], [], []>} : vector<2x32xbf16>, vector<32x32xbf16>, vector<2x32xf32> -> vector<2x32xf32>
    %173 = arith.addf %171, %172 : vector<2x32xf32>
    %174 = arith.negf %164 : vector<2x32xf32>
    %175 = math.exp %174 : vector<2x32xf32>
    %cst_54 = arith.constant 1.000000e+00 : f32
    %176 = vector.broadcast %cst_54 : f32 to vector<2x32xf32>
    %177 = arith.addf %176, %175 : vector<2x32xf32>
    %178 = arith.divf %176, %177 : vector<2x32xf32>
    %179 = arith.negf %167 : vector<2x32xf32>
    %180 = math.exp %179 : vector<2x32xf32>
    %cst_55 = arith.constant 1.000000e+00 : f32
    %181 = vector.broadcast %cst_55 : f32 to vector<2x32xf32>
    %182 = arith.addf %181, %180 : vector<2x32xf32>
    %183 = arith.divf %181, %182 : vector<2x32xf32>
    %184 = math.tanh %170 : vector<2x32xf32>
    %185 = arith.negf %173 : vector<2x32xf32>
    %186 = math.exp %185 : vector<2x32xf32>
    %cst_56 = arith.constant 1.000000e+00 : f32
    %187 = vector.broadcast %cst_56 : f32 to vector<2x32xf32>
    %188 = arith.addf %187, %186 : vector<2x32xf32>
    %189 = arith.divf %187, %188 : vector<2x32xf32>
    %190 = arith.mulf %183, %157 : vector<2x32xf32>
    %191 = arith.mulf %178, %184 : vector<2x32xf32>
    %192 = arith.addf %190, %191 : vector<2x32xf32>
    %193 = math.tanh %192 : vector<2x32xf32>
    %194 = arith.mulf %189, %193 : vector<2x32xf32>
    %c8 = arith.constant 8 : index
    %c0_57 = arith.constant 0 : index
    %195 = vector.load %arg10[%c8, %c0_57] : memref<16x32xf32, #tpu.memory_space<vmem>>, vector<2x32xf32>
    tpu.vector_store %arg10[%c8, %c0_57], %194 {strides = array<i32>} : memref<16x32xf32, #tpu.memory_space<vmem>>, vector<2x32xf32>,
    %196 = arith.truncf %194 : vector<2x32xf32> to vector<2x32xbf16>
    %197 = vector.extract_strided_slice %7 {offsets = [10, 0], sizes = [2, 32], strides = [1, 1]} : vector<16x32xf32> to vector<2x32xf32>
    %cst_58 = arith.constant dense<0.000000e+00> : vector<2x32xf32>
    %198 = tpu.matmul %196, %12, %cst_58 {dimension_numbers = #tpu.dot_dimension_numbers<[1], [0], [0], [1], [0, 0, 1, 1], [], []>} : vector<2x32xbf16>, vector<32x32xbf16>, vector<2x32xf32> -> vector<2x32xf32>
    %199 = arith.addf %197, %198 : vector<2x32xf32>
    %200 = vector.extract_strided_slice %8 {offsets = [10, 0], sizes = [2, 32], strides = [1, 1]} : vector<16x32xf32> to vector<2x32xf32>
    %cst_59 = arith.constant dense<0.000000e+00> : vector<2x32xf32>
    %201 = tpu.matmul %196, %14, %cst_59 {dimension_numbers = #tpu.dot_dimension_numbers<[1], [0], [0], [1], [0, 0, 1, 1], [], []>} : vector<2x32xbf16>, vector<32x32xbf16>, vector<2x32xf32> -> vector<2x32xf32>
    %202 = arith.addf %200, %201 : vector<2x32xf32>
    %203 = vector.extract_strided_slice %9 {offsets = [10, 0], sizes = [2, 32], strides = [1, 1]} : vector<16x32xf32> to vector<2x32xf32>
    %cst_60 = arith.constant dense<0.000000e+00> : vector<2x32xf32>
    %204 = tpu.matmul %196, %16, %cst_60 {dimension_numbers = #tpu.dot_dimension_numbers<[1], [0], [0], [1], [0, 0, 1, 1], [], []>} : vector<2x32xbf16>, vector<32x32xbf16>, vector<2x32xf32> -> vector<2x32xf32>
    %205 = arith.addf %203, %204 : vector<2x32xf32>
    %206 = vector.extract_strided_slice %10 {offsets = [10, 0], sizes = [2, 32], strides = [1, 1]} : vector<16x32xf32> to vector<2x32xf32>
    %cst_61 = arith.constant dense<0.000000e+00> : vector<2x32xf32>
    %207 = tpu.matmul %196, %18, %cst_61 {dimension_numbers = #tpu.dot_dimension_numbers<[1], [0], [0], [1], [0, 0, 1, 1], [], []>} : vector<2x32xbf16>, vector<32x32xbf16>, vector<2x32xf32> -> vector<2x32xf32>
    %208 = arith.addf %206, %207 : vector<2x32xf32>
    %209 = arith.negf %199 : vector<2x32xf32>
    %210 = math.exp %209 : vector<2x32xf32>
    %cst_62 = arith.constant 1.000000e+00 : f32
    %211 = vector.broadcast %cst_62 : f32 to vector<2x32xf32>
    %212 = arith.addf %211, %210 : vector<2x32xf32>
    %213 = arith.divf %211, %212 : vector<2x32xf32>
    %214 = arith.negf %202 : vector<2x32xf32>
    %215 = math.exp %214 : vector<2x32xf32>
    %cst_63 = arith.constant 1.000000e+00 : f32
    %216 = vector.broadcast %cst_63 : f32 to vector<2x32xf32>
    %217 = arith.addf %216, %215 : vector<2x32xf32>
    %218 = arith.divf %216, %217 : vector<2x32xf32>
    %219 = math.tanh %205 : vector<2x32xf32>
    %220 = arith.negf %208 : vector<2x32xf32>
    %221 = math.exp %220 : vector<2x32xf32>
    %cst_64 = arith.constant 1.000000e+00 : f32
    %222 = vector.broadcast %cst_64 : f32 to vector<2x32xf32>
    %223 = arith.addf %222, %221 : vector<2x32xf32>
    %224 = arith.divf %222, %223 : vector<2x32xf32>
    %225 = arith.mulf %218, %192 : vector<2x32xf32>
    %226 = arith.mulf %213, %219 : vector<2x32xf32>
    %227 = arith.addf %225, %226 : vector<2x32xf32>
    %228 = math.tanh %227 : vector<2x32xf32>
    %229 = arith.mulf %224, %228 : vector<2x32xf32>
    %c10 = arith.constant 10 : index
    %c0_65 = arith.constant 0 : index
    %230 = vector.load %arg10[%c10, %c0_65] : memref<16x32xf32, #tpu.memory_space<vmem>>, vector<2x32xf32>
    tpu.vector_store %arg10[%c10, %c0_65], %229 {strides = array<i32>} : memref<16x32xf32, #tpu.memory_space<vmem>>, vector<2x32xf32>,
    %231 = arith.truncf %229 : vector<2x32xf32> to vector<2x32xbf16>
    %232 = vector.extract_strided_slice %7 {offsets = [12, 0], sizes = [2, 32], strides = [1, 1]} : vector<16x32xf32> to vector<2x32xf32>
    %cst_66 = arith.constant dense<0.000000e+00> : vector<2x32xf32>
    %233 = tpu.matmul %231, %12, %cst_66 {dimension_numbers = #tpu.dot_dimension_numbers<[1], [0], [0], [1], [0, 0, 1, 1], [], []>} : vector<2x32xbf16>, vector<32x32xbf16>, vector<2x32xf32> -> vector<2x32xf32>
    %234 = arith.addf %232, %233 : vector<2x32xf32>
    %235 = vector.extract_strided_slice %8 {offsets = [12, 0], sizes = [2, 32], strides = [1, 1]} : vector<16x32xf32> to vector<2x32xf32>
    %cst_67 = arith.constant dense<0.000000e+00> : vector<2x32xf32>
    %236 = tpu.matmul %231, %14, %cst_67 {dimension_numbers = #tpu.dot_dimension_numbers<[1], [0], [0], [1], [0, 0, 1, 1], [], []>} : vector<2x32xbf16>, vector<32x32xbf16>, vector<2x32xf32> -> vector<2x32xf32>
    %237 = arith.addf %235, %236 : vector<2x32xf32>
    %238 = vector.extract_strided_slice %9 {offsets = [12, 0], sizes = [2, 32], strides = [1, 1]} : vector<16x32xf32> to vector<2x32xf32>
    %cst_68 = arith.constant dense<0.000000e+00> : vector<2x32xf32>
    %239 = tpu.matmul %231, %16, %cst_68 {dimension_numbers = #tpu.dot_dimension_numbers<[1], [0], [0], [1], [0, 0, 1, 1], [], []>} : vector<2x32xbf16>, vector<32x32xbf16>, vector<2x32xf32> -> vector<2x32xf32>
    %240 = arith.addf %238, %239 : vector<2x32xf32>
    %241 = vector.extract_strided_slice %10 {offsets = [12, 0], sizes = [2, 32], strides = [1, 1]} : vector<16x32xf32> to vector<2x32xf32>
    %cst_69 = arith.constant dense<0.000000e+00> : vector<2x32xf32>
    %242 = tpu.matmul %231, %18, %cst_69 {dimension_numbers = #tpu.dot_dimension_numbers<[1], [0], [0], [1], [0, 0, 1, 1], [], []>} : vector<2x32xbf16>, vector<32x32xbf16>, vector<2x32xf32> -> vector<2x32xf32>
    %243 = arith.addf %241, %242 : vector<2x32xf32>
    %244 = arith.negf %234 : vector<2x32xf32>
    %245 = math.exp %244 : vector<2x32xf32>
    %cst_70 = arith.constant 1.000000e+00 : f32
    %246 = vector.broadcast %cst_70 : f32 to vector<2x32xf32>
    %247 = arith.addf %246, %245 : vector<2x32xf32>
    %248 = arith.divf %246, %247 : vector<2x32xf32>
    %249 = arith.negf %237 : vector<2x32xf32>
    %250 = math.exp %249 : vector<2x32xf32>
    %cst_71 = arith.constant 1.000000e+00 : f32
    %251 = vector.broadcast %cst_71 : f32 to vector<2x32xf32>
    %252 = arith.addf %251, %250 : vector<2x32xf32>
    %253 = arith.divf %251, %252 : vector<2x32xf32>
    %254 = math.tanh %240 : vector<2x32xf32>
    %255 = arith.negf %243 : vector<2x32xf32>
    %256 = math.exp %255 : vector<2x32xf32>
    %cst_72 = arith.constant 1.000000e+00 : f32
    %257 = vector.broadcast %cst_72 : f32 to vector<2x32xf32>
    %258 = arith.addf %257, %256 : vector<2x32xf32>
    %259 = arith.divf %257, %258 : vector<2x32xf32>
    %260 = arith.mulf %253, %227 : vector<2x32xf32>
    %261 = arith.mulf %248, %254 : vector<2x32xf32>
    %262 = arith.addf %260, %261 : vector<2x32xf32>
    %263 = math.tanh %262 : vector<2x32xf32>
    %264 = arith.mulf %259, %263 : vector<2x32xf32>
    %c12 = arith.constant 12 : index
    %c0_73 = arith.constant 0 : index
    %265 = vector.load %arg10[%c12, %c0_73] : memref<16x32xf32, #tpu.memory_space<vmem>>, vector<2x32xf32>
    tpu.vector_store %arg10[%c12, %c0_73], %264 {strides = array<i32>} : memref<16x32xf32, #tpu.memory_space<vmem>>, vector<2x32xf32>,
    %266 = arith.truncf %264 : vector<2x32xf32> to vector<2x32xbf16>
    %267 = vector.extract_strided_slice %7 {offsets = [14, 0], sizes = [2, 32], strides = [1, 1]} : vector<16x32xf32> to vector<2x32xf32>
    %cst_74 = arith.constant dense<0.000000e+00> : vector<2x32xf32>
    %268 = tpu.matmul %266, %12, %cst_74 {dimension_numbers = #tpu.dot_dimension_numbers<[1], [0], [0], [1], [0, 0, 1, 1], [], []>} : vector<2x32xbf16>, vector<32x32xbf16>, vector<2x32xf32> -> vector<2x32xf32>
    %269 = arith.addf %267, %268 : vector<2x32xf32>
    %270 = vector.extract_strided_slice %8 {offsets = [14, 0], sizes = [2, 32], strides = [1, 1]} : vector<16x32xf32> to vector<2x32xf32>
    %cst_75 = arith.constant dense<0.000000e+00> : vector<2x32xf32>
    %271 = tpu.matmul %266, %14, %cst_75 {dimension_numbers = #tpu.dot_dimension_numbers<[1], [0], [0], [1], [0, 0, 1, 1], [], []>} : vector<2x32xbf16>, vector<32x32xbf16>, vector<2x32xf32> -> vector<2x32xf32>
    %272 = arith.addf %270, %271 : vector<2x32xf32>
    %273 = vector.extract_strided_slice %9 {offsets = [14, 0], sizes = [2, 32], strides = [1, 1]} : vector<16x32xf32> to vector<2x32xf32>
    %cst_76 = arith.constant dense<0.000000e+00> : vector<2x32xf32>
    %274 = tpu.matmul %266, %16, %cst_76 {dimension_numbers = #tpu.dot_dimension_numbers<[1], [0], [0], [1], [0, 0, 1, 1], [], []>} : vector<2x32xbf16>, vector<32x32xbf16>, vector<2x32xf32> -> vector<2x32xf32>
    %275 = arith.addf %273, %274 : vector<2x32xf32>
    %276 = vector.extract_strided_slice %10 {offsets = [14, 0], sizes = [2, 32], strides = [1, 1]} : vector<16x32xf32> to vector<2x32xf32>
    %cst_77 = arith.constant dense<0.000000e+00> : vector<2x32xf32>
    %277 = tpu.matmul %266, %18, %cst_77 {dimension_numbers = #tpu.dot_dimension_numbers<[1], [0], [0], [1], [0, 0, 1, 1], [], []>} : vector<2x32xbf16>, vector<32x32xbf16>, vector<2x32xf32> -> vector<2x32xf32>
    %278 = arith.addf %276, %277 : vector<2x32xf32>
    %279 = arith.negf %269 : vector<2x32xf32>
    %280 = math.exp %279 : vector<2x32xf32>
    %cst_78 = arith.constant 1.000000e+00 : f32
    %281 = vector.broadcast %cst_78 : f32 to vector<2x32xf32>
    %282 = arith.addf %281, %280 : vector<2x32xf32>
    %283 = arith.divf %281, %282 : vector<2x32xf32>
    %284 = arith.negf %272 : vector<2x32xf32>
    %285 = math.exp %284 : vector<2x32xf32>
    %cst_79 = arith.constant 1.000000e+00 : f32
    %286 = vector.broadcast %cst_79 : f32 to vector<2x32xf32>
    %287 = arith.addf %286, %285 : vector<2x32xf32>
    %288 = arith.divf %286, %287 : vector<2x32xf32>
    %289 = math.tanh %275 : vector<2x32xf32>
    %290 = arith.negf %278 : vector<2x32xf32>
    %291 = math.exp %290 : vector<2x32xf32>
    %cst_80 = arith.constant 1.000000e+00 : f32
    %292 = vector.broadcast %cst_80 : f32 to vector<2x32xf32>
    %293 = arith.addf %292, %291 : vector<2x32xf32>
    %294 = arith.divf %292, %293 : vector<2x32xf32>
    %295 = arith.mulf %288, %262 : vector<2x32xf32>
    %296 = arith.mulf %283, %289 : vector<2x32xf32>
    %297 = arith.addf %295, %296 : vector<2x32xf32>
    %298 = math.tanh %297 : vector<2x32xf32>
    %299 = arith.mulf %294, %298 : vector<2x32xf32>
    %c14 = arith.constant 14 : index
    %c0_81 = arith.constant 0 : index
    %300 = vector.load %arg10[%c14, %c0_81] : memref<16x32xf32, #tpu.memory_space<vmem>>, vector<2x32xf32>
    tpu.vector_store %arg10[%c14, %c0_81], %299 {strides = array<i32>} : memref<16x32xf32, #tpu.memory_space<vmem>>, vector<2x32xf32>,
    %c0_82 = arith.constant 0 : index
    %c0_83 = arith.constant 0 : index
    %301 = vector.load %arg10[%c0_82, %c0_83] : memref<16x32xf32, #tpu.memory_space<vmem>>, vector<16x32xf32>
    %302 = arith.truncf %301 : vector<16x32xf32> to vector<16x32xbf16>
    %c0_84 = arith.constant 0 : index
    %c0_85 = arith.constant 0 : index
    %303 = vector.load %arg4[%c0_84, %c0_85] : memref<32x128xbf16, #tpu.memory_space<vmem>>, vector<32x128xbf16>
    %c0_86 = arith.constant 0 : index
    %c0_87 = arith.constant 0 : index
    %304 = vector.load %arg6[%c0_86, %c0_87] : memref<1x128xf32, #tpu.memory_space<vmem>>, vector<1x128xf32>
    %cst_88 = arith.constant dense<0.000000e+00> : vector<16x128xf32>
    %305 = tpu.matmul %302, %303, %cst_88 {dimension_numbers = #tpu.dot_dimension_numbers<[1], [0], [0], [1], [0, 0, 1, 1], [], []>} : vector<16x32xbf16>, vector<32x128xbf16>, vector<16x128xf32> -> vector<16x128xf32>
    %306 = vector.broadcast %304 : vector<1x128xf32> to vector<16x128xf32>
    %307 = arith.addf %305, %306 : vector<16x128xf32>
    %308 = vector.extract_strided_slice %307 {offsets = [0, 0], sizes = [16, 32], strides = [1, 1]} : vector<16x128xf32> to vector<16x32xf32>
    %309 = vector.extract_strided_slice %307 {offsets = [0, 32], sizes = [16, 32], strides = [1, 1]} : vector<16x128xf32> to vector<16x32xf32>
    %310 = vector.extract_strided_slice %307 {offsets = [0, 64], sizes = [16, 32], strides = [1, 1]} : vector<16x128xf32> to vector<16x32xf32>
    %311 = vector.extract_strided_slice %307 {offsets = [0, 96], sizes = [16, 32], strides = [1, 1]} : vector<16x128xf32> to vector<16x32xf32>
    %c0_89 = arith.constant 0 : index
    %c0_90 = arith.constant 0 : index
    %c0_91 = arith.constant 0 : index
    %312 = vector.load %arg5[%c0_89, %c0_90, %c0_91] : memref<4x32x32xbf16, #tpu.memory_space<vmem>>, vector<1x32x32xbf16>
    %313 = vector.shape_cast %312 : vector<1x32x32xbf16> to vector<32x32xbf16>
    %c1_92 = arith.constant 1 : index
    %c0_93 = arith.constant 0 : index
    %c0_94 = arith.constant 0 : index
    %314 = vector.load %arg5[%c1_92, %c0_93, %c0_94] : memref<4x32x32xbf16, #tpu.memory_space<vmem>>, vector<1x32x32xbf16>
    %315 = vector.shape_cast %314 : vector<1x32x32xbf16> to vector<32x32xbf16>
    %c2_95 = arith.constant 2 : index
    %c0_96 = arith.constant 0 : index
    %c0_97 = arith.constant 0 : index
    %316 = vector.load %arg5[%c2_95, %c0_96, %c0_97] : memref<4x32x32xbf16, #tpu.memory_space<vmem>>, vector<1x32x32xbf16>
    %317 = vector.shape_cast %316 : vector<1x32x32xbf16> to vector<32x32xbf16>
    %c3_98 = arith.constant 3 : index
    %c0_99 = arith.constant 0 : index
    %c0_100 = arith.constant 0 : index
    %318 = vector.load %arg5[%c3_98, %c0_99, %c0_100] : memref<4x32x32xbf16, #tpu.memory_space<vmem>>, vector<1x32x32xbf16>
    %319 = vector.shape_cast %318 : vector<1x32x32xbf16> to vector<32x32xbf16>
    %cst_101 = arith.constant 0.000000e+00 : f32
    %320 = vector.broadcast %cst_101 : f32 to vector<2x32xf32>
    %cst_102 = arith.constant 0.000000e+00 : f32
    %321 = vector.broadcast %cst_102 : f32 to vector<2x32xf32>
    %322 = arith.truncf %320 : vector<2x32xf32> to vector<2x32xbf16>
    %323 = vector.extract_strided_slice %308 {offsets = [0, 0], sizes = [2, 32], strides = [1, 1]} : vector<16x32xf32> to vector<2x32xf32>
    %cst_103 = arith.constant dense<0.000000e+00> : vector<2x32xf32>
    %324 = tpu.matmul %322, %313, %cst_103 {dimension_numbers = #tpu.dot_dimension_numbers<[1], [0], [0], [1], [0, 0, 1, 1], [], []>} : vector<2x32xbf16>, vector<32x32xbf16>, vector<2x32xf32> -> vector<2x32xf32>
    %325 = arith.addf %323, %324 : vector<2x32xf32>
    %326 = vector.extract_strided_slice %309 {offsets = [0, 0], sizes = [2, 32], strides = [1, 1]} : vector<16x32xf32> to vector<2x32xf32>
    %cst_104 = arith.constant dense<0.000000e+00> : vector<2x32xf32>
    %327 = tpu.matmul %322, %315, %cst_104 {dimension_numbers = #tpu.dot_dimension_numbers<[1], [0], [0], [1], [0, 0, 1, 1], [], []>} : vector<2x32xbf16>, vector<32x32xbf16>, vector<2x32xf32> -> vector<2x32xf32>
    %328 = arith.addf %326, %327 : vector<2x32xf32>
    %329 = vector.extract_strided_slice %310 {offsets = [0, 0], sizes = [2, 32], strides = [1, 1]} : vector<16x32xf32> to vector<2x32xf32>
    %cst_105 = arith.constant dense<0.000000e+00> : vector<2x32xf32>
    %330 = tpu.matmul %322, %317, %cst_105 {dimension_numbers = #tpu.dot_dimension_numbers<[1], [0], [0], [1], [0, 0, 1, 1], [], []>} : vector<2x32xbf16>, vector<32x32xbf16>, vector<2x32xf32> -> vector<2x32xf32>
    %331 = arith.addf %329, %330 : vector<2x32xf32>
    %332 = vector.extract_strided_slice %311 {offsets = [0, 0], sizes = [2, 32], strides = [1, 1]} : vector<16x32xf32> to vector<2x32xf32>
    %cst_106 = arith.constant dense<0.000000e+00> : vector<2x32xf32>
    %333 = tpu.matmul %322, %319, %cst_106 {dimension_numbers = #tpu.dot_dimension_numbers<[1], [0], [0], [1], [0, 0, 1, 1], [], []>} : vector<2x32xbf16>, vector<32x32xbf16>, vector<2x32xf32> -> vector<2x32xf32>
    %334 = arith.addf %332, %333 : vector<2x32xf32>
    %335 = arith.negf %325 : vector<2x32xf32>
    %336 = math.exp %335 : vector<2x32xf32>
    %cst_107 = arith.constant 1.000000e+00 : f32
    %337 = vector.broadcast %cst_107 : f32 to vector<2x32xf32>
    %338 = arith.addf %337, %336 : vector<2x32xf32>
    %339 = arith.divf %337, %338 : vector<2x32xf32>
    %340 = arith.negf %328 : vector<2x32xf32>
    %341 = math.exp %340 : vector<2x32xf32>
    %cst_108 = arith.constant 1.000000e+00 : f32
    %342 = vector.broadcast %cst_108 : f32 to vector<2x32xf32>
    %343 = arith.addf %342, %341 : vector<2x32xf32>
    %344 = arith.divf %342, %343 : vector<2x32xf32>
    %345 = math.tanh %331 : vector<2x32xf32>
    %346 = arith.negf %334 : vector<2x32xf32>
    %347 = math.exp %346 : vector<2x32xf32>
    %cst_109 = arith.constant 1.000000e+00 : f32
    %348 = vector.broadcast %cst_109 : f32 to vector<2x32xf32>
    %349 = arith.addf %348, %347 : vector<2x32xf32>
    %350 = arith.divf %348, %349 : vector<2x32xf32>
    %351 = arith.mulf %344, %321 : vector<2x32xf32>
    %352 = arith.mulf %339, %345 : vector<2x32xf32>
    %353 = arith.addf %351, %352 : vector<2x32xf32>
    %354 = math.tanh %353 : vector<2x32xf32>
    %355 = arith.mulf %350, %354 : vector<2x32xf32>
    %356 = arith.truncf %355 : vector<2x32xf32> to vector<2x32xbf16>
    %357 = vector.extract_strided_slice %308 {offsets = [2, 0], sizes = [2, 32], strides = [1, 1]} : vector<16x32xf32> to vector<2x32xf32>
    %cst_110 = arith.constant dense<0.000000e+00> : vector<2x32xf32>
    %358 = tpu.matmul %356, %313, %cst_110 {dimension_numbers = #tpu.dot_dimension_numbers<[1], [0], [0], [1], [0, 0, 1, 1], [], []>} : vector<2x32xbf16>, vector<32x32xbf16>, vector<2x32xf32> -> vector<2x32xf32>
    %359 = arith.addf %357, %358 : vector<2x32xf32>
    %360 = vector.extract_strided_slice %309 {offsets = [2, 0], sizes = [2, 32], strides = [1, 1]} : vector<16x32xf32> to vector<2x32xf32>
    %cst_111 = arith.constant dense<0.000000e+00> : vector<2x32xf32>
    %361 = tpu.matmul %356, %315, %cst_111 {dimension_numbers = #tpu.dot_dimension_numbers<[1], [0], [0], [1], [0, 0, 1, 1], [], []>} : vector<2x32xbf16>, vector<32x32xbf16>, vector<2x32xf32> -> vector<2x32xf32>
    %362 = arith.addf %360, %361 : vector<2x32xf32>
    %363 = vector.extract_strided_slice %310 {offsets = [2, 0], sizes = [2, 32], strides = [1, 1]} : vector<16x32xf32> to vector<2x32xf32>
    %cst_112 = arith.constant dense<0.000000e+00> : vector<2x32xf32>
    %364 = tpu.matmul %356, %317, %cst_112 {dimension_numbers = #tpu.dot_dimension_numbers<[1], [0], [0], [1], [0, 0, 1, 1], [], []>} : vector<2x32xbf16>, vector<32x32xbf16>, vector<2x32xf32> -> vector<2x32xf32>
    %365 = arith.addf %363, %364 : vector<2x32xf32>
    %366 = vector.extract_strided_slice %311 {offsets = [2, 0], sizes = [2, 32], strides = [1, 1]} : vector<16x32xf32> to vector<2x32xf32>
    %cst_113 = arith.constant dense<0.000000e+00> : vector<2x32xf32>
    %367 = tpu.matmul %356, %319, %cst_113 {dimension_numbers = #tpu.dot_dimension_numbers<[1], [0], [0], [1], [0, 0, 1, 1], [], []>} : vector<2x32xbf16>, vector<32x32xbf16>, vector<2x32xf32> -> vector<2x32xf32>
    %368 = arith.addf %366, %367 : vector<2x32xf32>
    %369 = arith.negf %359 : vector<2x32xf32>
    %370 = math.exp %369 : vector<2x32xf32>
    %cst_114 = arith.constant 1.000000e+00 : f32
    %371 = vector.broadcast %cst_114 : f32 to vector<2x32xf32>
    %372 = arith.addf %371, %370 : vector<2x32xf32>
    %373 = arith.divf %371, %372 : vector<2x32xf32>
    %374 = arith.negf %362 : vector<2x32xf32>
    %375 = math.exp %374 : vector<2x32xf32>
    %cst_115 = arith.constant 1.000000e+00 : f32
    %376 = vector.broadcast %cst_115 : f32 to vector<2x32xf32>
    %377 = arith.addf %376, %375 : vector<2x32xf32>
    %378 = arith.divf %376, %377 : vector<2x32xf32>
    %379 = math.tanh %365 : vector<2x32xf32>
    %380 = arith.negf %368 : vector<2x32xf32>
    %381 = math.exp %380 : vector<2x32xf32>
    %cst_116 = arith.constant 1.000000e+00 : f32
    %382 = vector.broadcast %cst_116 : f32 to vector<2x32xf32>
    %383 = arith.addf %382, %381 : vector<2x32xf32>
    %384 = arith.divf %382, %383 : vector<2x32xf32>
    %385 = arith.mulf %378, %353 : vector<2x32xf32>
    %386 = arith.mulf %373, %379 : vector<2x32xf32>
    %387 = arith.addf %385, %386 : vector<2x32xf32>
    %388 = math.tanh %387 : vector<2x32xf32>
    %389 = arith.mulf %384, %388 : vector<2x32xf32>
    %390 = arith.truncf %389 : vector<2x32xf32> to vector<2x32xbf16>
    %391 = vector.extract_strided_slice %308 {offsets = [4, 0], sizes = [2, 32], strides = [1, 1]} : vector<16x32xf32> to vector<2x32xf32>
    %cst_117 = arith.constant dense<0.000000e+00> : vector<2x32xf32>
    %392 = tpu.matmul %390, %313, %cst_117 {dimension_numbers = #tpu.dot_dimension_numbers<[1], [0], [0], [1], [0, 0, 1, 1], [], []>} : vector<2x32xbf16>, vector<32x32xbf16>, vector<2x32xf32> -> vector<2x32xf32>
    %393 = arith.addf %391, %392 : vector<2x32xf32>
    %394 = vector.extract_strided_slice %309 {offsets = [4, 0], sizes = [2, 32], strides = [1, 1]} : vector<16x32xf32> to vector<2x32xf32>
    %cst_118 = arith.constant dense<0.000000e+00> : vector<2x32xf32>
    %395 = tpu.matmul %390, %315, %cst_118 {dimension_numbers = #tpu.dot_dimension_numbers<[1], [0], [0], [1], [0, 0, 1, 1], [], []>} : vector<2x32xbf16>, vector<32x32xbf16>, vector<2x32xf32> -> vector<2x32xf32>
    %396 = arith.addf %394, %395 : vector<2x32xf32>
    %397 = vector.extract_strided_slice %310 {offsets = [4, 0], sizes = [2, 32], strides = [1, 1]} : vector<16x32xf32> to vector<2x32xf32>
    %cst_119 = arith.constant dense<0.000000e+00> : vector<2x32xf32>
    %398 = tpu.matmul %390, %317, %cst_119 {dimension_numbers = #tpu.dot_dimension_numbers<[1], [0], [0], [1], [0, 0, 1, 1], [], []>} : vector<2x32xbf16>, vector<32x32xbf16>, vector<2x32xf32> -> vector<2x32xf32>
    %399 = arith.addf %397, %398 : vector<2x32xf32>
    %400 = vector.extract_strided_slice %311 {offsets = [4, 0], sizes = [2, 32], strides = [1, 1]} : vector<16x32xf32> to vector<2x32xf32>
    %cst_120 = arith.constant dense<0.000000e+00> : vector<2x32xf32>
    %401 = tpu.matmul %390, %319, %cst_120 {dimension_numbers = #tpu.dot_dimension_numbers<[1], [0], [0], [1], [0, 0, 1, 1], [], []>} : vector<2x32xbf16>, vector<32x32xbf16>, vector<2x32xf32> -> vector<2x32xf32>
    %402 = arith.addf %400, %401 : vector<2x32xf32>
    %403 = arith.negf %393 : vector<2x32xf32>
    %404 = math.exp %403 : vector<2x32xf32>
    %cst_121 = arith.constant 1.000000e+00 : f32
    %405 = vector.broadcast %cst_121 : f32 to vector<2x32xf32>
    %406 = arith.addf %405, %404 : vector<2x32xf32>
    %407 = arith.divf %405, %406 : vector<2x32xf32>
    %408 = arith.negf %396 : vector<2x32xf32>
    %409 = math.exp %408 : vector<2x32xf32>
    %cst_122 = arith.constant 1.000000e+00 : f32
    %410 = vector.broadcast %cst_122 : f32 to vector<2x32xf32>
    %411 = arith.addf %410, %409 : vector<2x32xf32>
    %412 = arith.divf %410, %411 : vector<2x32xf32>
    %413 = math.tanh %399 : vector<2x32xf32>
    %414 = arith.negf %402 : vector<2x32xf32>
    %415 = math.exp %414 : vector<2x32xf32>
    %cst_123 = arith.constant 1.000000e+00 : f32
    %416 = vector.broadcast %cst_123 : f32 to vector<2x32xf32>
    %417 = arith.addf %416, %415 : vector<2x32xf32>
    %418 = arith.divf %416, %417 : vector<2x32xf32>
    %419 = arith.mulf %412, %387 : vector<2x32xf32>
    %420 = arith.mulf %407, %413 : vector<2x32xf32>
    %421 = arith.addf %419, %420 : vector<2x32xf32>
    %422 = math.tanh %421 : vector<2x32xf32>
    %423 = arith.mulf %418, %422 : vector<2x32xf32>
    %424 = arith.truncf %423 : vector<2x32xf32> to vector<2x32xbf16>
    %425 = vector.extract_strided_slice %308 {offsets = [6, 0], sizes = [2, 32], strides = [1, 1]} : vector<16x32xf32> to vector<2x32xf32>
    %cst_124 = arith.constant dense<0.000000e+00> : vector<2x32xf32>
    %426 = tpu.matmul %424, %313, %cst_124 {dimension_numbers = #tpu.dot_dimension_numbers<[1], [0], [0], [1], [0, 0, 1, 1], [], []>} : vector<2x32xbf16>, vector<32x32xbf16>, vector<2x32xf32> -> vector<2x32xf32>
    %427 = arith.addf %425, %426 : vector<2x32xf32>
    %428 = vector.extract_strided_slice %309 {offsets = [6, 0], sizes = [2, 32], strides = [1, 1]} : vector<16x32xf32> to vector<2x32xf32>
    %cst_125 = arith.constant dense<0.000000e+00> : vector<2x32xf32>
    %429 = tpu.matmul %424, %315, %cst_125 {dimension_numbers = #tpu.dot_dimension_numbers<[1], [0], [0], [1], [0, 0, 1, 1], [], []>} : vector<2x32xbf16>, vector<32x32xbf16>, vector<2x32xf32> -> vector<2x32xf32>
    %430 = arith.addf %428, %429 : vector<2x32xf32>
    %431 = vector.extract_strided_slice %310 {offsets = [6, 0], sizes = [2, 32], strides = [1, 1]} : vector<16x32xf32> to vector<2x32xf32>
    %cst_126 = arith.constant dense<0.000000e+00> : vector<2x32xf32>
    %432 = tpu.matmul %424, %317, %cst_126 {dimension_numbers = #tpu.dot_dimension_numbers<[1], [0], [0], [1], [0, 0, 1, 1], [], []>} : vector<2x32xbf16>, vector<32x32xbf16>, vector<2x32xf32> -> vector<2x32xf32>
    %433 = arith.addf %431, %432 : vector<2x32xf32>
    %434 = vector.extract_strided_slice %311 {offsets = [6, 0], sizes = [2, 32], strides = [1, 1]} : vector<16x32xf32> to vector<2x32xf32>
    %cst_127 = arith.constant dense<0.000000e+00> : vector<2x32xf32>
    %435 = tpu.matmul %424, %319, %cst_127 {dimension_numbers = #tpu.dot_dimension_numbers<[1], [0], [0], [1], [0, 0, 1, 1], [], []>} : vector<2x32xbf16>, vector<32x32xbf16>, vector<2x32xf32> -> vector<2x32xf32>
    %436 = arith.addf %434, %435 : vector<2x32xf32>
    %437 = arith.negf %427 : vector<2x32xf32>
    %438 = math.exp %437 : vector<2x32xf32>
    %cst_128 = arith.constant 1.000000e+00 : f32
    %439 = vector.broadcast %cst_128 : f32 to vector<2x32xf32>
    %440 = arith.addf %439, %438 : vector<2x32xf32>
    %441 = arith.divf %439, %440 : vector<2x32xf32>
    %442 = arith.negf %430 : vector<2x32xf32>
    %443 = math.exp %442 : vector<2x32xf32>
    %cst_129 = arith.constant 1.000000e+00 : f32
    %444 = vector.broadcast %cst_129 : f32 to vector<2x32xf32>
    %445 = arith.addf %444, %443 : vector<2x32xf32>
    %446 = arith.divf %444, %445 : vector<2x32xf32>
    %447 = math.tanh %433 : vector<2x32xf32>
    %448 = arith.negf %436 : vector<2x32xf32>
    %449 = math.exp %448 : vector<2x32xf32>
    %cst_130 = arith.constant 1.000000e+00 : f32
    %450 = vector.broadcast %cst_130 : f32 to vector<2x32xf32>
    %451 = arith.addf %450, %449 : vector<2x32xf32>
    %452 = arith.divf %450, %451 : vector<2x32xf32>
    %453 = arith.mulf %446, %421 : vector<2x32xf32>
    %454 = arith.mulf %441, %447 : vector<2x32xf32>
    %455 = arith.addf %453, %454 : vector<2x32xf32>
    %456 = math.tanh %455 : vector<2x32xf32>
    %457 = arith.mulf %452, %456 : vector<2x32xf32>
    %458 = arith.truncf %457 : vector<2x32xf32> to vector<2x32xbf16>
    %459 = vector.extract_strided_slice %308 {offsets = [8, 0], sizes = [2, 32], strides = [1, 1]} : vector<16x32xf32> to vector<2x32xf32>
    %cst_131 = arith.constant dense<0.000000e+00> : vector<2x32xf32>
    %460 = tpu.matmul %458, %313, %cst_131 {dimension_numbers = #tpu.dot_dimension_numbers<[1], [0], [0], [1], [0, 0, 1, 1], [], []>} : vector<2x32xbf16>, vector<32x32xbf16>, vector<2x32xf32> -> vector<2x32xf32>
    %461 = arith.addf %459, %460 : vector<2x32xf32>
    %462 = vector.extract_strided_slice %309 {offsets = [8, 0], sizes = [2, 32], strides = [1, 1]} : vector<16x32xf32> to vector<2x32xf32>
    %cst_132 = arith.constant dense<0.000000e+00> : vector<2x32xf32>
    %463 = tpu.matmul %458, %315, %cst_132 {dimension_numbers = #tpu.dot_dimension_numbers<[1], [0], [0], [1], [0, 0, 1, 1], [], []>} : vector<2x32xbf16>, vector<32x32xbf16>, vector<2x32xf32> -> vector<2x32xf32>
    %464 = arith.addf %462, %463 : vector<2x32xf32>
    %465 = vector.extract_strided_slice %310 {offsets = [8, 0], sizes = [2, 32], strides = [1, 1]} : vector<16x32xf32> to vector<2x32xf32>
    %cst_133 = arith.constant dense<0.000000e+00> : vector<2x32xf32>
    %466 = tpu.matmul %458, %317, %cst_133 {dimension_numbers = #tpu.dot_dimension_numbers<[1], [0], [0], [1], [0, 0, 1, 1], [], []>} : vector<2x32xbf16>, vector<32x32xbf16>, vector<2x32xf32> -> vector<2x32xf32>
    %467 = arith.addf %465, %466 : vector<2x32xf32>
    %468 = vector.extract_strided_slice %311 {offsets = [8, 0], sizes = [2, 32], strides = [1, 1]} : vector<16x32xf32> to vector<2x32xf32>
    %cst_134 = arith.constant dense<0.000000e+00> : vector<2x32xf32>
    %469 = tpu.matmul %458, %319, %cst_134 {dimension_numbers = #tpu.dot_dimension_numbers<[1], [0], [0], [1], [0, 0, 1, 1], [], []>} : vector<2x32xbf16>, vector<32x32xbf16>, vector<2x32xf32> -> vector<2x32xf32>
    %470 = arith.addf %468, %469 : vector<2x32xf32>
    %471 = arith.negf %461 : vector<2x32xf32>
    %472 = math.exp %471 : vector<2x32xf32>
    %cst_135 = arith.constant 1.000000e+00 : f32
    %473 = vector.broadcast %cst_135 : f32 to vector<2x32xf32>
    %474 = arith.addf %473, %472 : vector<2x32xf32>
    %475 = arith.divf %473, %474 : vector<2x32xf32>
    %476 = arith.negf %464 : vector<2x32xf32>
    %477 = math.exp %476 : vector<2x32xf32>
    %cst_136 = arith.constant 1.000000e+00 : f32
    %478 = vector.broadcast %cst_136 : f32 to vector<2x32xf32>
    %479 = arith.addf %478, %477 : vector<2x32xf32>
    %480 = arith.divf %478, %479 : vector<2x32xf32>
    %481 = math.tanh %467 : vector<2x32xf32>
    %482 = arith.negf %470 : vector<2x32xf32>
    %483 = math.exp %482 : vector<2x32xf32>
    %cst_137 = arith.constant 1.000000e+00 : f32
    %484 = vector.broadcast %cst_137 : f32 to vector<2x32xf32>
    %485 = arith.addf %484, %483 : vector<2x32xf32>
    %486 = arith.divf %484, %485 : vector<2x32xf32>
    %487 = arith.mulf %480, %455 : vector<2x32xf32>
    %488 = arith.mulf %475, %481 : vector<2x32xf32>
    %489 = arith.addf %487, %488 : vector<2x32xf32>
    %490 = math.tanh %489 : vector<2x32xf32>
    %491 = arith.mulf %486, %490 : vector<2x32xf32>
    %492 = arith.truncf %491 : vector<2x32xf32> to vector<2x32xbf16>
    %493 = vector.extract_strided_slice %308 {offsets = [10, 0], sizes = [2, 32], strides = [1, 1]} : vector<16x32xf32> to vector<2x32xf32>
    %cst_138 = arith.constant dense<0.000000e+00> : vector<2x32xf32>
    %494 = tpu.matmul %492, %313, %cst_138 {dimension_numbers = #tpu.dot_dimension_numbers<[1], [0], [0], [1], [0, 0, 1, 1], [], []>} : vector<2x32xbf16>, vector<32x32xbf16>, vector<2x32xf32> -> vector<2x32xf32>
    %495 = arith.addf %493, %494 : vector<2x32xf32>
    %496 = vector.extract_strided_slice %309 {offsets = [10, 0], sizes = [2, 32], strides = [1, 1]} : vector<16x32xf32> to vector<2x32xf32>
    %cst_139 = arith.constant dense<0.000000e+00> : vector<2x32xf32>
    %497 = tpu.matmul %492, %315, %cst_139 {dimension_numbers = #tpu.dot_dimension_numbers<[1], [0], [0], [1], [0, 0, 1, 1], [], []>} : vector<2x32xbf16>, vector<32x32xbf16>, vector<2x32xf32> -> vector<2x32xf32>
    %498 = arith.addf %496, %497 : vector<2x32xf32>
    %499 = vector.extract_strided_slice %310 {offsets = [10, 0], sizes = [2, 32], strides = [1, 1]} : vector<16x32xf32> to vector<2x32xf32>
    %cst_140 = arith.constant dense<0.000000e+00> : vector<2x32xf32>
    %500 = tpu.matmul %492, %317, %cst_140 {dimension_numbers = #tpu.dot_dimension_numbers<[1], [0], [0], [1], [0, 0, 1, 1], [], []>} : vector<2x32xbf16>, vector<32x32xbf16>, vector<2x32xf32> -> vector<2x32xf32>
    %501 = arith.addf %499, %500 : vector<2x32xf32>
    %502 = vector.extract_strided_slice %311 {offsets = [10, 0], sizes = [2, 32], strides = [1, 1]} : vector<16x32xf32> to vector<2x32xf32>
    %cst_141 = arith.constant dense<0.000000e+00> : vector<2x32xf32>
    %503 = tpu.matmul %492, %319, %cst_141 {dimension_numbers = #tpu.dot_dimension_numbers<[1], [0], [0], [1], [0, 0, 1, 1], [], []>} : vector<2x32xbf16>, vector<32x32xbf16>, vector<2x32xf32> -> vector<2x32xf32>
    %504 = arith.addf %502, %503 : vector<2x32xf32>
    %505 = arith.negf %495 : vector<2x32xf32>
    %506 = math.exp %505 : vector<2x32xf32>
    %cst_142 = arith.constant 1.000000e+00 : f32
    %507 = vector.broadcast %cst_142 : f32 to vector<2x32xf32>
    %508 = arith.addf %507, %506 : vector<2x32xf32>
    %509 = arith.divf %507, %508 : vector<2x32xf32>
    %510 = arith.negf %498 : vector<2x32xf32>
    %511 = math.exp %510 : vector<2x32xf32>
    %cst_143 = arith.constant 1.000000e+00 : f32
    %512 = vector.broadcast %cst_143 : f32 to vector<2x32xf32>
    %513 = arith.addf %512, %511 : vector<2x32xf32>
    %514 = arith.divf %512, %513 : vector<2x32xf32>
    %515 = math.tanh %501 : vector<2x32xf32>
    %516 = arith.negf %504 : vector<2x32xf32>
    %517 = math.exp %516 : vector<2x32xf32>
    %cst_144 = arith.constant 1.000000e+00 : f32
    %518 = vector.broadcast %cst_144 : f32 to vector<2x32xf32>
    %519 = arith.addf %518, %517 : vector<2x32xf32>
    %520 = arith.divf %518, %519 : vector<2x32xf32>
    %521 = arith.mulf %514, %489 : vector<2x32xf32>
    %522 = arith.mulf %509, %515 : vector<2x32xf32>
    %523 = arith.addf %521, %522 : vector<2x32xf32>
    %524 = math.tanh %523 : vector<2x32xf32>
    %525 = arith.mulf %520, %524 : vector<2x32xf32>
    %526 = arith.truncf %525 : vector<2x32xf32> to vector<2x32xbf16>
    %527 = vector.extract_strided_slice %308 {offsets = [12, 0], sizes = [2, 32], strides = [1, 1]} : vector<16x32xf32> to vector<2x32xf32>
    %cst_145 = arith.constant dense<0.000000e+00> : vector<2x32xf32>
    %528 = tpu.matmul %526, %313, %cst_145 {dimension_numbers = #tpu.dot_dimension_numbers<[1], [0], [0], [1], [0, 0, 1, 1], [], []>} : vector<2x32xbf16>, vector<32x32xbf16>, vector<2x32xf32> -> vector<2x32xf32>
    %529 = arith.addf %527, %528 : vector<2x32xf32>
    %530 = vector.extract_strided_slice %309 {offsets = [12, 0], sizes = [2, 32], strides = [1, 1]} : vector<16x32xf32> to vector<2x32xf32>
    %cst_146 = arith.constant dense<0.000000e+00> : vector<2x32xf32>
    %531 = tpu.matmul %526, %315, %cst_146 {dimension_numbers = #tpu.dot_dimension_numbers<[1], [0], [0], [1], [0, 0, 1, 1], [], []>} : vector<2x32xbf16>, vector<32x32xbf16>, vector<2x32xf32> -> vector<2x32xf32>
    %532 = arith.addf %530, %531 : vector<2x32xf32>
    %533 = vector.extract_strided_slice %310 {offsets = [12, 0], sizes = [2, 32], strides = [1, 1]} : vector<16x32xf32> to vector<2x32xf32>
    %cst_147 = arith.constant dense<0.000000e+00> : vector<2x32xf32>
    %534 = tpu.matmul %526, %317, %cst_147 {dimension_numbers = #tpu.dot_dimension_numbers<[1], [0], [0], [1], [0, 0, 1, 1], [], []>} : vector<2x32xbf16>, vector<32x32xbf16>, vector<2x32xf32> -> vector<2x32xf32>
    %535 = arith.addf %533, %534 : vector<2x32xf32>
    %536 = vector.extract_strided_slice %311 {offsets = [12, 0], sizes = [2, 32], strides = [1, 1]} : vector<16x32xf32> to vector<2x32xf32>
    %cst_148 = arith.constant dense<0.000000e+00> : vector<2x32xf32>
    %537 = tpu.matmul %526, %319, %cst_148 {dimension_numbers = #tpu.dot_dimension_numbers<[1], [0], [0], [1], [0, 0, 1, 1], [], []>} : vector<2x32xbf16>, vector<32x32xbf16>, vector<2x32xf32> -> vector<2x32xf32>
    %538 = arith.addf %536, %537 : vector<2x32xf32>
    %539 = arith.negf %529 : vector<2x32xf32>
    %540 = math.exp %539 : vector<2x32xf32>
    %cst_149 = arith.constant 1.000000e+00 : f32
    %541 = vector.broadcast %cst_149 : f32 to vector<2x32xf32>
    %542 = arith.addf %541, %540 : vector<2x32xf32>
    %543 = arith.divf %541, %542 : vector<2x32xf32>
    %544 = arith.negf %532 : vector<2x32xf32>
    %545 = math.exp %544 : vector<2x32xf32>
    %cst_150 = arith.constant 1.000000e+00 : f32
    %546 = vector.broadcast %cst_150 : f32 to vector<2x32xf32>
    %547 = arith.addf %546, %545 : vector<2x32xf32>
    %548 = arith.divf %546, %547 : vector<2x32xf32>
    %549 = math.tanh %535 : vector<2x32xf32>
    %550 = arith.negf %538 : vector<2x32xf32>
    %551 = math.exp %550 : vector<2x32xf32>
    %cst_151 = arith.constant 1.000000e+00 : f32
    %552 = vector.broadcast %cst_151 : f32 to vector<2x32xf32>
    %553 = arith.addf %552, %551 : vector<2x32xf32>
    %554 = arith.divf %552, %553 : vector<2x32xf32>
    %555 = arith.mulf %548, %523 : vector<2x32xf32>
    %556 = arith.mulf %543, %549 : vector<2x32xf32>
    %557 = arith.addf %555, %556 : vector<2x32xf32>
    %558 = math.tanh %557 : vector<2x32xf32>
    %559 = arith.mulf %554, %558 : vector<2x32xf32>
    %560 = arith.truncf %559 : vector<2x32xf32> to vector<2x32xbf16>
    %561 = vector.extract_strided_slice %308 {offsets = [14, 0], sizes = [2, 32], strides = [1, 1]} : vector<16x32xf32> to vector<2x32xf32>
    %cst_152 = arith.constant dense<0.000000e+00> : vector<2x32xf32>
    %562 = tpu.matmul %560, %313, %cst_152 {dimension_numbers = #tpu.dot_dimension_numbers<[1], [0], [0], [1], [0, 0, 1, 1], [], []>} : vector<2x32xbf16>, vector<32x32xbf16>, vector<2x32xf32> -> vector<2x32xf32>
    %563 = arith.addf %561, %562 : vector<2x32xf32>
    %564 = vector.extract_strided_slice %309 {offsets = [14, 0], sizes = [2, 32], strides = [1, 1]} : vector<16x32xf32> to vector<2x32xf32>
    %cst_153 = arith.constant dense<0.000000e+00> : vector<2x32xf32>
    %565 = tpu.matmul %560, %315, %cst_153 {dimension_numbers = #tpu.dot_dimension_numbers<[1], [0], [0], [1], [0, 0, 1, 1], [], []>} : vector<2x32xbf16>, vector<32x32xbf16>, vector<2x32xf32> -> vector<2x32xf32>
    %566 = arith.addf %564, %565 : vector<2x32xf32>
    %567 = vector.extract_strided_slice %310 {offsets = [14, 0], sizes = [2, 32], strides = [1, 1]} : vector<16x32xf32> to vector<2x32xf32>
    %cst_154 = arith.constant dense<0.000000e+00> : vector<2x32xf32>
    %568 = tpu.matmul %560, %317, %cst_154 {dimension_numbers = #tpu.dot_dimension_numbers<[1], [0], [0], [1], [0, 0, 1, 1], [], []>} : vector<2x32xbf16>, vector<32x32xbf16>, vector<2x32xf32> -> vector<2x32xf32>
    %569 = arith.addf %567, %568 : vector<2x32xf32>
    %570 = vector.extract_strided_slice %311 {offsets = [14, 0], sizes = [2, 32], strides = [1, 1]} : vector<16x32xf32> to vector<2x32xf32>
    %cst_155 = arith.constant dense<0.000000e+00> : vector<2x32xf32>
    %571 = tpu.matmul %560, %319, %cst_155 {dimension_numbers = #tpu.dot_dimension_numbers<[1], [0], [0], [1], [0, 0, 1, 1], [], []>} : vector<2x32xbf16>, vector<32x32xbf16>, vector<2x32xf32> -> vector<2x32xf32>
    %572 = arith.addf %570, %571 : vector<2x32xf32>
    %573 = arith.negf %563 : vector<2x32xf32>
    %574 = math.exp %573 : vector<2x32xf32>
    %cst_156 = arith.constant 1.000000e+00 : f32
    %575 = vector.broadcast %cst_156 : f32 to vector<2x32xf32>
    %576 = arith.addf %575, %574 : vector<2x32xf32>
    %577 = arith.divf %575, %576 : vector<2x32xf32>
    %578 = arith.negf %566 : vector<2x32xf32>
    %579 = math.exp %578 : vector<2x32xf32>
    %cst_157 = arith.constant 1.000000e+00 : f32
    %580 = vector.broadcast %cst_157 : f32 to vector<2x32xf32>
    %581 = arith.addf %580, %579 : vector<2x32xf32>
    %582 = arith.divf %580, %581 : vector<2x32xf32>
    %583 = math.tanh %569 : vector<2x32xf32>
    %584 = arith.negf %572 : vector<2x32xf32>
    %585 = math.exp %584 : vector<2x32xf32>
    %cst_158 = arith.constant 1.000000e+00 : f32
    %586 = vector.broadcast %cst_158 : f32 to vector<2x32xf32>
    %587 = arith.addf %586, %585 : vector<2x32xf32>
    %588 = arith.divf %586, %587 : vector<2x32xf32>
    %589 = arith.mulf %582, %557 : vector<2x32xf32>
    %590 = arith.mulf %577, %583 : vector<2x32xf32>
    %591 = arith.addf %589, %590 : vector<2x32xf32>
    %592 = math.tanh %591 : vector<2x32xf32>
    %593 = arith.mulf %588, %592 : vector<2x32xf32>
    %594 = arith.truncf %593 : vector<2x32xf32> to vector<2x32xbf16>
    %c0_159 = arith.constant 0 : index
    %c0_160 = arith.constant 0 : index
    %595 = vector.load %arg7[%c0_159, %c0_160] : memref<32x32xbf16, #tpu.memory_space<vmem>>, vector<32x32xbf16>
    %cst_161 = arith.constant dense<0.000000e+00> : vector<2x32xf32>
    %596 = tpu.matmul %594, %595, %cst_161 {dimension_numbers = #tpu.dot_dimension_numbers<[1], [0], [0], [1], [0, 0, 1, 1], [], []>} : vector<2x32xbf16>, vector<32x32xbf16>, vector<2x32xf32> -> vector<2x32xf32>
    %c0_162 = arith.constant 0 : index
    %c0_163 = arith.constant 0 : index
    %597 = vector.load %arg8[%c0_162, %c0_163] : memref<1x32xf32, #tpu.memory_space<vmem>>, vector<1x32xf32>
    %598 = vector.broadcast %597 : vector<1x32xf32> to vector<2x32xf32>
    %599 = arith.addf %596, %598 : vector<2x32xf32>
    %c0_164 = arith.constant 0 : index
    %c0_165 = arith.constant 0 : index
    %600 = vector.load %arg9[%c0_164, %c0_165] : memref<2x32xf32, #tpu.memory_space<vmem>>, vector<2x32xf32>
    tpu.vector_store %arg9[%c0_164, %c0_165], %599 {strides = array<i32>} : memref<2x32xf32, #tpu.memory_space<vmem>>, vector<2x32xf32>,
    return
  }
}

</mosaic_0001>

<bundles_post_ra>
// kernel: lstm_encoder_forward.1
= control target key start
LH: loop header
LB: loop body
LE: loop exit
PB: predicated region body
PF: predicated region fallthrough
CT: control target
= control target key end

     0   :  { %14 = vsyncpa [#allocation4], 0  ;;  %s6245_s0 = inlined_call_operand.vmem [shape: f32[16,16], index: 0, kind: input, shape index: {}]   ;;  %s6246_s1 = inlined_call_operand.vmem [shape: bf16[16,128], index: 1, kind: input, shape index: {}]   ;;  %s6247_s2 = inlined_call_operand.hbm [shape: bf16[4,32,32], index: 2, kind: input, shape index: {}]   ;;  %s6248_s3 = inlined_call_operand.vmem [shape: f32[1,128], index: 3, kind: input, shape index: {}]   ;;  %s6249_s4 = inlined_call_operand.vmem [shape: bf16[32,128], index: 4, kind: input, shape index: {}]   ;;  %s6250_s5 = inlined_call_operand.hbm [shape: bf16[4,32,32], index: 5, kind: input, shape index: {}]   ;;  %s6251_s6 = inlined_call_operand.vmem [shape: f32[1,128], index: 6, kind: input, shape index: {}]   ;;  %s6252_s7 = inlined_call_operand.vmem [shape: bf16[32,32], index: 7, kind: input, shape index: {}]   ;;  %s6253_s8 = inlined_call_operand.vmem [shape: f32[1,32], index: 8, kind: input, shape index: {}]   ;;  %s6254_s9 = inlined_call_operand.hbm [shape: f32[2,32], index: 9, kind: output, shape index: {}]  }
   0x1   :  { %15 = vsyncpa [#allocation7], 0 }
   0x2   :  { %16 = vsyncpa [#allocation5], 0  ;;  %s5319_s30 = smov [#allocation3]   ;;  %s5247_s13 = scalar_lea.hbm %s6247_s2, 1024 }
   0x3   :  { %s26_s10 = sshll.u32 %s5319_s30, 4  ;;  %p5248_p0 = scmp.ne.s32.totalorder %s6247_s2, %s5247_s13  ;;  %s27_s10 = int_to_ptr.vmem [resolvable:$true] %s26_s10 }
   0x4   :  { %p5251_p1 = scmp.lt.u32.totalorder %s5247_s13, %s6247_s2 }
   0x6   :  { %p5253_p2 = pnand %p5251_p1, %p5248_p0 }
   0x8   :  { %5256 = shalt.err (!%p5253_p2)
}
   0x9   :  { %s5257_s18 = scalar_lea.vmem %s27_s10, 1024  ;;  %p5262_p4 = scmp.lt.s32.totalorder %s27_s10, %s27_s10 }
   0xa   :  { %p5258_p3 = scmp.ne.s32.totalorder %s27_s10, %s5257_s18  ;;  %p5263_p5 = scmp.lt.s32.totalorder %s5257_s18, %s5257_s18 }
   0xc   :  { %p5264_p6 = por %p5263_p5, %p5262_p4 }
   0xe   :  { %p5265_p7 = pnand %p5264_p6, %p5258_p3 }
  0x10   :  { %5268 = shalt.err (!%p5265_p7)
}
  0x11   :  { %s5320_s19 = smov 64   ;;  %s5321_s20 = smov 4  }
  0x12   :  { %32 = dma.hbm_to_vmem [thread:$0]  %s6247_s2, 1024, %s27_s10, [#allocation4], %s5320_s19, %s5320_s19, %s5321_s20  }
  0x13   :  { %s5322_s23 = smov [#allocation6]   ;;  %s5269_s27 = scalar_lea.hbm %s6250_s5, 1024 }
  0x14   :  { %s42_s24 = sshll.u32 %s5322_s23, 4  ;;  %p5270_p8 = scmp.ne.s32.totalorder %s6250_s5, %s5269_s27  ;;  %s43_s24 = int_to_ptr.vmem [resolvable:$true] %s42_s24 }
  0x15   :  { %p5273_p9 = scmp.lt.u32.totalorder %s5269_s27, %s6250_s5 }
  0x17   :  { %p5275_p10 = pnand %p5273_p9, %p5270_p8 }
  0x19   :  { %5278 = shalt.err (!%p5275_p10)
}
  0x1a   :  { %s5279_s12 = scalar_lea.vmem %s43_s24, 1024  ;;  %p5284_p12 = scmp.lt.s32.totalorder %s43_s24, %s43_s24 }
  0x1b   :  { %p5280_p11 = scmp.ne.s32.totalorder %s43_s24, %s5279_s12  ;;  %p5285_p13 = scmp.lt.s32.totalorder %s5279_s12, %s5279_s12 }
  0x1d   :  { %p5286_p0 = por %p5285_p13, %p5284_p12 }
  0x1f   :  { %p5287_p1 = pnand %p5286_p0, %p5280_p11 }
  0x21   :  { %5290 = shalt.err (!%p5287_p1)
}
  0x22   :  { %48 = dma.hbm_to_vmem [thread:$0]  %s6250_s5, 1024, %s43_s24, [#allocation7], %s5320_s19, %s5320_s19, %s5321_s20  }
  0x23   :  { %5313 = dma.done.wait [#allocation4], 1024  }
  0x24   :  { %5314 = vsyncadd [#allocation4], 4294966272 }
  0x25   :  { %5315 = dma.done.wait [#allocation7], 1024  }
  0x26   :  { %5316 = vsyncadd [#allocation7], 4294966272  ;;  %v5323_v0 = vmov 0.0   ;;  %vm5324_vm0 = vmmov 0   ;;  %v5413_v1 = vld [vmem:[#allocation3] sm:$0xff]   ;;  %v4955_v2 = vld [vmem:[%s6246_s1] sm:$0xff]  }
  0x27   :  { %4416 = vmatprep.subr.bf16.mxu1 %v5323_v0  ;;  %4410 = vmatprep.subr.bf16.mxu0 %v5323_v0  ;;  %v5419_v3 = vld [vmem:[#allocation3 + $0x8] sm:$0xff]   ;;  %v62_v4 = vld [vmem:[%s6245_s0] sm:$0xff]  ;;  %v63_v5 = vld [vmem:[%s6245_s0 + $0x8] sm:$0xff]  ;;  %vm80_vm1 = vcmask 130048   ;;  %v5325_v10 = vmov 0   ;;  %s5326_s18 = smov 32  }
  0x28   :  { %4412 = vmatprep.mubr.msk.bf16.mxu0 %vm5324_vm0, %v5323_v0  ;;  %4420 = vmatprep.mubr.msk.bf16.mxu1 %vm5324_vm0, %v5323_v0  ;;  %v64_v6 = vpack.c.bf16 %v63_v5, %v62_v4  ;;  %v5429_v7 = vld [vmem:[#allocation3 + $0x10] sm:$0xff]   ;;  %v5432_v8 = vld [vmem:[#allocation3 + $0x20] sm:$0xff]   ;;  %v5436_v9 = vld [vmem:[#allocation3 + $0x18] sm:$0xff]   ;;  %vm156_vm2 = vcmask 261120   ;;  %vm412_vm3 = vcmask 254976   ;;  %vm881_vm4 = vcmask 259076  }
  0x29   :  { %4417 = vmatpush3.bf16.msra.mxu1 %v5413_v1  ;;  %4411 = vmatpush3.bf16.msra.mxu0 %v4955_v2  ;;  %v5442_v11 = vld [vmem:[#allocation3 + $0x28] sm:$0xff]   ;;  %v5444_v12 = vld [vmem:[#allocation3 + $0x30] sm:$0xff]   ;;  %v5452_v13 = vld [vmem:[#allocation3 + $0x38] sm:$0xff]   ;;  %vm646_vm5 = vcmask 257026   ;;  %vm1116_vm6 = vcmask 261126   ;;  %s5328_s28 = smov [#allocation8]  }
  0x2a   :  { %4418 = vmatprep.subr.bf16.mxu1 %v5323_v0  ;;  %4424 = vmatprep.subr.bf16.mxu0 %v5323_v0  ;;  %v4079_v16 = vld [vmem:[%s6248_s3] ss:$0 sm:$0xff]  ;;  %s5327_s3 = smov 96   ;;  %s4069_s29 = sshll.u32 %s5328_s28, 4  ;;  %s4070_s29 = int_to_ptr.vmem [resolvable:$true] %s4069_s29 }
  0x2b   :  { %s5291_s30 = scalar_lea.vmem %s4070_s29, 32  ;;  %p5296_p3 = scmp.lt.s32.totalorder %s4070_s29, %s4070_s29 }
  0x2c   :  { %4413 = vmatmul.mubr.msk.bf16.vlgmr.msra.gmra.mrb[0].mxu0 %vm80_vm1, %v64_v6  ;;  %p5292_p2 = scmp.ne.s32.totalorder %s4070_s29, %s5291_s30  ;;  %p5297_p4 = scmp.lt.s32.totalorder %s5291_s30, %s5291_s30 }
  0x2d   :  { %4419 = vmatpush3.bf16.msra.mxu1 %v5419_v3  ;;  %4425 = vmatpush3.bf16.msra.mxu0 %v5429_v7 }
  0x2e   :  { %4432 = vmatprep.subr.bf16.mxu1 %v5323_v0  ;;  %4426 = vmatprep.subr.bf16.mxu0 %v5323_v0  ;;  %p5298_p5 = por %p5297_p4, %p5296_p3 }
  0x2f   :  { %4428 = vmatprep.mubr.msk.bf16.mxu0 %vm5324_vm0, %v5323_v0 }
  0x30   :  { %4421 = vmatmul.mubr.bf16.vlgmr.msra.gmra.mrb[0].mxu1 %v5325_v10  ;;  %p5299_p6 = pnand %p5298_p5, %p5292_p2 }
  0x31   :  { %4433 = vmatpush3.bf16.msra.mxu1 %v5432_v8  ;;  %4436 = vmatprep.mubr.msk.bf16.mxu1 %vm5324_vm0, %v5323_v0 }
  0x32   :  { %4434 = vmatprep.subr.bf16.mxu1 %v5323_v0  ;;  %4427 = vmatpush3.bf16.msra.mxu0 %v5436_v9 }
  0x33   :  { %4440 = vmatprep.subr.bf16.mxu0 %v5323_v0 }
  0x35   :  { %4435 = vmatpush3.bf16.msra.mxu1 %v5442_v11  ;;  %4429 = vmatmul.mubr.bf16.vlgmr.msra.gmra.mrb[4].mxu0 %v5325_v10 }
  0x36   :  { %4441 = vmatpush3.bf16.msra.mxu0 %v5444_v12  ;;  %4444 = vmatprep.mubr.msk.bf16.mxu0 %vm5324_vm0, %v5323_v0 }
  0x37   :  { %4442 = vmatprep.subr.bf16.mxu0 %v5323_v0  ;;  %4448 = vmatprep.subr.bf16.mxu1 %v5323_v0 }
  0x38   :  { %4437 = vmatmul.mubr.bf16.vlgmr.msra.gmra.mrb[4].mxu1 %v5325_v10 }
  0x39   :  { %4449 = vmatpush3.bf16.msra.mxu1 %v5413_v1  ;;  %4452 = vmatprep.mubr.msk.bf16.mxu1 %vm5324_vm0, %v5323_v0 }
  0x3a   :  { %4443 = vmatpush3.bf16.msra.mxu0 %v5452_v13  ;;  %4450 = vmatprep.subr.bf16.mxu1 %v5323_v0 }
  0x3b   :  { %4456 = vmatprep.subr.bf16.mxu0 %v5323_v0 }
  0x3d   :  { %4445 = vmatmul.mubr.bf16.vlgmr.msra.gmra.mrb[8].mxu0 %v5325_v10  ;;  %4451 = vmatpush3.bf16.msra.mxu1 %v5419_v3 }
  0x3e   :  { %4457 = vmatpush3.bf16.msra.mxu0 %v5429_v7  ;;  %4460 = vmatprep.mubr.msk.bf16.mxu0 %vm5324_vm0, %v5323_v0 }
  0x3f   :  { %4458 = vmatprep.subr.bf16.mxu0 %v5323_v0  ;;  %4464 = vmatprep.subr.bf16.mxu1 %v5323_v0 }
  0x42   :  { %4459 = vmatpush3.bf16.msra.mxu0 %v5436_v9 }
  0x43   :  { %4472 = vmatprep.subr.bf16.mxu0 %v5323_v0 }
  0xff   :  { %v118_v14 = vpop.f32.mrb[0].mxu0 }
 0x100   :  { %v4414_v15 = vpop.f32.mrb[1].mxu0  ;;  %v5484_v36 = vadd.f32 %v4079_v16, %v118_v14 }
 0x101   :  { %v121_v17 = vpop.f32.mrb[2].mxu0 }
 0x102   :  { %v5480_v19 = vadd.f32 %v4079_v16, %v121_v17  ;;  %v4415_v20 = vpop.f32.mrb[3].mxu0 }
 0x103   :  { %v194_v18 = vpop.f32.mrb[0].mxu1 }
 0x104   :  { %v4422_v21 = vpop.f32.mrb[1].mxu1  ;;  %v200_v40 = vadd.f32 %v194_v18, %v5484_v36 }
 0x105   :  { %v197_v22 = vpop.f32.mrb[2].mxu1 }
 0x106   :  { %v4423_v23 = vpop.f32.mrb[3].mxu1  ;;  %v4090_v41 = vmul.f32 -1.442695, %v200_v40 }
 0x108   :  { %v247_v24 = vpop.f32.mrb[4].mxu0 }
 0x109   :  { %254 = vrot.lane.b32.xlu1 %v247_v24, %s5326_s18  ;;  %v4430_v25 = vpop.f32.mrb[5].mxu0 }
 0x10a   :  { %v250_v26 = vpop.f32.mrb[6].mxu0 }
 0x10b   :  { %v304_v27 = vpop.f32.mrb[4].mxu1  ;;  %v4431_v28 = vpop.f32.mrb[7].mxu0 }
 0x10c   :  { %311 = vrot.lane.b32.xlu0 %v304_v27, %s5320_s19  ;;  %v4438_v29 = vpop.f32.mrb[5].mxu1 }
 0x10d   :  { %v307_v30 = vpop.f32.mrb[6].mxu1 }
 0x10e   :  { %v4439_v31 = vpop.f32.mrb[7].mxu1 }
 0x110   :  { %v361_v32 = vpop.f32.mrb[8].mxu0 }
 0x111   :  { %v4446_v33 = vpop.f32.mrb[9].mxu0 }
 0x112   :  { %v364_v34 = vpop.f32.mrb[10].mxu0 }
 0x113   :  { %v4447_v35 = vpop.f32.mrb[11].mxu0 }
 0x17b   :  { %v255_v47 = vpop.permute.xlu1 %254 }
 0x17c   :  { %v257_v48 = vadd.f32 %v255_v47, %v5484_v36 }
 0x17e   :  { %v312_v37 = vpop.permute.xlu0 %311  ;;  %v4091_v49 = vmul.f32 -1.442695, %v257_v48 }
 0x17f   :  { %v314_v38 = vadd.f32 %v312_v37, %v5484_v36 }
 0x181   :  { %4975 = vtanh.f32 %v314_v38 }
 0x182   :  { %4977 = vpow2.f32 %v4090_v41 }
 0x18b   :  { %v4976_v39 = vpop.eup %4975 }
 0x18c   :  { %393 = vrot.lane.b32.xlu0 %v4976_v39, %s5320_s19  ;;  %v4978_v42 = vpop.eup %4977 }
 0x18d   :  { %v375_v43 = vadd.f32 1.0, %v4978_v42 }
 0x18f   :  { %4979 = vrcp.f32 %v375_v43 }
 0x190   :  { %368 = vrot.lane.b32.xlu0 %v361_v32, %s5327_s3  ;;  %4981 = vpow2.f32 %v4091_v49 }
 0x199   :  { %v4980_v44 = vpop.eup %4979 }
 0x19a   :  { %v4982_v50 = vpop.eup %4981 }
 0x19b   :  { %v381_v51 = vadd.f32 1.0, %v4982_v50 }
 0x19d   :  { %4983 = vrcp.f32 %v381_v51 }
 0x1a7   :  { %v4984_v52 = vpop.eup %4983 }
 0x1a8   :  { %v391_v53 = vmul.f32 0.0, %v4984_v52 }
 0x1fe   :  { %v394_v45 = vpop.permute.xlu0 %393 }
 0x1ff   :  { %v396_v46 = vmul.f32 %v4980_v44, %v394_v45 }
 0x201   :  { %398 = vrot.lane.b32.xlu1 %v396_v46, %s5326_s18 }
 0x202   :  { %v369_v57 = vpop.permute.xlu0 %368 }
 0x203   :  { %v371_v58 = vadd.f32 %v369_v57, %v5484_v36 }
 0x205   :  { %v4092_v59 = vmul.f32 -1.442695, %v371_v58 }
 0x273   :  { %v399_v54 = vpop.permute.xlu1 %398 }
 0x274   :  { %v5492_v55 = vadd.f32 %v399_v54, %v391_v53 }
 0x276   :  { %4985 = vtanh.f32 %v5492_v55  ;;  %v623_v51 = vrot.slane %v5492_v55, 6 }
 0x277   :  { %4987 = vpow2.f32 %v4092_v59 }
 0x280   :  { %v4986_v56 = vpop.eup %4985 }
 0x281   :  { %404 = vrot.lane.b32.xlu1 %v4986_v56, %s5320_s19  ;;  %v4988_v60 = vpop.eup %4987 }
 0x282   :  { %v388_v61 = vadd.f32 1.0, %v4988_v60 }
 0x284   :  { %4989 = vrcp.f32 %v388_v61 }
 0x28e   :  { %v4990_v62 = vpop.eup %4989 }
 0x2f3   :  { %v405_v63 = vpop.permute.xlu1 %404 }
 0x2f4   :  { %v5497_v2 = vmul.f32 %v4990_v62, %v405_v63 }
 0x2f6   :  { %v414_v4 = vpack.c.bf16 %v5497_v2, %v5497_v2 }
 0x2f8   :  { %416 = vrot.lane.b32.xlu0 %v414_v4, %s5326_s18 }
 0x36a   :  { %v417_v5 = vpop.permute.xlu0 %416 }
 0x36b   :  { %4453 = vmatmul.mubr.msk.bf16.vlgmr.msra.gmra.mrb[8].mxu1 %vm156_vm2, %v417_v5  ;;  %4461 = vmatmul.mubr.msk.bf16.vlgmr.msra.gmra.mrb[12].mxu0 %vm156_vm2, %v417_v5 }
 0x36c   :  { %4465 = vmatpush3.bf16.msra.mxu1 %v5432_v8  ;;  %4473 = vmatpush3.bf16.msra.mxu0 %v5444_v12 }
 0x36d   :  { %4466 = vmatprep.subr.bf16.mxu1 %v5323_v0  ;;  %4474 = vmatprep.subr.bf16.mxu0 %v5323_v0 }
 0x36e   :  { %4468 = vmatprep.mubr.msk.bf16.mxu1 %vm5324_vm0, %v5323_v0  ;;  %4476 = vmatprep.mubr.msk.bf16.mxu0 %vm5324_vm0, %v5323_v0 }
 0x370   :  { %4467 = vmatpush3.bf16.msra.mxu1 %v5442_v11  ;;  %4475 = vmatpush3.bf16.msra.mxu0 %v5452_v13 }
 0x371   :  { %4480 = vmatprep.subr.bf16.mxu1 %v5323_v0  ;;  %4488 = vmatprep.subr.bf16.mxu0 %v5323_v0 }
 0x373   :  { %4469 = vmatmul.mubr.msk.bf16.vlgmr.msra.gmra.mrb[12].mxu1 %vm156_vm2, %v417_v5  ;;  %4477 = vmatmul.mubr.msk.bf16.vlgmr.msra.gmra.mrb[16].mxu0 %vm156_vm2, %v417_v5 }
 0x374   :  { %4481 = vmatpush3.bf16.msra.mxu1 %v5413_v1  ;;  %4489 = vmatpush3.bf16.msra.mxu0 %v5429_v7 }
 0x375   :  { %4482 = vmatprep.subr.bf16.mxu1 %v5323_v0  ;;  %4490 = vmatprep.subr.bf16.mxu0 %v5323_v0 }
 0x376   :  { %4484 = vmatprep.mubr.msk.bf16.mxu1 %vm5324_vm0, %v5323_v0  ;;  %4492 = vmatprep.mubr.msk.bf16.mxu0 %vm5324_vm0, %v5323_v0 }
 0x378   :  { %4483 = vmatpush3.bf16.msra.mxu1 %v5419_v3  ;;  %4491 = vmatpush3.bf16.msra.mxu0 %v5436_v9 }
 0x379   :  { %4496 = vmatprep.subr.bf16.mxu1 %v5323_v0  ;;  %4504 = vmatprep.subr.bf16.mxu0 %v5323_v0 }
 0x43e   :  { %v455_v6 = vpop.f32.mrb[8].mxu1  ;;  %v499_v14 = vpop.f32.mrb[12].mxu0 }
 0x43f   :  { %v4454_v15 = vpop.f32.mrb[9].mxu1  ;;  %v4462_v16 = vpop.f32.mrb[13].mxu0  ;;  %v506_v31 = vrot.slane %v499_v14, 6  ;;  %v462_v37 = vrot.slane %v455_v6, 6 }
 0x440   :  { %v458_v17 = vpop.f32.mrb[10].mxu1  ;;  %v502_v18 = vpop.f32.mrb[14].mxu0 }
 0x441   :  { %v4455_v20 = vpop.f32.mrb[11].mxu1  ;;  %v4463_v21 = vpop.f32.mrb[15].mxu0  ;;  %v464_v38 = vadd.f32 %v462_v37, %v5484_v36 }
 0x443   :  { %v4097_v39 = vmul.f32 -1.442695, %v464_v38 }
 0x446   :  { %v545_v22 = vpop.f32.mrb[12].mxu1  ;;  %v591_v23 = vpop.f32.mrb[16].mxu0 }
 0x447   :  { %v552_v24 = vrot.slane %v545_v22, 6  ;;  %v4470_v25 = vpop.f32.mrb[13].mxu1  ;;  %v4478_v26 = vpop.f32.mrb[17].mxu0  ;;  %v598_v32 = vrot.slane %v591_v23, 6 }
 0x448   :  { %v548_v27 = vpop.f32.mrb[14].mxu1  ;;  %v594_v28 = vpop.f32.mrb[18].mxu0 }
 0x449   :  { %553 = vrot.lane.b32.xlu1 %v552_v24, %s5320_s19  ;;  %v4471_v29 = vpop.f32.mrb[15].mxu1  ;;  %v4479_v30 = vpop.f32.mrb[19].mxu0 }
 0x44d   :  { %507 = vrot.lane.b32.xlu1 %v506_v31, %s5326_s18 }
 0x451   :  { %599 = vrot.lane.b32.xlu1 %v598_v32, %s5327_s3 }
 0x4bb   :  { %v554_v33 = vpop.permute.xlu1 %553 }
 0x4bc   :  { %v556_v34 = vadd.f32 %v554_v33, %v5484_v36 }
 0x4be   :  { %4991 = vtanh.f32 %v556_v34 }
 0x4bf   :  { %4993 = vpow2.f32 %v4097_v39  ;;  %v508_v45 = vpop.permute.xlu1 %507 }
 0x4c0   :  { %v510_v46 = vadd.f32 %v508_v45, %v5484_v36 }
 0x4c2   :  { %v4098_v47 = vmul.f32 -1.442695, %v510_v46 }
 0x4c3   :  { %v600_v57 = vpop.permute.xlu1 %599 }
 0x4c4   :  { %v602_v58 = vadd.f32 %v600_v57, %v5484_v36 }
 0x4c6   :  { %v4099_v59 = vmul.f32 -1.442695, %v602_v58 }
 0x4c8   :  { %v4992_v35 = vpop.eup %4991 }
 0x4c9   :  { %627 = vrot.lane.b32.xlu0 %v4992_v35, %s5320_s19  ;;  %v4994_v40 = vpop.eup %4993 }
 0x4ca   :  { %v606_v41 = vadd.f32 1.0, %v4994_v40 }
 0x4cc   :  { %4995 = vrcp.f32 %v606_v41 }
 0x4cd   :  { %4997 = vpow2.f32 %v4098_v47 }
 0x4d6   :  { %v4996_v42 = vpop.eup %4995 }
 0x4d7   :  { %v4998_v48 = vpop.eup %4997 }
 0x4d8   :  { %v612_v49 = vadd.f32 1.0, %v4998_v48 }
 0x4da   :  { %4999 = vrcp.f32 %v612_v49 }
 0x4e4   :  { %v5000_v50 = vpop.eup %4999 }
 0x4e5   :  { %v625_v52 = vmul.f32 %v5000_v50, %v623_v51 }
 0x53b   :  { %v628_v43 = vpop.permute.xlu0 %627 }
 0x53c   :  { %v630_v44 = vmul.f32 %v4996_v42, %v628_v43 }
 0x53e   :  { %632 = vrot.lane.b32.xlu0 %v630_v44, %s5326_s18 }
 0x5b0   :  { %v633_v53 = vpop.permute.xlu0 %632 }
 0x5b1   :  { %v5539_v54 = vadd.f32 %v633_v53, %v625_v52 }
 0x5b3   :  { %5001 = vtanh.f32 %v5539_v54  ;;  %v858_v52 = vrot.slane %v5539_v54, 6 }
 0x5b4   :  { %5003 = vpow2.f32 %v4099_v59 }
 0x5bd   :  { %v5002_v56 = vpop.eup %5001 }
 0x5be   :  { %638 = vrot.lane.b32.xlu0 %v5002_v56, %s5320_s19  ;;  %v5004_v60 = vpop.eup %5003 }
 0x5bf   :  { %v619_v61 = vadd.f32 1.0, %v5004_v60 }
 0x5c1   :  { %5005 = vrcp.f32 %v619_v61 }
 0x5cb   :  { %v5006_v62 = vpop.eup %5005 }
 0x630   :  { %v639_v63 = vpop.permute.xlu0 %638 }
 0x631   :  { %v5544_v55 = vmul.f32 %v5006_v62, %v639_v63 }
 0x633   :  { %v648_v4 = vpack.c.bf16 %v5544_v55, %v5544_v55 }
 0x635   :  { %v650_v5 = vrot.slane %v648_v4, 1 }
 0x637   :  { %651 = vrot.lane.b32.xlu1 %v650_v5, %s5326_s18 }
 0x6a9   :  { %v652_v6 = vpop.permute.xlu1 %651 }
 0x6aa   :  { %4485 = vmatmul.mubr.msk.bf16.vlgmr.msra.gmra.mrb[16].mxu1 %vm156_vm2, %v652_v6  ;;  %4493 = vmatmul.mubr.msk.bf16.vlgmr.msra.gmra.mrb[20].mxu0 %vm156_vm2, %v652_v6 }
 0x6ab   :  { %4497 = vmatpush3.bf16.msra.mxu1 %v5432_v8  ;;  %4505 = vmatpush3.bf16.msra.mxu0 %v5444_v12 }
 0x6ac   :  { %4498 = vmatprep.subr.bf16.mxu1 %v5323_v0  ;;  %4506 = vmatprep.subr.bf16.mxu0 %v5323_v0 }
 0x6ad   :  { %4500 = vmatprep.mubr.msk.bf16.mxu1 %vm5324_vm0, %v5323_v0  ;;  %4508 = vmatprep.mubr.msk.bf16.mxu0 %vm5324_vm0, %v5323_v0 }
 0x6af   :  { %4499 = vmatpush3.bf16.msra.mxu1 %v5442_v11  ;;  %4507 = vmatpush3.bf16.msra.mxu0 %v5452_v13 }
 0x6b0   :  { %4512 = vmatprep.subr.bf16.mxu1 %v5323_v0  ;;  %4520 = vmatprep.subr.bf16.mxu0 %v5323_v0 }
 0x6b2   :  { %4501 = vmatmul.mubr.msk.bf16.vlgmr.msra.gmra.mrb[20].mxu1 %vm156_vm2, %v652_v6  ;;  %4509 = vmatmul.mubr.msk.bf16.vlgmr.msra.gmra.mrb[24].mxu0 %vm156_vm2, %v652_v6 }
 0x6b3   :  { %4513 = vmatpush3.bf16.msra.mxu1 %v5413_v1  ;;  %4521 = vmatpush3.bf16.msra.mxu0 %v5429_v7 }
 0x6b4   :  { %4514 = vmatprep.subr.bf16.mxu1 %v5323_v0  ;;  %4522 = vmatprep.subr.bf16.mxu0 %v5323_v0 }
 0x6b5   :  { %4516 = vmatprep.mubr.msk.bf16.mxu1 %vm5324_vm0, %v5323_v0  ;;  %4524 = vmatprep.mubr.msk.bf16.mxu0 %vm5324_vm0, %v5323_v0 }
 0x6b7   :  { %4515 = vmatpush3.bf16.msra.mxu1 %v5419_v3  ;;  %4523 = vmatpush3.bf16.msra.mxu0 %v5436_v9 }
 0x6b8   :  { %4528 = vmatprep.subr.bf16.mxu1 %v5323_v0  ;;  %4536 = vmatprep.subr.bf16.mxu0 %v5323_v0 }
 0x77d   :  { %v690_v14 = vpop.f32.mrb[16].mxu1  ;;  %v734_v15 = vpop.f32.mrb[20].mxu0 }
 0x77e   :  { %v4486_v16 = vpop.f32.mrb[17].mxu1  ;;  %v4494_v17 = vpop.f32.mrb[21].mxu0  ;;  %v741_v32 = vrot.slane %v734_v15, 4  ;;  %v697_v38 = vrot.slane %v690_v14, 4 }
 0x77f   :  { %v693_v18 = vpop.f32.mrb[18].mxu1  ;;  %v737_v20 = vpop.f32.mrb[22].mxu0 }
 0x780   :  { %v4487_v21 = vpop.f32.mrb[19].mxu1  ;;  %v4495_v22 = vpop.f32.mrb[23].mxu0  ;;  %v699_v39 = vadd.f32 %v697_v38, %v5484_v36 }
 0x782   :  { %v4104_v40 = vmul.f32 -1.442695, %v699_v39 }
 0x785   :  { %v780_v23 = vpop.f32.mrb[20].mxu1  ;;  %v826_v24 = vpop.f32.mrb[24].mxu0 }
 0x786   :  { %v787_v25 = vrot.slane %v780_v23, 4  ;;  %v4502_v26 = vpop.f32.mrb[21].mxu1  ;;  %v4510_v27 = vpop.f32.mrb[25].mxu0  ;;  %v833_v33 = vrot.slane %v826_v24, 4 }
 0x787   :  { %v783_v28 = vpop.f32.mrb[22].mxu1  ;;  %v829_v29 = vpop.f32.mrb[26].mxu0 }
 0x788   :  { %788 = vrot.lane.b32.xlu0 %v787_v25, %s5320_s19  ;;  %v4503_v30 = vpop.f32.mrb[23].mxu1  ;;  %v4511_v31 = vpop.f32.mrb[27].mxu0 }
 0x78c   :  { %742 = vrot.lane.b32.xlu0 %v741_v32, %s5326_s18 }
 0x790   :  { %834 = vrot.lane.b32.xlu0 %v833_v33, %s5327_s3 }
 0x7fa   :  { %v789_v34 = vpop.permute.xlu0 %788 }
 0x7fb   :  { %v791_v35 = vadd.f32 %v789_v34, %v5484_v36 }
 0x7fd   :  { %5007 = vtanh.f32 %v791_v35 }
 0x7fe   :  { %5009 = vpow2.f32 %v4104_v40  ;;  %v743_v46 = vpop.permute.xlu0 %742 }
 0x7ff   :  { %v745_v47 = vadd.f32 %v743_v46, %v5484_v36 }
 0x801   :  { %v4105_v48 = vmul.f32 -1.442695, %v745_v47 }
 0x802   :  { %v835_v59 = vpop.permute.xlu0 %834 }
 0x803   :  { %v837_v60 = vadd.f32 %v835_v59, %v5484_v36 }
 0x805   :  { %v4106_v61 = vmul.f32 -1.442695, %v837_v60 }
 0x807   :  { %v5008_v37 = vpop.eup %5007 }
 0x808   :  { %862 = vrot.lane.b32.xlu1 %v5008_v37, %s5320_s19  ;;  %v5010_v41 = vpop.eup %5009 }
 0x809   :  { %v841_v42 = vadd.f32 1.0, %v5010_v41 }
 0x80b   :  { %5011 = vrcp.f32 %v841_v42 }
 0x80c   :  { %5013 = vpow2.f32 %v4105_v48 }
 0x815   :  { %v5012_v43 = vpop.eup %5011 }
 0x816   :  { %v5014_v49 = vpop.eup %5013 }
 0x817   :  { %v847_v50 = vadd.f32 1.0, %v5014_v49 }
 0x819   :  { %5015 = vrcp.f32 %v847_v50 }
 0x823   :  { %v5016_v51 = vpop.eup %5015 }
 0x824   :  { %v860_v53 = vmul.f32 %v5016_v51, %v858_v52 }
 0x87a   :  { %v863_v44 = vpop.permute.xlu1 %862 }
 0x87b   :  { %v865_v45 = vmul.f32 %v5012_v43, %v863_v44 }
 0x87d   :  { %867 = vrot.lane.b32.xlu1 %v865_v45, %s5326_s18 }
 0x8ef   :  { %v868_v56 = vpop.permute.xlu1 %867 }
 0x8f0   :  { %v5586_v57 = vadd.f32 %v868_v56, %v860_v53 }
 0x8f2   :  { %5017 = vtanh.f32 %v5586_v57  ;;  %v1093_v56 = vrot.slane %v5586_v57, 6 }
 0x8f3   :  { %5019 = vpow2.f32 %v4106_v61 }
 0x8fc   :  { %v5018_v58 = vpop.eup %5017 }
 0x8fd   :  { %873 = vrot.lane.b32.xlu1 %v5018_v58, %s5320_s19  ;;  %v5020_v62 = vpop.eup %5019 }
 0x8fe   :  { %v854_v63 = vadd.f32 1.0, %v5020_v62 }
 0x900   :  { %5021 = vrcp.f32 %v854_v63 }
 0x90a   :  { %v5022_v4 = vpop.eup %5021 }
 0x96f   :  { %v874_v5 = vpop.permute.xlu1 %873 }
 0x970   :  { %v5591_v54 = vmul.f32 %v5022_v4, %v874_v5 }
 0x972   :  { %v883_v6 = vpack.c.bf16 %v5591_v54, %v5591_v54 }
 0x974   :  { %v885_v14 = vrot.slane %v883_v6, 2 }
 0x976   :  { %886 = vrot.lane.b32.xlu0 %v885_v14, %s5326_s18 }
 0x9e8   :  { %v887_v15 = vpop.permute.xlu0 %886 }
 0x9e9   :  { %4517 = vmatmul.mubr.msk.bf16.vlgmr.msra.gmra.mrb[24].mxu1 %vm156_vm2, %v887_v15  ;;  %4525 = vmatmul.mubr.msk.bf16.vlgmr.msra.gmra.mrb[28].mxu0 %vm156_vm2, %v887_v15 }
 0x9ea   :  { %4529 = vmatpush3.bf16.msra.mxu1 %v5432_v8  ;;  %4537 = vmatpush3.bf16.msra.mxu0 %v5444_v12 }
 0x9eb   :  { %4530 = vmatprep.subr.bf16.mxu1 %v5323_v0  ;;  %4538 = vmatprep.subr.bf16.mxu0 %v5323_v0 }
 0x9ec   :  { %4532 = vmatprep.mubr.msk.bf16.mxu1 %vm5324_vm0, %v5323_v0  ;;  %4540 = vmatprep.mubr.msk.bf16.mxu0 %vm5324_vm0, %v5323_v0 }
 0x9ee   :  { %4531 = vmatpush3.bf16.msra.mxu1 %v5442_v11  ;;  %4539 = vmatpush3.bf16.msra.mxu0 %v5452_v13 }
 0x9ef   :  { %4544 = vmatprep.subr.bf16.mxu1 %v5323_v0  ;;  %4552 = vmatprep.subr.bf16.mxu0 %v5323_v0 }
 0x9f1   :  { %4533 = vmatmul.mubr.msk.bf16.vlgmr.msra.gmra.mrb[28].mxu1 %vm156_vm2, %v887_v15  ;;  %4541 = vmatmul.mubr.msk.bf16.vlgmr.msra.gmra.mrb[32].mxu0 %vm156_vm2, %v887_v15 }
 0x9f2   :  { %4545 = vmatpush3.bf16.msra.mxu1 %v5413_v1  ;;  %4553 = vmatpush3.bf16.msra.mxu0 %v5429_v7 }
 0x9f3   :  { %4546 = vmatprep.subr.bf16.mxu1 %v5323_v0  ;;  %4554 = vmatprep.subr.bf16.mxu0 %v5323_v0 }
 0x9f4   :  { %4548 = vmatprep.mubr.msk.bf16.mxu1 %vm5324_vm0, %v5323_v0  ;;  %4556 = vmatprep.mubr.msk.bf16.mxu0 %vm5324_vm0, %v5323_v0 }
 0x9f6   :  { %4547 = vmatpush3.bf16.msra.mxu1 %v5419_v3  ;;  %4555 = vmatpush3.bf16.msra.mxu0 %v5436_v9 }
 0x9f7   :  { %4560 = vmatprep.subr.bf16.mxu1 %v5323_v0  ;;  %4568 = vmatprep.subr.bf16.mxu0 %v5323_v0 }
 0xabc   :  { %v925_v16 = vpop.f32.mrb[24].mxu1  ;;  %v969_v17 = vpop.f32.mrb[28].mxu0 }
 0xabd   :  { %v4518_v18 = vpop.f32.mrb[25].mxu1  ;;  %v4526_v20 = vpop.f32.mrb[29].mxu0  ;;  %v976_v34 = vrot.slane %v969_v17, 2  ;;  %v932_v40 = vrot.slane %v925_v16, 2 }
 0xabe   :  { %v928_v21 = vpop.f32.mrb[26].mxu1  ;;  %v972_v22 = vpop.f32.mrb[30].mxu0 }
 0xabf   :  { %v4519_v23 = vpop.f32.mrb[27].mxu1  ;;  %v4527_v24 = vpop.f32.mrb[31].mxu0  ;;  %v934_v41 = vadd.f32 %v932_v40, %v5484_v36 }
 0xac1   :  { %v4111_v42 = vmul.f32 -1.442695, %v934_v41 }
 0xac4   :  { %v1015_v25 = vpop.f32.mrb[28].mxu1  ;;  %v1061_v26 = vpop.f32.mrb[32].mxu0 }
 0xac5   :  { %v1022_v27 = vrot.slane %v1015_v25, 2  ;;  %v4534_v28 = vpop.f32.mrb[29].mxu1  ;;  %v4542_v29 = vpop.f32.mrb[33].mxu0  ;;  %v1068_v35 = vrot.slane %v1061_v26, 2 }
 0xac6   :  { %v1018_v30 = vpop.f32.mrb[30].mxu1  ;;  %v1064_v31 = vpop.f32.mrb[34].mxu0 }
 0xac7   :  { %1023 = vrot.lane.b32.xlu1 %v1022_v27, %s5320_s19  ;;  %v4535_v32 = vpop.f32.mrb[31].mxu1  ;;  %v4543_v33 = vpop.f32.mrb[35].mxu0 }
 0xacb   :  { %977 = vrot.lane.b32.xlu1 %v976_v34, %s5326_s18 }
 0xacf   :  { %1069 = vrot.lane.b32.xlu1 %v1068_v35, %s5327_s3 }
 0xb39   :  { %v1024_v37 = vpop.permute.xlu1 %1023 }
 0xb3a   :  { %v1026_v38 = vadd.f32 %v1024_v37, %v5484_v36 }
 0xb3c   :  { %5023 = vtanh.f32 %v1026_v38 }
 0xb3d   :  { %5025 = vpow2.f32 %v4111_v42  ;;  %v978_v48 = vpop.permute.xlu1 %977 }
 0xb3e   :  { %v980_v49 = vadd.f32 %v978_v48, %v5484_v36 }
 0xb40   :  { %v4112_v50 = vmul.f32 -1.442695, %v980_v49 }
 0xb41   :  { %v1070_v62 = vpop.permute.xlu1 %1069 }
 0xb42   :  { %v1072_v63 = vadd.f32 %v1070_v62, %v5484_v36 }
 0xb44   :  { %v4113_v4 = vmul.f32 -1.442695, %v1072_v63 }
 0xb46   :  { %v5024_v39 = vpop.eup %5023 }
 0xb47   :  { %1097 = vrot.lane.b32.xlu0 %v5024_v39, %s5320_s19  ;;  %v5026_v43 = vpop.eup %5025 }
 0xb48   :  { %v1076_v44 = vadd.f32 1.0, %v5026_v43 }
 0xb4a   :  { %5027 = vrcp.f32 %v1076_v44 }
 0xb4b   :  { %5029 = vpow2.f32 %v4112_v50 }
 0xb54   :  { %v5028_v45 = vpop.eup %5027 }
 0xb55   :  { %v5030_v51 = vpop.eup %5029 }
 0xb56   :  { %v1082_v52 = vadd.f32 1.0, %v5030_v51 }
 0xb58   :  { %5031 = vrcp.f32 %v1082_v52 }
 0xb62   :  { %v5032_v53 = vpop.eup %5031 }
 0xb63   :  { %v1095_v58 = vmul.f32 %v5032_v53, %v1093_v56 }
 0xbb9   :  { %v1098_v46 = vpop.permute.xlu0 %1097 }
 0xbba   :  { %v1100_v47 = vmul.f32 %v5028_v45, %v1098_v46 }
 0xbbc   :  { %1102 = vrot.lane.b32.xlu0 %v1100_v47, %s5326_s18 }
 0xc2e   :  { %v1103_v59 = vpop.permute.xlu0 %1102 }
 0xc2f   :  { %v5633_v60 = vadd.f32 %v1103_v59, %v1095_v58 }
 0xc31   :  { %5033 = vtanh.f32 %v5633_v60  ;;  %v1322_v49 = vrot.slane %v5633_v60, 6 }
 0xc32   :  { %5035 = vpow2.f32 %v4113_v4 }
 0xc3b   :  { %v5034_v61 = vpop.eup %5033 }
 0xc3c   :  { %1108 = vrot.lane.b32.xlu0 %v5034_v61, %s5320_s19  ;;  %v5036_v5 = vpop.eup %5035 }
 0xc3d   :  { %v1089_v6 = vadd.f32 1.0, %v5036_v5 }
 0xc3f   :  { %5037 = vrcp.f32 %v1089_v6 }
 0xc49   :  { %v5038_v14 = vpop.eup %5037 }
 0xcae   :  { %v1109_v15 = vpop.permute.xlu0 %1108 }
 0xcaf   :  { %v5638_v57 = vmul.f32 %v5038_v14, %v1109_v15 }
 0xcb1   :  { %v1118_v16 = vpack.c.bf16 %v5638_v57, %v5638_v57 }
 0xcb3   :  { %v1120_v17 = vrot.slane %v1118_v16, 3 }
 0xcb5   :  { %1121 = vrot.lane.b32.xlu1 %v1120_v17, %s5326_s18 }
 0xd27   :  { %v1122_v18 = vpop.permute.xlu1 %1121 }
 0xd28   :  { %4549 = vmatmul.mubr.msk.bf16.vlgmr.msra.gmra.mrb[32].mxu1 %vm156_vm2, %v1122_v18  ;;  %4557 = vmatmul.mubr.msk.bf16.vlgmr.msra.gmra.mrb[36].mxu0 %vm156_vm2, %v1122_v18 }
 0xd29   :  { %4561 = vmatpush3.bf16.msra.mxu1 %v5432_v8  ;;  %4569 = vmatpush3.bf16.msra.mxu0 %v5444_v12 }
 0xd2a   :  { %4562 = vmatprep.subr.bf16.mxu1 %v5323_v0  ;;  %4570 = vmatprep.subr.bf16.mxu0 %v5323_v0 }
 0xd2b   :  { %4564 = vmatprep.mubr.msk.bf16.mxu1 %vm5324_vm0, %v5323_v0  ;;  %4572 = vmatprep.mubr.msk.bf16.mxu0 %vm5324_vm0, %v5323_v0 }
 0xd2d   :  { %4563 = vmatpush3.bf16.msra.mxu1 %v5442_v11  ;;  %4571 = vmatpush3.bf16.msra.mxu0 %v5452_v13 }
 0xd2e   :  { %4576 = vmatprep.subr.bf16.mxu1 %v5323_v0  ;;  %4584 = vmatprep.subr.bf16.mxu0 %v5323_v0 }
 0xd30   :  { %4565 = vmatmul.mubr.msk.bf16.vlgmr.msra.gmra.mrb[36].mxu1 %vm156_vm2, %v1122_v18  ;;  %4573 = vmatmul.mubr.msk.bf16.vlgmr.msra.gmra.mrb[40].mxu0 %vm156_vm2, %v1122_v18 }
 0xd31   :  { %4577 = vmatpush3.bf16.msra.mxu1 %v5413_v1  ;;  %4585 = vmatpush3.bf16.msra.mxu0 %v5429_v7 }
 0xd32   :  { %4578 = vmatprep.subr.bf16.mxu1 %v5323_v0  ;;  %4586 = vmatprep.subr.bf16.mxu0 %v5323_v0 }
 0xd33   :  { %4580 = vmatprep.mubr.msk.bf16.mxu1 %vm5324_vm0, %v5323_v0  ;;  %4588 = vmatprep.mubr.msk.bf16.mxu0 %vm5324_vm0, %v5323_v0 }
 0xd35   :  { %4579 = vmatpush3.bf16.msra.mxu1 %v5419_v3  ;;  %4587 = vmatpush3.bf16.msra.mxu0 %v5436_v9 }
 0xd36   :  { %4592 = vmatprep.subr.bf16.mxu1 %v5323_v0  ;;  %4600 = vmatprep.subr.bf16.mxu0 %v5323_v0 }
 0xdfb   :  { %v1160_v1 = vpop.f32.mrb[32].mxu1  ;;  %v1201_v7 = vpop.f32.mrb[36].mxu0 }
 0xdfc   :  { %v4550_v36 = vpop.f32.mrb[33].mxu1  ;;  %v4558_v20 = vpop.f32.mrb[37].mxu0  ;;  %v1166_v35 = vadd.f32 %v1160_v1, %v5480_v19 }
 0xdfd   :  { %v1163_v21 = vpop.f32.mrb[34].mxu1  ;;  %v1204_v22 = vpop.f32.mrb[38].mxu0 }
 0xdfe   :  { %v4551_v23 = vpop.f32.mrb[35].mxu1  ;;  %v4559_v24 = vpop.f32.mrb[39].mxu0  ;;  %v4118_v37 = vmul.f32 -1.442695, %v1166_v35 }
 0xe03   :  { %v1246_v25 = vpop.f32.mrb[36].mxu1  ;;  %v1291_v26 = vpop.f32.mrb[40].mxu0 }
 0xe04   :  { %1253 = vrot.lane.b32.xlu0 %v1246_v25, %s5320_s19  ;;  %v4566_v27 = vpop.f32.mrb[37].mxu1  ;;  %v4574_v3 = vpop.f32.mrb[41].mxu0 }
 0xe05   :  { %v1249_v28 = vpop.f32.mrb[38].mxu1  ;;  %v1294_v29 = vpop.f32.mrb[42].mxu0 }
 0xe06   :  { %v4567_v30 = vpop.f32.mrb[39].mxu1  ;;  %v4575_v31 = vpop.f32.mrb[43].mxu0 }
 0xe08   :  { %1208 = vrot.lane.b32.xlu0 %v1201_v7, %s5326_s18 }
 0xe0c   :  { %1298 = vrot.lane.b32.xlu0 %v1291_v26, %s5327_s3 }
 0xe76   :  { %v1254_v32 = vpop.permute.xlu0 %1253 }
 0xe77   :  { %v1256_v33 = vadd.f32 %v1254_v32, %v5480_v19 }
 0xe79   :  { %5039 = vtanh.f32 %v1256_v33 }
 0xe7a   :  { %5041 = vpow2.f32 %v4118_v37  ;;  %v1209_v43 = vpop.permute.xlu0 %1208 }
 0xe7b   :  { %v1211_v44 = vadd.f32 %v1209_v43, %v5480_v19 }
 0xe7d   :  { %v4119_v45 = vmul.f32 -1.442695, %v1211_v44 }
 0xe7e   :  { %v1299_v56 = vpop.permute.xlu0 %1298 }
 0xe7f   :  { %v1301_v58 = vadd.f32 %v1299_v56, %v5480_v19 }
 0xe81   :  { %v4120_v59 = vmul.f32 -1.442695, %v1301_v58 }
 0xe83   :  { %v5040_v34 = vpop.eup %5039 }
 0xe84   :  { %1326 = vrot.lane.b32.xlu1 %v5040_v34, %s5320_s19  ;;  %v5042_v38 = vpop.eup %5041 }
 0xe85   :  { %v1305_v39 = vadd.f32 1.0, %v5042_v38 }
 0xe87   :  { %5043 = vrcp.f32 %v1305_v39 }
 0xe88   :  { %5045 = vpow2.f32 %v4119_v45 }
 0xe91   :  { %v5044_v40 = vpop.eup %5043 }
 0xe92   :  { %v5046_v46 = vpop.eup %5045 }
 0xe93   :  { %v1311_v47 = vadd.f32 1.0, %v5046_v46 }
 0xe95   :  { %5047 = vrcp.f32 %v1311_v47 }
 0xe9f   :  { %v5048_v48 = vpop.eup %5047 }
 0xea0   :  { %v1324_v50 = vmul.f32 %v5048_v48, %v1322_v49 }
 0xef6   :  { %v1327_v41 = vpop.permute.xlu1 %1326 }
 0xef7   :  { %v1329_v42 = vmul.f32 %v5044_v40, %v1327_v41 }
 0xef9   :  { %1331 = vrot.lane.b32.xlu1 %v1329_v42, %s5326_s18 }
 0xf6b   :  { %v1332_v51 = vpop.permute.xlu1 %1331 }
 0xf6c   :  { %v5680_v52 = vadd.f32 %v1332_v51, %v1324_v50 }
 0xf6e   :  { %5049 = vtanh.f32 %v5680_v52  ;;  %v1555_v46 = vrot.slane %v5680_v52, 6 }
 0xf6f   :  { %5051 = vpow2.f32 %v4120_v59 }
 0xf78   :  { %v5050_v53 = vpop.eup %5049 }
 0xf79   :  { %1337 = vrot.lane.b32.xlu1 %v5050_v53, %s5320_s19  ;;  %v5052_v61 = vpop.eup %5051 }
 0xf7a   :  { %v1318_v62 = vadd.f32 1.0, %v5052_v61 }
 0xf7c   :  { %5053 = vrcp.f32 %v1318_v62 }
 0xf86   :  { %v5054_v63 = vpop.eup %5053 }
 0xfeb   :  { %v1338_v4 = vpop.permute.xlu1 %1337 }
 0xfec   :  { %v5685_v60 = vmul.f32 %v5054_v63, %v1338_v4 }
 0xfee   :  { %v1346_v5 = vpack.c.bf16 %v5685_v60, %v5685_v60 }
 0xff0   :  { %1348 = vrot.lane.b32.xlu0 %v1346_v5, %s5326_s18 }
0x1062   :  { %v1349_v6 = vpop.permute.xlu0 %1348 }
0x1063   :  { %4581 = vmatmul.mubr.msk.bf16.vlgmr.msra.gmra.mrb[40].mxu1 %vm156_vm2, %v1349_v6  ;;  %4589 = vmatmul.mubr.msk.bf16.vlgmr.msra.gmra.mrb[44].mxu0 %vm156_vm2, %v1349_v6 }
0x1064   :  { %4593 = vmatpush3.bf16.msra.mxu1 %v5432_v8  ;;  %4601 = vmatpush3.bf16.msra.mxu0 %v5444_v12  ;;  %v5706_v8 = vld [vmem:[#allocation3] sm:$0xff]   ;;  %v5709_v12 = vld [vmem:[#allocation3 + $0x10] sm:$0xff]  }
0x1065   :  { %4594 = vmatprep.subr.bf16.mxu1 %v5323_v0  ;;  %4602 = vmatprep.subr.bf16.mxu0 %v5323_v0 }
0x1066   :  { %4596 = vmatprep.mubr.msk.bf16.mxu1 %vm5324_vm0, %v5323_v0  ;;  %4604 = vmatprep.mubr.msk.bf16.mxu0 %vm5324_vm0, %v5323_v0 }
0x1068   :  { %4595 = vmatpush3.bf16.msra.mxu1 %v5442_v11  ;;  %4603 = vmatpush3.bf16.msra.mxu0 %v5452_v13  ;;  %v5718_v11 = vld [vmem:[#allocation3 + $0x8] sm:$0xff]  }
0x1069   :  { %4608 = vmatprep.subr.bf16.mxu1 %v5323_v0  ;;  %4616 = vmatprep.subr.bf16.mxu0 %v5323_v0 }
0x106b   :  { %4597 = vmatmul.mubr.msk.bf16.vlgmr.msra.gmra.mrb[44].mxu1 %vm156_vm2, %v1349_v6  ;;  %4605 = vmatmul.mubr.msk.bf16.vlgmr.msra.gmra.mrb[48].mxu0 %vm156_vm2, %v1349_v6  ;;  %v5745_v6 = vld [vmem:[#allocation3 + $0x20] sm:$0xff]  }
0x106c   :  { %4609 = vmatpush3.bf16.msra.mxu1 %v5706_v8  ;;  %4617 = vmatpush3.bf16.msra.mxu0 %v5709_v12 }
0x106d   :  { %4610 = vmatprep.subr.bf16.mxu1 %v5323_v0  ;;  %4618 = vmatprep.subr.bf16.mxu0 %v5323_v0 }
0x106e   :  { %4612 = vmatprep.mubr.msk.bf16.mxu1 %vm5324_vm0, %v5323_v0  ;;  %4620 = vmatprep.mubr.msk.bf16.mxu0 %vm5324_vm0, %v5323_v0 }
0x1070   :  { %4611 = vmatpush3.bf16.msra.mxu1 %v5718_v11  ;;  %4619 = vmatpush3.bf16.msra.mxu0 %v5436_v9 }
0x1071   :  { %4624 = vmatprep.subr.bf16.mxu1 %v5323_v0  ;;  %4632 = vmatprep.subr.bf16.mxu0 %v5323_v0 }
0x1136   :  { %v1387_v13 = vpop.f32.mrb[40].mxu1  ;;  %v1431_v14 = vpop.f32.mrb[44].mxu0 }
0x1137   :  { %v4582_v15 = vpop.f32.mrb[41].mxu1  ;;  %v4590_v16 = vpop.f32.mrb[45].mxu0  ;;  %v1438_v27 = vrot.slane %v1431_v14, 6  ;;  %v1394_v31 = vrot.slane %v1387_v13, 6  ;;  %v5748_v13 = vld [vmem:[#allocation3 + $0x30] sm:$0xff]   ;;  %v5757_v14 = vld [vmem:[#allocation3 + $0x28] sm:$0xff]  }
0x1138   :  { %v1390_v17 = vpop.f32.mrb[42].mxu1  ;;  %v1434_v18 = vpop.f32.mrb[46].mxu0  ;;  %v5760_v15 = vld [vmem:[#allocation3 + $0x38] sm:$0xff]  }
0x1139   :  { %v4583_v1 = vpop.f32.mrb[43].mxu1  ;;  %v4591_v7 = vpop.f32.mrb[47].mxu0  ;;  %v1396_v32 = vadd.f32 %v1394_v31, %v5480_v19  ;;  %v5238_v16 = vld [vmem:[#allocation3 + $0x18] sm:$0xff]  }
0x113b   :  { %v4125_v33 = vmul.f32 -1.442695, %v1396_v32 }
0x113e   :  { %v1477_v36 = vpop.f32.mrb[44].mxu1  ;;  %v1523_v20 = vpop.f32.mrb[48].mxu0 }
0x113f   :  { %v1484_v21 = vrot.slane %v1477_v36, 6  ;;  %v4598_v22 = vpop.f32.mrb[45].mxu1  ;;  %v4606_v23 = vpop.f32.mrb[49].mxu0  ;;  %v1530_v3 = vrot.slane %v1523_v20, 6 }
0x1140   :  { %v1480_v24 = vpop.f32.mrb[46].mxu1  ;;  %v1526_v25 = vpop.f32.mrb[50].mxu0 }
0x1141   :  { %1485 = vrot.lane.b32.xlu1 %v1484_v21, %s5320_s19  ;;  %v4599_v9 = vpop.f32.mrb[47].mxu1  ;;  %v4607_v26 = vpop.f32.mrb[51].mxu0 }
0x1145   :  { %1439 = vrot.lane.b32.xlu1 %v1438_v27, %s5326_s18 }
0x1149   :  { %1531 = vrot.lane.b32.xlu1 %v1530_v3, %s5327_s3 }
0x11b3   :  { %v1486_v28 = vpop.permute.xlu1 %1485 }
0x11b4   :  { %v1488_v29 = vadd.f32 %v1486_v28, %v5480_v19 }
0x11b6   :  { %5055 = vtanh.f32 %v1488_v29 }
0x11b7   :  { %5057 = vpow2.f32 %v4125_v33  ;;  %v1440_v40 = vpop.permute.xlu1 %1439 }
0x11b8   :  { %v1442_v41 = vadd.f32 %v1440_v40, %v5480_v19 }
0x11ba   :  { %v4126_v42 = vmul.f32 -1.442695, %v1442_v41 }
0x11bb   :  { %v1532_v51 = vpop.permute.xlu1 %1531 }
0x11bc   :  { %v1534_v53 = vadd.f32 %v1532_v51, %v5480_v19 }
0x11be   :  { %v4127_v56 = vmul.f32 -1.442695, %v1534_v53 }
0x11c0   :  { %v5056_v30 = vpop.eup %5055 }
0x11c1   :  { %1559 = vrot.lane.b32.xlu0 %v5056_v30, %s5320_s19  ;;  %v5058_v34 = vpop.eup %5057 }
0x11c2   :  { %v1538_v35 = vadd.f32 1.0, %v5058_v34 }
0x11c4   :  { %5059 = vrcp.f32 %v1538_v35 }
0x11c5   :  { %5061 = vpow2.f32 %v4126_v42 }
0x11ce   :  { %v5060_v37 = vpop.eup %5059 }
0x11cf   :  { %v5062_v43 = vpop.eup %5061 }
0x11d0   :  { %v1544_v44 = vadd.f32 1.0, %v5062_v43 }
0x11d2   :  { %5063 = vrcp.f32 %v1544_v44 }
0x11dc   :  { %v5064_v45 = vpop.eup %5063 }
0x11dd   :  { %v1557_v47 = vmul.f32 %v5064_v45, %v1555_v46 }
0x1233   :  { %v1560_v38 = vpop.permute.xlu0 %1559 }
0x1234   :  { %v1562_v39 = vmul.f32 %v5060_v37, %v1560_v38 }
0x1236   :  { %1564 = vrot.lane.b32.xlu0 %v1562_v39, %s5326_s18 }
0x12a8   :  { %v1565_v48 = vpop.permute.xlu0 %1564 }
0x12a9   :  { %v5733_v49 = vadd.f32 %v1565_v48, %v1557_v47 }
0x12ab   :  { %5065 = vtanh.f32 %v5733_v49  ;;  %v1789_v47 = vrot.slane %v5733_v49, 6 }
0x12ac   :  { %5067 = vpow2.f32 %v4127_v56 }
0x12b5   :  { %v5066_v50 = vpop.eup %5065 }
0x12b6   :  { %1570 = vrot.lane.b32.xlu0 %v5066_v50, %s5320_s19  ;;  %v5068_v58 = vpop.eup %5067 }
0x12b7   :  { %v1551_v59 = vadd.f32 1.0, %v5068_v58 }
0x12b9   :  { %5069 = vrcp.f32 %v1551_v59 }
0x12c3   :  { %v5070_v61 = vpop.eup %5069 }
0x1328   :  { %v1571_v62 = vpop.permute.xlu0 %1570 }
0x1329   :  { %v5738_v52 = vmul.f32 %v5070_v61, %v1571_v62 }
0x132b   :  { %v1579_v63 = vpack.c.bf16 %v5738_v52, %v5738_v52 }
0x132d   :  { %v1581_v4 = vrot.slane %v1579_v63, 1 }
0x132f   :  { %1582 = vrot.lane.b32.xlu1 %v1581_v4, %s5326_s18 }
0x13a1   :  { %v1583_v5 = vpop.permute.xlu1 %1582 }
0x13a2   :  { %4613 = vmatmul.mubr.msk.bf16.vlgmr.msra.gmra.mrb[48].mxu1 %vm156_vm2, %v1583_v5  ;;  %4621 = vmatmul.mubr.msk.bf16.vlgmr.msra.gmra.mrb[52].mxu0 %vm156_vm2, %v1583_v5 }
0x13a3   :  { %4625 = vmatpush3.bf16.msra.mxu1 %v5745_v6  ;;  %4633 = vmatpush3.bf16.msra.mxu0 %v5748_v13 }
0x13a4   :  { %4626 = vmatprep.subr.bf16.mxu1 %v5323_v0  ;;  %4634 = vmatprep.subr.bf16.mxu0 %v5323_v0 }
0x13a5   :  { %4628 = vmatprep.mubr.msk.bf16.mxu1 %vm5324_vm0, %v5323_v0  ;;  %4636 = vmatprep.mubr.msk.bf16.mxu0 %vm5324_vm0, %v5323_v0 }
0x13a7   :  { %4627 = vmatpush3.bf16.msra.mxu1 %v5757_v14  ;;  %4635 = vmatpush3.bf16.msra.mxu0 %v5760_v15 }
0x13a8   :  { %4640 = vmatprep.subr.bf16.mxu1 %v5323_v0  ;;  %4648 = vmatprep.subr.bf16.mxu0 %v5323_v0 }
0x13aa   :  { %4629 = vmatmul.mubr.msk.bf16.vlgmr.msra.gmra.mrb[52].mxu1 %vm156_vm2, %v1583_v5  ;;  %4637 = vmatmul.mubr.msk.bf16.vlgmr.msra.gmra.mrb[56].mxu0 %vm156_vm2, %v1583_v5 }
0x13ab   :  { %4641 = vmatpush3.bf16.msra.mxu1 %v5706_v8  ;;  %4649 = vmatpush3.bf16.msra.mxu0 %v5709_v12 }
0x13ac   :  { %4642 = vmatprep.subr.bf16.mxu1 %v5323_v0  ;;  %4650 = vmatprep.subr.bf16.mxu0 %v5323_v0 }
0x13ad   :  { %4644 = vmatprep.mubr.msk.bf16.mxu1 %vm5324_vm0, %v5323_v0  ;;  %4652 = vmatprep.mubr.msk.bf16.mxu0 %vm5324_vm0, %v5323_v0 }
0x13af   :  { %4643 = vmatpush3.bf16.msra.mxu1 %v5718_v11  ;;  %4651 = vmatpush3.bf16.msra.mxu0 %v5238_v16 }
0x13b0   :  { %4656 = vmatprep.subr.bf16.mxu1 %v5323_v0  ;;  %4664 = vmatprep.subr.bf16.mxu0 %v5323_v0 }
0x1475   :  { %v1621_v8 = vpop.f32.mrb[48].mxu1  ;;  %v1665_v12 = vpop.f32.mrb[52].mxu0 }
0x1476   :  { %v4614_v17 = vpop.f32.mrb[49].mxu1  ;;  %v4622_v18 = vpop.f32.mrb[53].mxu0  ;;  %v1672_v3 = vrot.slane %v1665_v12, 4  ;;  %v1628_v32 = vrot.slane %v1621_v8, 4 }
0x1477   :  { %v1624_v1 = vpop.f32.mrb[50].mxu1  ;;  %v1668_v7 = vpop.f32.mrb[54].mxu0 }
0x1478   :  { %v4615_v36 = vpop.f32.mrb[51].mxu1  ;;  %v4623_v20 = vpop.f32.mrb[55].mxu0  ;;  %v1630_v33 = vadd.f32 %v1628_v32, %v5480_v19 }
0x147a   :  { %v4132_v34 = vmul.f32 -1.442695, %v1630_v33 }
0x147d   :  { %v1711_v21 = vpop.f32.mrb[52].mxu1  ;;  %v1757_v22 = vpop.f32.mrb[56].mxu0 }
0x147e   :  { %v1718_v23 = vrot.slane %v1711_v21, 4  ;;  %v4630_v24 = vpop.f32.mrb[53].mxu1  ;;  %v4638_v25 = vpop.f32.mrb[57].mxu0  ;;  %v1764_v28 = vrot.slane %v1757_v22, 4 }
0x147f   :  { %v1714_v11 = vpop.f32.mrb[54].mxu1  ;;  %v1760_v9 = vpop.f32.mrb[58].mxu0 }
0x1480   :  { %1719 = vrot.lane.b32.xlu0 %v1718_v23, %s5320_s19  ;;  %v4631_v26 = vpop.f32.mrb[55].mxu1  ;;  %v4639_v27 = vpop.f32.mrb[59].mxu0 }
0x1484   :  { %1673 = vrot.lane.b32.xlu0 %v1672_v3, %s5326_s18 }
0x1488   :  { %1765 = vrot.lane.b32.xlu0 %v1764_v28, %s5327_s3 }
0x14f2   :  { %v1720_v29 = vpop.permute.xlu0 %1719 }
0x14f3   :  { %v1722_v30 = vadd.f32 %v1720_v29, %v5480_v19 }
0x14f5   :  { %5071 = vtanh.f32 %v1722_v30 }
0x14f6   :  { %5073 = vpow2.f32 %v4132_v34  ;;  %v1674_v41 = vpop.permute.xlu0 %1673 }
0x14f7   :  { %v1676_v42 = vadd.f32 %v1674_v41, %v5480_v19 }
0x14f9   :  { %v4133_v43 = vmul.f32 -1.442695, %v1676_v42 }
0x14fa   :  { %v1766_v56 = vpop.permute.xlu0 %1765 }
0x14fb   :  { %v1768_v58 = vadd.f32 %v1766_v56, %v5480_v19  ;;  %v5839_v56 = vld [vmem:[#allocation6 + $0x20] sm:$0xff]  }
0x14fd   :  { %v4134_v59 = vmul.f32 -1.442695, %v1768_v58  ;;  %v5846_v58 = vld [vmem:[#allocation6 + $0x28] sm:$0xff]  }
0x14ff   :  { %v5072_v31 = vpop.eup %5071 }
0x1500   :  { %1793 = vrot.lane.b32.xlu1 %v5072_v31, %s5320_s19  ;;  %v5074_v35 = vpop.eup %5073 }
0x1501   :  { %v1772_v37 = vadd.f32 1.0, %v5074_v35 }
0x1503   :  { %5075 = vrcp.f32 %v1772_v37 }
0x1504   :  { %5077 = vpow2.f32 %v4133_v43 }
0x150d   :  { %v5076_v38 = vpop.eup %5075 }
0x150e   :  { %v5078_v44 = vpop.eup %5077 }
0x150f   :  { %v1778_v45 = vadd.f32 1.0, %v5078_v44 }
0x1511   :  { %5079 = vrcp.f32 %v1778_v45 }
0x151b   :  { %v5080_v46 = vpop.eup %5079 }
0x151c   :  { %v1791_v48 = vmul.f32 %v5080_v46, %v1789_v47 }
0x1572   :  { %v1794_v39 = vpop.permute.xlu1 %1793 }
0x1573   :  { %v1796_v40 = vmul.f32 %v5076_v38, %v1794_v39 }
0x1575   :  { %1798 = vrot.lane.b32.xlu1 %v1796_v40, %s5326_s18 }
0x15e7   :  { %v1799_v50 = vpop.permute.xlu1 %1798 }
0x15e8   :  { %v5787_v51 = vadd.f32 %v1799_v50, %v1791_v48  ;;  %v5831_v48 = vld [vmem:[#allocation6] sm:$0xff]   ;;  %v5835_v50 = vld [vmem:[#allocation6 + $0x8] sm:$0xff]  }
0x15ea   :  { %5081 = vtanh.f32 %v5787_v51  ;;  %v2023_v37 = vrot.slane %v5787_v51, 6 }
0x15eb   :  { %5083 = vpow2.f32 %v4134_v59 }
0x15f4   :  { %v5082_v53 = vpop.eup %5081 }
0x15f5   :  { %1804 = vrot.lane.b32.xlu1 %v5082_v53, %s5320_s19  ;;  %v5084_v61 = vpop.eup %5083 }
0x15f6   :  { %v1785_v62 = vadd.f32 1.0, %v5084_v61 }
0x15f8   :  { %5085 = vrcp.f32 %v1785_v62 }
0x1602   :  { %v5086_v63 = vpop.eup %5085 }
0x1667   :  { %v1805_v4 = vpop.permute.xlu1 %1804 }
0x1668   :  { %v1807_v49 = vmul.f32 %v5086_v63, %v1805_v4 }
0x166a   :  { %v1813_v5 = vpack.c.bf16 %v1807_v49, %v1807_v49 }
0x166c   :  { %v1815_v16 = vrot.slane %v1813_v5, 2 }
0x166e   :  { %1816 = vrot.lane.b32.xlu0 %v1815_v16, %s5326_s18 }
0x16e0   :  { %v1817_v8 = vpop.permute.xlu0 %1816 }
0x16e1   :  { %4645 = vmatmul.mubr.msk.bf16.vlgmr.msra.gmra.mrb[56].mxu1 %vm156_vm2, %v1817_v8  ;;  %4653 = vmatmul.mubr.msk.bf16.vlgmr.msra.gmra.mrb[60].mxu0 %vm156_vm2, %v1817_v8 }
0x16e2   :  { %4657 = vmatpush3.bf16.msra.mxu1 %v5745_v6  ;;  %4665 = vmatpush3.bf16.msra.mxu0 %v5748_v13 }
0x16e3   :  { %4658 = vmatprep.subr.bf16.mxu1 %v5323_v0  ;;  %4666 = vmatprep.subr.bf16.mxu0 %v5323_v0 }
0x16e4   :  { %4660 = vmatprep.mubr.msk.bf16.mxu1 %vm5324_vm0, %v5323_v0  ;;  %4668 = vmatprep.mubr.msk.bf16.mxu0 %vm5324_vm0, %v5323_v0 }
0x16e6   :  { %4659 = vmatpush3.bf16.msra.mxu1 %v5757_v14  ;;  %4667 = vmatpush3.bf16.msra.mxu0 %v5760_v15 }
0x16e7   :  { %4680 = vmatprep.subr.bf16.mxu0 %v5323_v0  ;;  %4672 = vmatprep.subr.bf16.mxu1 %v5323_v0 }
0x16e9   :  { %4661 = vmatmul.mubr.msk.bf16.vlgmr.msra.gmra.mrb[60].mxu1 %vm156_vm2, %v1817_v8  ;;  %4669 = vmatmul.mubr.msk.bf16.vlgmr.msra.gmra.mrb[64].mxu0 %vm156_vm2, %v1817_v8 }
0x16ea   :  { %4684 = vmatprep.mubr.msk.bf16.mxu0 %vm5324_vm0, %v5323_v0  ;;  %4676 = vmatprep.mubr.msk.bf16.mxu1 %vm5324_vm0, %v5323_v0 }
0x16eb   :  { %4681 = vmatpush3.bf16.msra.mxu0 %v5831_v48 }
0x16ec   :  { %4682 = vmatprep.subr.bf16.mxu0 %v5323_v0 }
0x16ef   :  { %4683 = vmatpush3.bf16.msra.mxu0 %v5835_v50 }
0x16f0   :  { %4696 = vmatprep.subr.bf16.mxu0 %v5323_v0 }
0x16f2   :  { %4685 = vmatmul.mubr.bf16.vlgmr.msra.gmra.mrb[68].mxu0 %v5325_v10 }
0x16f3   :  { %4697 = vmatpush3.bf16.msra.mxu0 %v5839_v56  ;;  %4700 = vmatprep.mubr.msk.bf16.mxu0 %vm5324_vm0, %v5323_v0 }
0x16f4   :  { %4698 = vmatprep.subr.bf16.mxu0 %v5323_v0 }
0x16f7   :  { %4699 = vmatpush3.bf16.msra.mxu0 %v5846_v58 }
0x16f8   :  { %4712 = vmatprep.subr.bf16.mxu0 %v5323_v0 }
0x16fa   :  { %4701 = vmatmul.mubr.bf16.vlgmr.msra.gmra.mrb[72].mxu0 %v5325_v10 }
0x16fb   :  { %4713 = vmatpush3.bf16.msra.mxu0 %v5831_v48  ;;  %4716 = vmatprep.mubr.msk.bf16.mxu0 %vm5324_vm0, %v5323_v0 }
0x16fc   :  { %4714 = vmatprep.subr.bf16.mxu0 %v5323_v0 }
0x16ff   :  { %4715 = vmatpush3.bf16.msra.mxu0 %v5835_v50 }
0x1700   :  { %4728 = vmatprep.subr.bf16.mxu0 %v5323_v0 }
0x17b4   :  { %v1855_v6 = vpop.f32.mrb[56].mxu1  ;;  %v1899_v13 = vpop.f32.mrb[60].mxu0 }
0x17b5   :  { %v4646_v12 = vpop.f32.mrb[57].mxu1  ;;  %v4654_v14 = vpop.f32.mrb[61].mxu0  ;;  %v1906_v9 = vrot.slane %v1899_v13, 2  ;;  %v1862_v40 = vrot.slane %v1855_v6, 2 }
0x17b6   :  { %v1858_v17 = vpop.f32.mrb[58].mxu1  ;;  %v1902_v15 = vpop.f32.mrb[62].mxu0 }
0x17b7   :  { %v4647_v18 = vpop.f32.mrb[59].mxu1  ;;  %v4655_v1 = vpop.f32.mrb[63].mxu0  ;;  %v1864_v41 = vadd.f32 %v1862_v40, %v5480_v19 }
0x17b9   :  { %v4139_v42 = vmul.f32 -1.442695, %v1864_v41 }
0x17bc   :  { %v1945_v7 = vpop.f32.mrb[60].mxu1  ;;  %v1991_v36 = vpop.f32.mrb[64].mxu0 }
0x17bd   :  { %v1952_v20 = vrot.slane %v1945_v7, 2  ;;  %v4662_v21 = vpop.f32.mrb[61].mxu1  ;;  %v4670_v22 = vpop.f32.mrb[65].mxu0  ;;  %v1998_v26 = vrot.slane %v1991_v36, 2 }
0x17be   :  { %v1948_v23 = vpop.f32.mrb[62].mxu1  ;;  %v1994_v24 = vpop.f32.mrb[66].mxu0  ;;  %v5875_v21 = vld [vmem:[#allocation6 + $0x10] sm:$0xff]  }
0x17bf   :  { %1953 = vrot.lane.b32.xlu1 %v1952_v20, %s5320_s19  ;;  %v4663_v25 = vpop.f32.mrb[63].mxu1  ;;  %v4671_v11 = vpop.f32.mrb[67].mxu0  ;;  %v5879_v23 = vld [vmem:[#allocation6 + $0x18] sm:$0xff]   ;;  %v5885_v24 = vld [vmem:[#allocation6 + $0x30] sm:$0xff]  }
0x17c0   :  { %v5890_v25 = vld [vmem:[#allocation6 + $0x38] sm:$0xff]   ;;  %v4142_v11 = vld [vmem:[%s6251_s6] ss:$0 sm:$0xff] }
0x17c3   :  { %1907 = vrot.lane.b32.xlu1 %v1906_v9, %s5326_s18 }
0x17c5   :  { %v2182_v6 = vpop.f32.mrb[68].mxu0 }
0x17c6   :  { %v4686_v13 = vpop.f32.mrb[69].mxu0 }
0x17c7   :  { %1999 = vrot.lane.b32.xlu1 %v1998_v26, %s5327_s3  ;;  %v2185_v12 = vpop.f32.mrb[70].mxu0 }
0x17c8   :  { %v4687_v14 = vpop.f32.mrb[71].mxu0 }
0x17cb   :  { %409 = vrot.lane.b32.xlu1 %v5497_v2, %s5326_s18 }
0x17cd   :  { %v2292_v17 = vpop.f32.mrb[72].mxu0 }
0x17ce   :  { %v4702_v15 = vpop.f32.mrb[73].mxu0 }
0x17cf   :  { %878 = vrot.lane.b32.xlu1 %v5591_v54, %s5326_s18  ;;  %v2295_v18 = vpop.f32.mrb[74].mxu0 }
0x17d0   :  { %v4703_v1 = vpop.f32.mrb[75].mxu0 }
0x17d3   :  { %1342 = vrot.lane.b32.xlu1 %v5685_v60, %s5326_s18 }
0x17d7   :  { %1809 = vrot.lane.b32.xlu1 %v1807_v49, %s5326_s18  ;;  %v4967_v49 = vld [vmem:[%s6249_s4] sm:$0xff]  }
0x17d8   :  { %4673 = vmatpush3.bf16.msra.mxu1 %v4967_v49 }
0x17d9   :  { %4674 = vmatprep.subr.bf16.mxu1 %v5323_v0 }
0x17db   :  { %2299 = vrot.lane.b32.xlu1 %v2292_v17, %s5320_s19 }
0x1831   :  { %v1954_v27 = vpop.permute.xlu1 %1953 }
0x1832   :  { %v1956_v3 = vadd.f32 %v1954_v27, %v5480_v19 }
0x1834   :  { %5087 = vtanh.f32 %v1956_v3 }
0x1835   :  { %v1908_v28 = vpop.permute.xlu1 %1907 }
0x1836   :  { %v1910_v29 = vadd.f32 %v1908_v28, %v5480_v19 }
0x1838   :  { %v4140_v30 = vmul.f32 -1.442695, %v1910_v29 }
0x1839   :  { %v2000_v31 = vpop.permute.xlu1 %1999 }
0x183a   :  { %5089 = vpow2.f32 %v4140_v30  ;;  %v2002_v61 = vadd.f32 %v2000_v31, %v5480_v19 }
0x183c   :  { %v4141_v62 = vmul.f32 -1.442695, %v2002_v61 }
0x183d   :  { %v410_v2 = vpop.permute.xlu1 %409 }
0x183e   :  { %v5088_v32 = vpop.eup %5087  ;;  %413 = vst.msk [vmem:[#allocation2] sm:$0x3] %vm412_vm3, %v410_v2 }
0x183f   :  { %2027 = vrot.lane.b32.xlu0 %v5088_v32, %s5320_s19 }
0x1841   :  { %v879_v54 = vpop.permute.xlu1 %878 }
0x1842   :  { %882 = vst.msk [vmem:[#allocation2] sm:$0x30] %vm881_vm4, %v879_v54 }
0x1844   :  { %v5090_v60 = vpop.eup %5089 }
0x1845   :  { %v2012_v33 = vadd.f32 1.0, %v5090_v60  ;;  %v1343_v34 = vpop.permute.xlu1 %1342 }
0x1846   :  { %1345 = vst.msk [vmem:[#allocation2 + $0x8] sm:$0x3] %vm412_vm3, %v1343_v34 }
0x1847   :  { %5091 = vrcp.f32 %v2012_v33 }
0x1848   :  { %5093 = vpow2.f32 %v4139_v42 }
0x1849   :  { %v1810_v35 = vpop.permute.xlu1 %1809 }
0x184a   :  { %1812 = vst.msk [vmem:[#allocation2 + $0x8] sm:$0x30] %vm881_vm4, %v1810_v35 }
0x184d   :  { %v2300_v26 = vpop.permute.xlu1 %2299 }
0x1851   :  { %v5092_v38 = vpop.eup %5091 }
0x1852   :  { %v2025_v39 = vmul.f32 %v5092_v38, %v2023_v37  ;;  %v5094_v43 = vpop.eup %5093 }
0x1853   :  { %v2006_v44 = vadd.f32 1.0, %v5094_v43 }
0x1855   :  { %5095 = vrcp.f32 %v2006_v44 }
0x185f   :  { %v5096_v45 = vpop.eup %5095 }
0x18b1   :  { %v2028_v46 = vpop.permute.xlu0 %2027 }
0x18b2   :  { %v2030_v47 = vmul.f32 %v5096_v45, %v2028_v46 }
0x18b4   :  { %2032 = vrot.lane.b32.xlu0 %v2030_v47, %s5326_s18 }
0x1926   :  { %v2033_v51 = vpop.permute.xlu0 %2032 }
0x1927   :  { %v2035_v53 = vadd.f32 %v2033_v51, %v2025_v39 }
0x1929   :  { %5097 = vtanh.f32 %v2035_v53 }
0x192a   :  { %5099 = vpow2.f32 %v4141_v62 }
0x1933   :  { %v5098_v59 = vpop.eup %5097 }
0x1934   :  { %2038 = vrot.lane.b32.xlu0 %v5098_v59, %s5320_s19  ;;  %v5100_v63 = vpop.eup %5099 }
0x1935   :  { %v2019_v4 = vadd.f32 1.0, %v5100_v63 }
0x1937   :  { %5101 = vrcp.f32 %v2019_v4 }
0x1938   :  { %643 = vrot.lane.b32.xlu0 %v5544_v55, %s5326_s18  ;;  %v4968_v55 = vld [vmem:[%s6249_s4 + $0x8] sm:$0xff]  }
0x1939   :  { %4675 = vmatpush3.bf16.msra.mxu1 %v4968_v55 }
0x193a   :  { %4688 = vmatprep.subr.bf16.mxu1 %v5323_v0 }
0x193c   :  { %1113 = vrot.lane.b32.xlu0 %v5638_v57, %s5326_s18 }
0x1940   :  { %1575 = vrot.lane.b32.xlu0 %v5738_v52, %s5326_s18 }
0x1941   :  { %v5102_v19 = vpop.eup %5101 }
0x19a6   :  { %v2039_v57 = vpop.permute.xlu0 %2038 }
0x19a7   :  { %v2041_v52 = vmul.f32 %v5102_v19, %v2039_v57 }
0x19a9   :  { %2043 = vrot.lane.b32.xlu0 %v2041_v52, %s5326_s18 }
0x19aa   :  { %v644_v5 = vpop.permute.xlu0 %643 }
0x19ab   :  { %647 = vst.msk [vmem:[#allocation2] sm:$0xc] %vm646_vm5, %v644_v5 }
0x19ae   :  { %v1114_v16 = vpop.permute.xlu0 %1113 }
0x19af   :  { %1117 = vst.msk [vmem:[#allocation2] sm:$0xc0] %vm1116_vm6, %v1114_v16 }
0x19b2   :  { %v1576_v8 = vpop.permute.xlu0 %1575 }
0x19b3   :  { %1578 = vst.msk [vmem:[#allocation2 + $0x8] sm:$0xc] %vm646_vm5, %v1576_v8 }
0x19b6   :  { %v2047_v36 = vld [vmem:[#allocation2] sm:$0xff] }
0x1a1b   :  { %v2044_v7 = vpop.permute.xlu0 %2043 }
0x1a1c   :  { %2046 = vst.msk [vmem:[#allocation2 + $0x8] sm:$0xc0] %vm1116_vm6, %v2044_v7 }
0x1a23   :  { %v2048_v20 = vld [vmem:[#allocation2 + $0x8] sm:$0xff] }
0x1a24   :  { %v2049_v22 = vpack.c.bf16 %v2048_v20, %v2047_v36 }
0x1a26   :  { %4677 = vmatmul.mubr.msk.bf16.vlgmr.msra.gmra.mrb[64].mxu1 %vm156_vm2, %v2049_v22 }
0x1a27   :  { %4689 = vmatpush3.bf16.msra.mxu1 %v5875_v21  ;;  %4692 = vmatprep.mubr.msk.bf16.mxu1 %vm5324_vm0, %v5323_v0 }
0x1a28   :  { %4690 = vmatprep.subr.bf16.mxu1 %v5323_v0 }
0x1a2b   :  { %4691 = vmatpush3.bf16.msra.mxu1 %v5879_v23 }
0x1a2c   :  { %4704 = vmatprep.subr.bf16.mxu1 %v5323_v0 }
0x1a2e   :  { %4693 = vmatmul.mubr.bf16.vlgmr.msra.gmra.mrb[68].mxu1 %v5325_v10 }
0x1a2f   :  { %4705 = vmatpush3.bf16.msra.mxu1 %v5885_v24  ;;  %4708 = vmatprep.mubr.msk.bf16.mxu1 %vm5324_vm0, %v5323_v0 }
0x1a30   :  { %4706 = vmatprep.subr.bf16.mxu1 %v5323_v0 }
0x1a33   :  { %4707 = vmatpush3.bf16.msra.mxu1 %v5890_v25 }
0x1a34   :  { %4720 = vmatprep.subr.bf16.mxu1 %v5323_v0 }
0x1a36   :  { %4709 = vmatmul.mubr.bf16.vlgmr.msra.gmra.mrb[72].mxu1 %v5325_v10 }
0x1a37   :  { %4721 = vmatpush3.bf16.msra.mxu1 %v5875_v21  ;;  %4724 = vmatprep.mubr.msk.bf16.mxu1 %vm5324_vm0, %v5323_v0 }
0x1a38   :  { %4722 = vmatprep.subr.bf16.mxu1 %v5323_v0 }
0x1a3b   :  { %4723 = vmatpush3.bf16.msra.mxu1 %v5879_v23 }
0x1a3c   :  { %4736 = vmatprep.subr.bf16.mxu1 %v5323_v0 }
0x1af9   :  { %v2110_v9 = vpop.f32.mrb[64].mxu1 }
0x1afa   :  { %v5907_v27 = vadd.f32 %v4142_v11, %v2110_v9  ;;  %v4678_v10 = vpop.f32.mrb[65].mxu1 }
0x1afb   :  { %v2113_v3 = vpop.f32.mrb[66].mxu1 }
0x1afc   :  { %v5909_v28 = vadd.f32 %v4142_v11, %v2113_v3  ;;  %v2302_v29 = vadd.f32 %v2300_v26, %v5907_v27  ;;  %v4679_v30 = vpop.f32.mrb[67].mxu1  ;;  %v2188_v38 = vadd.f32 %v2182_v6, %v5907_v27 }
0x1afe   :  { %5103 = vtanh.f32 %v2302_v29  ;;  %v4154_v39 = vmul.f32 -1.442695, %v2188_v38 }
0x1b00   :  { %5105 = vpow2.f32 %v4154_v39 }
0x1b01   :  { %v2235_v31 = vpop.f32.mrb[68].mxu1 }
0x1b02   :  { %2242 = vrot.lane.b32.xlu1 %v2235_v31, %s5326_s18  ;;  %v4694_v2 = vpop.f32.mrb[69].mxu1 }
0x1b03   :  { %v2238_v32 = vpop.f32.mrb[70].mxu1 }
0x1b04   :  { %v4695_v54 = vpop.f32.mrb[71].mxu1 }
0x1b08   :  { %v5104_v60 = vpop.eup %5103 }
0x1b09   :  { %v2349_v33 = vpop.f32.mrb[72].mxu1  ;;  %2381 = vrot.lane.b32.xlu0 %v5104_v60, %s5320_s19 }
0x1b0a   :  { %2356 = vrot.lane.b32.xlu1 %v2349_v33, %s5327_s3  ;;  %v4710_v34 = vpop.f32.mrb[73].mxu1  ;;  %v5106_v40 = vpop.eup %5105 }
0x1b0b   :  { %v2352_v35 = vpop.f32.mrb[74].mxu1  ;;  %v2363_v41 = vadd.f32 1.0, %v5106_v40 }
0x1b0c   :  { %v4711_v37 = vpop.f32.mrb[75].mxu1 }
0x1b0d   :  { %5107 = vrcp.f32 %v2363_v41 }
0x1b17   :  { %v5108_v42 = vpop.eup %5107 }
0x1b74   :  { %v2243_v45 = vpop.permute.xlu1 %2242 }
0x1b75   :  { %v2245_v46 = vadd.f32 %v2243_v45, %v5907_v27 }
0x1b77   :  { %v4155_v47 = vmul.f32 -1.442695, %v2245_v46 }
0x1b79   :  { %5109 = vpow2.f32 %v4155_v47 }
0x1b7b   :  { %v2382_v43 = vpop.permute.xlu0 %2381 }
0x1b7c   :  { %v2384_v44 = vmul.f32 %v5108_v42, %v2382_v43  ;;  %v2357_v49 = vpop.permute.xlu1 %2356 }
0x1b7d   :  { %v2359_v55 = vadd.f32 %v2357_v49, %v5907_v27 }
0x1b7e   :  { %2386 = vrot.lane.b32.xlu0 %v2384_v44, %s5326_s18 }
0x1b7f   :  { %v4156_v19 = vmul.f32 -1.442695, %v2359_v55 }
0x1b83   :  { %v5110_v51 = vpop.eup %5109 }
0x1b84   :  { %v2369_v53 = vadd.f32 1.0, %v5110_v51 }
0x1b86   :  { %5111 = vrcp.f32 %v2369_v53 }
0x1b90   :  { %v5112_v59 = vpop.eup %5111 }
0x1b91   :  { %v2379_v61 = vmul.f32 0.0, %v5112_v59 }
0x1bf0   :  { %v2387_v62 = vpop.permute.xlu0 %2386 }
0x1bf1   :  { %v5918_v63 = vadd.f32 %v2387_v62, %v2379_v61 }
0x1bf3   :  { %5113 = vtanh.f32 %v5918_v63  ;;  %v2605_v51 = vrot.slane %v5918_v63, 6 }
0x1bf4   :  { %5115 = vpow2.f32 %v4156_v19 }
0x1bfd   :  { %v5114_v4 = vpop.eup %5113 }
0x1bfe   :  { %2392 = vrot.lane.b32.xlu0 %v5114_v4, %s5320_s19  ;;  %v5116_v57 = vpop.eup %5115 }
0x1bff   :  { %v2376_v52 = vadd.f32 1.0, %v5116_v57 }
0x1c01   :  { %5117 = vrcp.f32 %v2376_v52 }
0x1c0b   :  { %v5118_v5 = vpop.eup %5117 }
0x1c70   :  { %v2393_v16 = vpop.permute.xlu0 %2392 }
0x1c71   :  { %v2395_v8 = vmul.f32 %v5118_v5, %v2393_v16 }
0x1c73   :  { %v2396_v6 = vpack.c.bf16 %v2395_v8, %v2395_v8 }
0x1c75   :  { %2398 = vrot.lane.b32.xlu1 %v2396_v6, %s5326_s18 }
0x1ce7   :  { %v2399_v13 = vpop.permute.xlu1 %2398 }
0x1ce8   :  { %4717 = vmatmul.mubr.msk.bf16.vlgmr.msra.gmra.mrb[76].mxu0 %vm156_vm2, %v2399_v13  ;;  %4725 = vmatmul.mubr.msk.bf16.vlgmr.msra.gmra.mrb[76].mxu1 %vm156_vm2, %v2399_v13 }
0x1ce9   :  { %4729 = vmatpush3.bf16.msra.mxu0 %v5839_v56  ;;  %4737 = vmatpush3.bf16.msra.mxu1 %v5885_v24 }
0x1cea   :  { %4730 = vmatprep.subr.bf16.mxu0 %v5323_v0  ;;  %4738 = vmatprep.subr.bf16.mxu1 %v5323_v0 }
0x1ceb   :  { %4732 = vmatprep.mubr.msk.bf16.mxu0 %vm5324_vm0, %v5323_v0  ;;  %4740 = vmatprep.mubr.msk.bf16.mxu1 %vm5324_vm0, %v5323_v0 }
0x1ced   :  { %4731 = vmatpush3.bf16.msra.mxu0 %v5846_v58  ;;  %4739 = vmatpush3.bf16.msra.mxu1 %v5890_v25 }
0x1cee   :  { %4744 = vmatprep.subr.bf16.mxu0 %v5323_v0  ;;  %4752 = vmatprep.subr.bf16.mxu1 %v5323_v0 }
0x1cf0   :  { %4733 = vmatmul.mubr.msk.bf16.vlgmr.msra.gmra.mrb[80].mxu0 %vm156_vm2, %v2399_v13  ;;  %4741 = vmatmul.mubr.msk.bf16.vlgmr.msra.gmra.mrb[80].mxu1 %vm156_vm2, %v2399_v13 }
0x1cf1   :  { %4745 = vmatpush3.bf16.msra.mxu0 %v5831_v48  ;;  %4753 = vmatpush3.bf16.msra.mxu1 %v5875_v21 }
0x1cf2   :  { %4746 = vmatprep.subr.bf16.mxu0 %v5323_v0  ;;  %4754 = vmatprep.subr.bf16.mxu1 %v5323_v0 }
0x1cf3   :  { %4748 = vmatprep.mubr.msk.bf16.mxu0 %vm5324_vm0, %v5323_v0  ;;  %4756 = vmatprep.mubr.msk.bf16.mxu1 %vm5324_vm0, %v5323_v0 }
0x1cf5   :  { %4747 = vmatpush3.bf16.msra.mxu0 %v5835_v50  ;;  %4755 = vmatpush3.bf16.msra.mxu1 %v5879_v23 }
0x1cf6   :  { %4760 = vmatprep.subr.bf16.mxu0 %v5323_v0  ;;  %4768 = vmatprep.subr.bf16.mxu1 %v5323_v0 }
0x1dbb   :  { %v2437_v12 = vpop.f32.mrb[76].mxu0  ;;  %v2481_v14 = vpop.f32.mrb[76].mxu1 }
0x1dbc   :  { %v4718_v17 = vpop.f32.mrb[77].mxu0  ;;  %v4726_v15 = vpop.f32.mrb[77].mxu1  ;;  %v2488_v31 = vrot.slane %v2481_v14, 6  ;;  %v2444_v33 = vrot.slane %v2437_v12, 6 }
0x1dbd   :  { %v2440_v18 = vpop.f32.mrb[78].mxu0  ;;  %v2484_v1 = vpop.f32.mrb[78].mxu1 }
0x1dbe   :  { %v4719_v7 = vpop.f32.mrb[79].mxu0  ;;  %v4727_v36 = vpop.f32.mrb[79].mxu1  ;;  %v2446_v34 = vadd.f32 %v2444_v33, %v5907_v27 }
0x1dc0   :  { %v4161_v35 = vmul.f32 -1.442695, %v2446_v34 }
0x1dc3   :  { %v2527_v20 = vpop.f32.mrb[80].mxu0  ;;  %v2573_v22 = vpop.f32.mrb[80].mxu1 }
0x1dc4   :  { %v2534_v11 = vrot.slane %v2527_v20, 6  ;;  %v4734_v9 = vpop.f32.mrb[81].mxu0  ;;  %v4742_v26 = vpop.f32.mrb[81].mxu1  ;;  %v2580_v2 = vrot.slane %v2573_v22, 6 }
0x1dc5   :  { %v2530_v10 = vpop.f32.mrb[82].mxu0  ;;  %v2576_v3 = vpop.f32.mrb[82].mxu1 }
0x1dc6   :  { %v4743_v29 = vpop.f32.mrb[83].mxu1  ;;  %2535 = vrot.lane.b32.xlu0 %v2534_v11, %s5320_s19  ;;  %v4735_v30 = vpop.f32.mrb[83].mxu0 }
0x1dca   :  { %2489 = vrot.lane.b32.xlu0 %v2488_v31, %s5326_s18 }
0x1dce   :  { %2581 = vrot.lane.b32.xlu0 %v2580_v2, %s5327_s3 }
0x1e38   :  { %v2536_v32 = vpop.permute.xlu0 %2535 }
0x1e39   :  { %v2538_v54 = vadd.f32 %v2536_v32, %v5907_v27 }
0x1e3b   :  { %5119 = vtanh.f32 %v2538_v54 }
0x1e3c   :  { %5121 = vpow2.f32 %v4161_v35  ;;  %v2490_v42 = vpop.permute.xlu0 %2489 }
0x1e3d   :  { %v2492_v43 = vadd.f32 %v2490_v42, %v5907_v27 }
0x1e3f   :  { %v4162_v44 = vmul.f32 -1.442695, %v2492_v43 }
0x1e40   :  { %v2582_v4 = vpop.permute.xlu0 %2581 }
0x1e41   :  { %v2584_v49 = vadd.f32 %v2582_v4, %v5907_v27 }
0x1e43   :  { %v4163_v55 = vmul.f32 -1.442695, %v2584_v49 }
0x1e45   :  { %v5120_v60 = vpop.eup %5119 }
0x1e46   :  { %2609 = vrot.lane.b32.xlu1 %v5120_v60, %s5320_s19  ;;  %v5122_v37 = vpop.eup %5121 }
0x1e47   :  { %v2588_v38 = vadd.f32 1.0, %v5122_v37 }
0x1e49   :  { %5123 = vrcp.f32 %v2588_v38 }
0x1e4a   :  { %5125 = vpow2.f32 %v4162_v44 }
0x1e53   :  { %v5124_v39 = vpop.eup %5123 }
0x1e54   :  { %v5126_v45 = vpop.eup %5125 }
0x1e55   :  { %v2594_v46 = vadd.f32 1.0, %v5126_v45 }
0x1e57   :  { %5127 = vrcp.f32 %v2594_v46 }
0x1e61   :  { %v5128_v47 = vpop.eup %5127 }
0x1e62   :  { %v2607_v53 = vmul.f32 %v5128_v47, %v2605_v51 }
0x1eb8   :  { %v2610_v40 = vpop.permute.xlu1 %2609 }
0x1eb9   :  { %v2612_v41 = vmul.f32 %v5124_v39, %v2610_v40 }
0x1ebb   :  { %2614 = vrot.lane.b32.xlu1 %v2612_v41, %s5326_s18 }
0x1f2d   :  { %v2615_v59 = vpop.permute.xlu1 %2614 }
0x1f2e   :  { %v5961_v61 = vadd.f32 %v2615_v59, %v2607_v53 }
0x1f30   :  { %5129 = vtanh.f32 %v5961_v61  ;;  %v2834_v47 = vrot.slane %v5961_v61, 6 }
0x1f31   :  { %5131 = vpow2.f32 %v4163_v55 }
0x1f3a   :  { %v5130_v62 = vpop.eup %5129 }
0x1f3b   :  { %2620 = vrot.lane.b32.xlu1 %v5130_v62, %s5320_s19  ;;  %v5132_v19 = vpop.eup %5131 }
0x1f3c   :  { %v2601_v57 = vadd.f32 1.0, %v5132_v19 }
0x1f3e   :  { %5133 = vrcp.f32 %v2601_v57 }
0x1f48   :  { %v5134_v52 = vpop.eup %5133 }
0x1fad   :  { %v2621_v5 = vpop.permute.xlu1 %2620 }
0x1fae   :  { %v2623_v63 = vmul.f32 %v5134_v52, %v2621_v5 }
0x1fb0   :  { %v2624_v16 = vpack.c.bf16 %v2623_v63, %v2623_v63 }
0x1fb2   :  { %v2626_v8 = vrot.slane %v2624_v16, 1 }
0x1fb4   :  { %2627 = vrot.lane.b32.xlu0 %v2626_v8, %s5326_s18 }
0x2026   :  { %v2628_v6 = vpop.permute.xlu0 %2627 }
0x2027   :  { %4749 = vmatmul.mubr.msk.bf16.vlgmr.msra.gmra.mrb[84].mxu0 %vm156_vm2, %v2628_v6  ;;  %4757 = vmatmul.mubr.msk.bf16.vlgmr.msra.gmra.mrb[84].mxu1 %vm156_vm2, %v2628_v6 }
0x2028   :  { %4761 = vmatpush3.bf16.msra.mxu0 %v5839_v56  ;;  %4769 = vmatpush3.bf16.msra.mxu1 %v5885_v24 }
0x2029   :  { %4762 = vmatprep.subr.bf16.mxu0 %v5323_v0  ;;  %4770 = vmatprep.subr.bf16.mxu1 %v5323_v0 }
0x202a   :  { %4764 = vmatprep.mubr.msk.bf16.mxu0 %vm5324_vm0, %v5323_v0  ;;  %4772 = vmatprep.mubr.msk.bf16.mxu1 %vm5324_vm0, %v5323_v0 }
0x202c   :  { %4763 = vmatpush3.bf16.msra.mxu0 %v5846_v58  ;;  %4771 = vmatpush3.bf16.msra.mxu1 %v5890_v25 }
0x202d   :  { %4776 = vmatprep.subr.bf16.mxu0 %v5323_v0  ;;  %4784 = vmatprep.subr.bf16.mxu1 %v5323_v0 }
0x202f   :  { %4765 = vmatmul.mubr.msk.bf16.vlgmr.msra.gmra.mrb[88].mxu0 %vm156_vm2, %v2628_v6  ;;  %4773 = vmatmul.mubr.msk.bf16.vlgmr.msra.gmra.mrb[88].mxu1 %vm156_vm2, %v2628_v6 }
0x2030   :  { %4777 = vmatpush3.bf16.msra.mxu0 %v5831_v48  ;;  %4785 = vmatpush3.bf16.msra.mxu1 %v5875_v21 }
0x2031   :  { %4778 = vmatprep.subr.bf16.mxu0 %v5323_v0  ;;  %4786 = vmatprep.subr.bf16.mxu1 %v5323_v0 }
0x2032   :  { %4780 = vmatprep.mubr.msk.bf16.mxu0 %vm5324_vm0, %v5323_v0  ;;  %4788 = vmatprep.mubr.msk.bf16.mxu1 %vm5324_vm0, %v5323_v0 }
0x2034   :  { %4779 = vmatpush3.bf16.msra.mxu0 %v5835_v50  ;;  %4787 = vmatpush3.bf16.msra.mxu1 %v5879_v23 }
0x2035   :  { %4792 = vmatprep.subr.bf16.mxu0 %v5323_v0  ;;  %4800 = vmatprep.subr.bf16.mxu1 %v5323_v0 }
0x20fa   :  { %v2666_v13 = vpop.f32.mrb[84].mxu0  ;;  %v2710_v12 = vpop.f32.mrb[84].mxu1 }
0x20fb   :  { %v4750_v14 = vpop.f32.mrb[85].mxu0  ;;  %v4758_v17 = vpop.f32.mrb[85].mxu1  ;;  %v2717_v30 = vrot.slane %v2710_v12, 4  ;;  %v2673_v60 = vrot.slane %v2666_v13, 4 }
0x20fc   :  { %v2669_v15 = vpop.f32.mrb[86].mxu0  ;;  %v2713_v18 = vpop.f32.mrb[86].mxu1 }
0x20fd   :  { %v4751_v1 = vpop.f32.mrb[87].mxu0  ;;  %v4759_v7 = vpop.f32.mrb[87].mxu1  ;;  %v2675_v33 = vadd.f32 %v2673_v60, %v5907_v27 }
0x20ff   :  { %v4168_v34 = vmul.f32 -1.442695, %v2675_v33 }
0x2102   :  { %v2756_v36 = vpop.f32.mrb[88].mxu0  ;;  %v2802_v20 = vpop.f32.mrb[88].mxu1 }
0x2103   :  { %v2763_v22 = vrot.slane %v2756_v36, 4  ;;  %v4766_v11 = vpop.f32.mrb[89].mxu0  ;;  %v4774_v9 = vpop.f32.mrb[89].mxu1  ;;  %v2809_v31 = vrot.slane %v2802_v20, 4 }
0x2104   :  { %v2759_v26 = vpop.f32.mrb[90].mxu0  ;;  %v2805_v10 = vpop.f32.mrb[90].mxu1 }
0x2105   :  { %v4775_v3 = vpop.f32.mrb[91].mxu1  ;;  %2764 = vrot.lane.b32.xlu1 %v2763_v22, %s5320_s19  ;;  %v4767_v29 = vpop.f32.mrb[91].mxu0 }
0x2109   :  { %2718 = vrot.lane.b32.xlu1 %v2717_v30, %s5326_s18 }
0x210d   :  { %2810 = vrot.lane.b32.xlu1 %v2809_v31, %s5327_s3 }
0x2177   :  { %v2765_v2 = vpop.permute.xlu1 %2764 }
0x2178   :  { %v2767_v32 = vadd.f32 %v2765_v2, %v5907_v27 }
0x217a   :  { %5135 = vtanh.f32 %v2767_v32 }
0x217b   :  { %5137 = vpow2.f32 %v4168_v34  ;;  %v2719_v41 = vpop.permute.xlu1 %2718 }
0x217c   :  { %v2721_v42 = vadd.f32 %v2719_v41, %v5907_v27 }
0x217e   :  { %v4169_v43 = vmul.f32 -1.442695, %v2721_v42 }
0x217f   :  { %v2811_v4 = vpop.permute.xlu1 %2810 }
0x2180   :  { %v2813_v49 = vadd.f32 %v2811_v4, %v5907_v27 }
0x2182   :  { %v4170_v55 = vmul.f32 -1.442695, %v2813_v49 }
0x2184   :  { %v5136_v54 = vpop.eup %5135 }
0x2185   :  { %2838 = vrot.lane.b32.xlu0 %v5136_v54, %s5320_s19  ;;  %v5138_v35 = vpop.eup %5137 }
0x2186   :  { %v2817_v37 = vadd.f32 1.0, %v5138_v35 }
0x2188   :  { %5139 = vrcp.f32 %v2817_v37 }
0x2189   :  { %5141 = vpow2.f32 %v4169_v43 }
0x2192   :  { %v5140_v38 = vpop.eup %5139 }
0x2193   :  { %v5142_v44 = vpop.eup %5141 }
0x2194   :  { %v2823_v45 = vadd.f32 1.0, %v5142_v44 }
0x2196   :  { %5143 = vrcp.f32 %v2823_v45 }
0x21a0   :  { %v5144_v46 = vpop.eup %5143 }
0x21a1   :  { %v2836_v51 = vmul.f32 %v5144_v46, %v2834_v47 }
0x21f7   :  { %v2839_v39 = vpop.permute.xlu0 %2838 }
0x21f8   :  { %v2841_v40 = vmul.f32 %v5140_v38, %v2839_v39 }
0x21fa   :  { %2843 = vrot.lane.b32.xlu0 %v2841_v40, %s5326_s18 }
0x226c   :  { %v2844_v53 = vpop.permute.xlu0 %2843 }
0x226d   :  { %v6004_v59 = vadd.f32 %v2844_v53, %v2836_v51 }
0x226f   :  { %5145 = vtanh.f32 %v6004_v59  ;;  %v3063_v46 = vrot.slane %v6004_v59, 6 }
0x2270   :  { %5147 = vpow2.f32 %v4170_v55 }
0x2279   :  { %v5146_v62 = vpop.eup %5145 }
0x227a   :  { %2849 = vrot.lane.b32.xlu0 %v5146_v62, %s5320_s19  ;;  %v5148_v19 = vpop.eup %5147 }
0x227b   :  { %v2830_v57 = vadd.f32 1.0, %v5148_v19 }
0x227d   :  { %5149 = vrcp.f32 %v2830_v57 }
0x2287   :  { %v5150_v52 = vpop.eup %5149 }
0x22ec   :  { %v2850_v5 = vpop.permute.xlu0 %2849 }
0x22ed   :  { %v2852_v61 = vmul.f32 %v5150_v52, %v2850_v5 }
0x22ef   :  { %v2853_v63 = vpack.c.bf16 %v2852_v61, %v2852_v61 }
0x22f1   :  { %v2855_v16 = vrot.slane %v2853_v63, 2 }
0x22f3   :  { %2856 = vrot.lane.b32.xlu1 %v2855_v16, %s5326_s18 }
0x2365   :  { %v2857_v8 = vpop.permute.xlu1 %2856 }
0x2366   :  { %4781 = vmatmul.mubr.msk.bf16.vlgmr.msra.gmra.mrb[92].mxu0 %vm156_vm2, %v2857_v8  ;;  %4789 = vmatmul.mubr.msk.bf16.vlgmr.msra.gmra.mrb[92].mxu1 %vm156_vm2, %v2857_v8 }
0x2367   :  { %4793 = vmatpush3.bf16.msra.mxu0 %v5839_v56  ;;  %4801 = vmatpush3.bf16.msra.mxu1 %v5885_v24 }
0x2368   :  { %4794 = vmatprep.subr.bf16.mxu0 %v5323_v0  ;;  %4802 = vmatprep.subr.bf16.mxu1 %v5323_v0 }
0x2369   :  { %4796 = vmatprep.mubr.msk.bf16.mxu0 %vm5324_vm0, %v5323_v0  ;;  %4804 = vmatprep.mubr.msk.bf16.mxu1 %vm5324_vm0, %v5323_v0 }
0x236b   :  { %4795 = vmatpush3.bf16.msra.mxu0 %v5846_v58  ;;  %4803 = vmatpush3.bf16.msra.mxu1 %v5890_v25 }
0x236c   :  { %4808 = vmatprep.subr.bf16.mxu0 %v5323_v0  ;;  %4816 = vmatprep.subr.bf16.mxu1 %v5323_v0 }
0x236e   :  { %4797 = vmatmul.mubr.msk.bf16.vlgmr.msra.gmra.mrb[96].mxu0 %vm156_vm2, %v2857_v8  ;;  %4805 = vmatmul.mubr.msk.bf16.vlgmr.msra.gmra.mrb[96].mxu1 %vm156_vm2, %v2857_v8 }
0x236f   :  { %4809 = vmatpush3.bf16.msra.mxu0 %v5831_v48  ;;  %4817 = vmatpush3.bf16.msra.mxu1 %v5875_v21 }
0x2370   :  { %4810 = vmatprep.subr.bf16.mxu0 %v5323_v0  ;;  %4818 = vmatprep.subr.bf16.mxu1 %v5323_v0 }
0x2371   :  { %4812 = vmatprep.mubr.msk.bf16.mxu0 %vm5324_vm0, %v5323_v0  ;;  %4820 = vmatprep.mubr.msk.bf16.mxu1 %vm5324_vm0, %v5323_v0 }
0x2373   :  { %4811 = vmatpush3.bf16.msra.mxu0 %v5835_v50  ;;  %4819 = vmatpush3.bf16.msra.mxu1 %v5879_v23 }
0x2374   :  { %4824 = vmatprep.subr.bf16.mxu0 %v5323_v0  ;;  %4832 = vmatprep.subr.bf16.mxu1 %v5323_v0 }
0x2439   :  { %v2895_v6 = vpop.f32.mrb[92].mxu0  ;;  %v2939_v13 = vpop.f32.mrb[92].mxu1 }
0x243a   :  { %v4782_v12 = vpop.f32.mrb[93].mxu0  ;;  %v4790_v14 = vpop.f32.mrb[93].mxu1  ;;  %v2946_v29 = vrot.slane %v2939_v13, 2  ;;  %v2902_v54 = vrot.slane %v2895_v6, 2 }
0x243b   :  { %v2898_v17 = vpop.f32.mrb[94].mxu0  ;;  %v2942_v15 = vpop.f32.mrb[94].mxu1 }
0x243c   :  { %v4783_v18 = vpop.f32.mrb[95].mxu0  ;;  %v4791_v1 = vpop.f32.mrb[95].mxu1  ;;  %v2904_v60 = vadd.f32 %v2902_v54, %v5907_v27 }
0x243e   :  { %v4175_v33 = vmul.f32 -1.442695, %v2904_v60 }
0x2441   :  { %v2985_v7 = vpop.f32.mrb[96].mxu0  ;;  %v3031_v36 = vpop.f32.mrb[96].mxu1 }
0x2442   :  { %v2992_v20 = vrot.slane %v2985_v7, 2  ;;  %v4798_v22 = vpop.f32.mrb[97].mxu0  ;;  %v4806_v11 = vpop.f32.mrb[97].mxu1  ;;  %v3038_v30 = vrot.slane %v3031_v36, 2 }
0x2443   :  { %v2988_v9 = vpop.f32.mrb[98].mxu0  ;;  %v3034_v26 = vpop.f32.mrb[98].mxu1 }
0x2444   :  { %v4807_v10 = vpop.f32.mrb[99].mxu1  ;;  %2993 = vrot.lane.b32.xlu0 %v2992_v20, %s5320_s19  ;;  %v4799_v3 = vpop.f32.mrb[99].mxu0 }
0x2448   :  { %2947 = vrot.lane.b32.xlu0 %v2946_v29, %s5326_s18 }
0x244c   :  { %3039 = vrot.lane.b32.xlu0 %v3038_v30, %s5327_s3 }
0x24b6   :  { %v2994_v31 = vpop.permute.xlu0 %2993 }
0x24b7   :  { %v2996_v2 = vadd.f32 %v2994_v31, %v5907_v27 }
0x24b9   :  { %5151 = vtanh.f32 %v2996_v2 }
0x24ba   :  { %5153 = vpow2.f32 %v4175_v33  ;;  %v2948_v40 = vpop.permute.xlu0 %2947 }
0x24bb   :  { %v2950_v41 = vadd.f32 %v2948_v40, %v5907_v27 }
0x24bd   :  { %v4176_v42 = vmul.f32 -1.442695, %v2950_v41 }
0x24be   :  { %v3040_v4 = vpop.permute.xlu0 %3039 }
0x24bf   :  { %v3042_v49 = vadd.f32 %v3040_v4, %v5907_v27 }
0x24c1   :  { %v4177_v55 = vmul.f32 -1.442695, %v3042_v49 }
0x24c3   :  { %v5152_v32 = vpop.eup %5151 }
0x24c4   :  { %3067 = vrot.lane.b32.xlu1 %v5152_v32, %s5320_s19  ;;  %v5154_v34 = vpop.eup %5153 }
0x24c5   :  { %v3046_v35 = vadd.f32 1.0, %v5154_v34 }
0x24c7   :  { %5155 = vrcp.f32 %v3046_v35 }
0x24c8   :  { %5157 = vpow2.f32 %v4176_v42 }
0x24d1   :  { %v5156_v37 = vpop.eup %5155 }
0x24d2   :  { %v5158_v43 = vpop.eup %5157 }
0x24d3   :  { %v3052_v44 = vadd.f32 1.0, %v5158_v43 }
0x24d5   :  { %5159 = vrcp.f32 %v3052_v44 }
0x24df   :  { %v5160_v45 = vpop.eup %5159 }
0x24e0   :  { %v3065_v47 = vmul.f32 %v5160_v45, %v3063_v46 }
0x2536   :  { %v3068_v38 = vpop.permute.xlu1 %3067 }
0x2537   :  { %v3070_v39 = vmul.f32 %v5156_v37, %v3068_v38 }
0x2539   :  { %3072 = vrot.lane.b32.xlu1 %v3070_v39, %s5326_s18 }
0x25ab   :  { %v3073_v51 = vpop.permute.xlu1 %3072 }
0x25ac   :  { %v6047_v53 = vadd.f32 %v3073_v51, %v3065_v47 }
0x25ae   :  { %5161 = vtanh.f32 %v6047_v53  ;;  %v3286_v38 = vrot.slane %v6047_v53, 6 }
0x25af   :  { %5163 = vpow2.f32 %v4177_v55 }
0x25b8   :  { %v5162_v62 = vpop.eup %5161 }
0x25b9   :  { %3078 = vrot.lane.b32.xlu1 %v5162_v62, %s5320_s19  ;;  %v5164_v19 = vpop.eup %5163 }
0x25ba   :  { %v3059_v57 = vadd.f32 1.0, %v5164_v19 }
0x25bc   :  { %5165 = vrcp.f32 %v3059_v57 }
0x25c6   :  { %v5166_v52 = vpop.eup %5165 }
0x262b   :  { %v3079_v5 = vpop.permute.xlu1 %3078 }
0x262c   :  { %v3081_v59 = vmul.f32 %v5166_v52, %v3079_v5 }
0x262e   :  { %v3082_v61 = vpack.c.bf16 %v3081_v59, %v3081_v59 }
0x2630   :  { %v3084_v63 = vrot.slane %v3082_v61, 3 }
0x2632   :  { %3085 = vrot.lane.b32.xlu0 %v3084_v63, %s5326_s18 }
0x26a4   :  { %v3086_v16 = vpop.permute.xlu0 %3085 }
0x26a5   :  { %4813 = vmatmul.mubr.msk.bf16.vlgmr.msra.gmra.mrb[100].mxu0 %vm156_vm2, %v3086_v16  ;;  %4821 = vmatmul.mubr.msk.bf16.vlgmr.msra.gmra.mrb[100].mxu1 %vm156_vm2, %v3086_v16 }
0x26a6   :  { %4825 = vmatpush3.bf16.msra.mxu0 %v5839_v56  ;;  %4833 = vmatpush3.bf16.msra.mxu1 %v5885_v24 }
0x26a7   :  { %4826 = vmatprep.subr.bf16.mxu0 %v5323_v0  ;;  %4834 = vmatprep.subr.bf16.mxu1 %v5323_v0 }
0x26a8   :  { %4828 = vmatprep.mubr.msk.bf16.mxu0 %vm5324_vm0, %v5323_v0  ;;  %4836 = vmatprep.mubr.msk.bf16.mxu1 %vm5324_vm0, %v5323_v0 }
0x26aa   :  { %4827 = vmatpush3.bf16.msra.mxu0 %v5846_v58  ;;  %4835 = vmatpush3.bf16.msra.mxu1 %v5890_v25 }
0x26ab   :  { %4840 = vmatprep.subr.bf16.mxu0 %v5323_v0  ;;  %4848 = vmatprep.subr.bf16.mxu1 %v5323_v0 }
0x26ad   :  { %4829 = vmatmul.mubr.msk.bf16.vlgmr.msra.gmra.mrb[104].mxu0 %vm156_vm2, %v3086_v16  ;;  %4837 = vmatmul.mubr.msk.bf16.vlgmr.msra.gmra.mrb[104].mxu1 %vm156_vm2, %v3086_v16 }
0x26ae   :  { %4841 = vmatpush3.bf16.msra.mxu0 %v5831_v48  ;;  %4849 = vmatpush3.bf16.msra.mxu1 %v5875_v21 }
0x26af   :  { %4842 = vmatprep.subr.bf16.mxu0 %v5323_v0  ;;  %4850 = vmatprep.subr.bf16.mxu1 %v5323_v0 }
0x26b0   :  { %4844 = vmatprep.mubr.msk.bf16.mxu0 %vm5324_vm0, %v5323_v0  ;;  %4852 = vmatprep.mubr.msk.bf16.mxu1 %vm5324_vm0, %v5323_v0 }
0x26b2   :  { %4843 = vmatpush3.bf16.msra.mxu0 %v5835_v50  ;;  %4851 = vmatpush3.bf16.msra.mxu1 %v5879_v23 }
0x26b3   :  { %4856 = vmatprep.subr.bf16.mxu0 %v5323_v0  ;;  %4864 = vmatprep.subr.bf16.mxu1 %v5323_v0 }
0x2778   :  { %v3124_v48 = vpop.f32.mrb[100].mxu0  ;;  %v3165_v27 = vpop.f32.mrb[100].mxu1 }
0x2779   :  { %v4814_v8 = vpop.f32.mrb[101].mxu0  ;;  %v4822_v6 = vpop.f32.mrb[101].mxu1  ;;  %v3130_v10 = vadd.f32 %v3124_v48, %v5909_v28 }
0x277a   :  { %v3127_v13 = vpop.f32.mrb[102].mxu0  ;;  %v3168_v12 = vpop.f32.mrb[102].mxu1 }
0x277b   :  { %v4815_v14 = vpop.f32.mrb[103].mxu0  ;;  %v4823_v17 = vpop.f32.mrb[103].mxu1  ;;  %v4182_v3 = vmul.f32 -1.442695, %v3130_v10 }
0x2780   :  { %v3210_v15 = vpop.f32.mrb[104].mxu0  ;;  %v3255_v18 = vpop.f32.mrb[104].mxu1 }
0x2781   :  { %v4838_v1 = vpop.f32.mrb[105].mxu1  ;;  %3217 = vrot.lane.b32.xlu1 %v3210_v15, %s5320_s19  ;;  %v4830_v50 = vpop.f32.mrb[105].mxu0 }
0x2782   :  { %v3213_v7 = vpop.f32.mrb[106].mxu0  ;;  %v3258_v36 = vpop.f32.mrb[106].mxu1 }
0x2783   :  { %v4831_v20 = vpop.f32.mrb[107].mxu0  ;;  %v4839_v22 = vpop.f32.mrb[107].mxu1 }
0x2785   :  { %3172 = vrot.lane.b32.xlu1 %v3165_v27, %s5326_s18 }
0x2789   :  { %3262 = vrot.lane.b32.xlu1 %v3255_v18, %s5327_s3 }
0x27f3   :  { %v3218_v11 = vpop.permute.xlu1 %3217 }
0x27f4   :  { %v3220_v9 = vadd.f32 %v3218_v11, %v5909_v28 }
0x27f6   :  { %5167 = vtanh.f32 %v3220_v9 }
0x27f7   :  { %5169 = vpow2.f32 %v4182_v3  ;;  %v3173_v54 = vpop.permute.xlu1 %3172 }
0x27f8   :  { %v3175_v60 = vadd.f32 %v3173_v54, %v5909_v28 }
0x27fa   :  { %v4183_v33 = vmul.f32 -1.442695, %v3175_v60 }
0x27fb   :  { %v3263_v43 = vpop.permute.xlu1 %3262 }
0x27fc   :  { %v3265_v44 = vadd.f32 %v3263_v43, %v5909_v28 }
0x27fe   :  { %v4184_v45 = vmul.f32 -1.442695, %v3265_v44 }
0x2800   :  { %v5168_v26 = vpop.eup %5167 }
0x2801   :  { %3290 = vrot.lane.b32.xlu0 %v5168_v26, %s5320_s19  ;;  %v5170_v29 = vpop.eup %5169 }
0x2802   :  { %v3269_v30 = vadd.f32 1.0, %v5170_v29 }
0x2804   :  { %5171 = vrcp.f32 %v3269_v30 }
0x2805   :  { %5173 = vpow2.f32 %v4183_v33 }
0x280e   :  { %v5172_v31 = vpop.eup %5171 }
0x280f   :  { %v5174_v34 = vpop.eup %5173 }
0x2810   :  { %v3275_v35 = vadd.f32 1.0, %v5174_v34 }
0x2812   :  { %5175 = vrcp.f32 %v3275_v35 }
0x281c   :  { %v5176_v37 = vpop.eup %5175 }
0x281d   :  { %v3288_v39 = vmul.f32 %v5176_v37, %v3286_v38 }
0x2873   :  { %v3291_v2 = vpop.permute.xlu0 %3290 }
0x2874   :  { %v3293_v32 = vmul.f32 %v5172_v31, %v3291_v2 }
0x2876   :  { %3295 = vrot.lane.b32.xlu0 %v3293_v32, %s5326_s18 }
0x28e8   :  { %v3296_v40 = vpop.permute.xlu0 %3295 }
0x28e9   :  { %v6090_v41 = vadd.f32 %v3296_v40, %v3288_v39 }
0x28eb   :  { %5177 = vtanh.f32 %v6090_v41  ;;  %v3514_v31 = vrot.slane %v6090_v41, 6 }
0x28ec   :  { %5179 = vpow2.f32 %v4184_v45  ;;  %v6145_v45 = vld [vmem:[#allocation6 + $0x20] sm:$0xff]  }
0x28f5   :  { %v5178_v42 = vpop.eup %5177 }
0x28f6   :  { %3301 = vrot.lane.b32.xlu0 %v5178_v42, %s5320_s19  ;;  %v5180_v46 = vpop.eup %5179 }
0x28f7   :  { %v3282_v47 = vadd.f32 1.0, %v5180_v46  ;;  %v6148_v46 = vld [vmem:[#allocation6 + $0x30] sm:$0xff]  }
0x28f9   :  { %5181 = vrcp.f32 %v3282_v47  ;;  %v6157_v47 = vld [vmem:[#allocation6 + $0x28] sm:$0xff]  }
0x2903   :  { %v5182_v51 = vpop.eup %5181 }
0x2968   :  { %v3302_v62 = vpop.permute.xlu0 %3301 }
0x2969   :  { %v3304_v53 = vmul.f32 %v5182_v51, %v3302_v62  ;;  %v6160_v51 = vld [vmem:[#allocation6 + $0x38] sm:$0xff]   ;;  %v5245_v62 = vld [vmem:[#allocation6 + $0x10] sm:$0xff]  }
0x296b   :  { %v3305_v4 = vpack.c.bf16 %v3304_v53, %v3304_v53  ;;  %v5246_v53 = vld [vmem:[#allocation6 + $0x18] sm:$0xff]  }
0x296d   :  { %3307 = vrot.lane.b32.xlu1 %v3305_v4, %s5326_s18 }
0x29df   :  { %v3308_v49 = vpop.permute.xlu1 %3307 }
0x29e0   :  { %4845 = vmatmul.mubr.msk.bf16.vlgmr.msra.gmra.mrb[108].mxu0 %vm156_vm2, %v3308_v49  ;;  %4853 = vmatmul.mubr.msk.bf16.vlgmr.msra.gmra.mrb[108].mxu1 %vm156_vm2, %v3308_v49 }
0x29e1   :  { %4857 = vmatpush3.bf16.msra.mxu0 %v5839_v56  ;;  %4865 = vmatpush3.bf16.msra.mxu1 %v5885_v24  ;;  %v6112_v56 = vld [vmem:[#allocation6] sm:$0xff]  }
0x29e2   :  { %4858 = vmatprep.subr.bf16.mxu0 %v5323_v0  ;;  %4866 = vmatprep.subr.bf16.mxu1 %v5323_v0 }
0x29e3   :  { %4860 = vmatprep.mubr.msk.bf16.mxu0 %vm5324_vm0, %v5323_v0  ;;  %4868 = vmatprep.mubr.msk.bf16.mxu1 %vm5324_vm0, %v5323_v0 }
0x29e5   :  { %4859 = vmatpush3.bf16.msra.mxu0 %v5846_v58  ;;  %4867 = vmatpush3.bf16.msra.mxu1 %v5890_v25  ;;  %v6122_v58 = vld [vmem:[#allocation6 + $0x8] sm:$0xff]  }
0x29e6   :  { %4872 = vmatprep.subr.bf16.mxu0 %v5323_v0  ;;  %4880 = vmatprep.subr.bf16.mxu1 %v5323_v0 }
0x29e8   :  { %4861 = vmatmul.mubr.msk.bf16.vlgmr.msra.gmra.mrb[112].mxu0 %vm156_vm2, %v3308_v49  ;;  %4869 = vmatmul.mubr.msk.bf16.vlgmr.msra.gmra.mrb[112].mxu1 %vm156_vm2, %v3308_v49 }
0x29e9   :  { %4873 = vmatpush3.bf16.msra.mxu0 %v6112_v56  ;;  %4881 = vmatpush3.bf16.msra.mxu1 %v5875_v21 }
0x29ea   :  { %4874 = vmatprep.subr.bf16.mxu0 %v5323_v0  ;;  %4882 = vmatprep.subr.bf16.mxu1 %v5323_v0 }
0x29eb   :  { %4876 = vmatprep.mubr.msk.bf16.mxu0 %vm5324_vm0, %v5323_v0  ;;  %4884 = vmatprep.mubr.msk.bf16.mxu1 %vm5324_vm0, %v5323_v0 }
0x29ed   :  { %4875 = vmatpush3.bf16.msra.mxu0 %v6122_v58  ;;  %4883 = vmatpush3.bf16.msra.mxu1 %v5879_v23 }
0x29ee   :  { %4888 = vmatprep.subr.bf16.mxu0 %v5323_v0  ;;  %4896 = vmatprep.subr.bf16.mxu1 %v5323_v0 }
0x2ab3   :  { %v3346_v21 = vpop.f32.mrb[108].mxu0  ;;  %v3390_v24 = vpop.f32.mrb[108].mxu1 }
0x2ab4   :  { %v4846_v25 = vpop.f32.mrb[109].mxu0  ;;  %v4854_v55 = vpop.f32.mrb[109].mxu1  ;;  %v3397_v13 = vrot.slane %v3390_v24, 6  ;;  %v3353_v18 = vrot.slane %v3346_v21, 6 }
0x2ab5   :  { %v3349_v19 = vpop.f32.mrb[110].mxu0  ;;  %v3393_v57 = vpop.f32.mrb[110].mxu1 }
0x2ab6   :  { %v4847_v52 = vpop.f32.mrb[111].mxu0  ;;  %v4855_v5 = vpop.f32.mrb[111].mxu1  ;;  %v3355_v1 = vadd.f32 %v3353_v18, %v5909_v28 }
0x2ab8   :  { %v4189_v50 = vmul.f32 -1.442695, %v3355_v1 }
0x2abb   :  { %v3436_v59 = vpop.f32.mrb[112].mxu0  ;;  %v3482_v61 = vpop.f32.mrb[112].mxu1 }
0x2abc   :  { %v3443_v63 = vrot.slane %v3436_v59, 6  ;;  %v4862_v16 = vpop.f32.mrb[113].mxu0  ;;  %v4870_v48 = vpop.f32.mrb[113].mxu1  ;;  %v3489_v12 = vrot.slane %v3482_v61, 6 }
0x2abd   :  { %v3439_v27 = vpop.f32.mrb[114].mxu0  ;;  %v3485_v8 = vpop.f32.mrb[114].mxu1 }
0x2abe   :  { %v4871_v23 = vpop.f32.mrb[115].mxu1  ;;  %3444 = vrot.lane.b32.xlu0 %v3443_v63, %s5320_s19  ;;  %v4863_v6 = vpop.f32.mrb[115].mxu0 }
0x2ac2   :  { %3398 = vrot.lane.b32.xlu0 %v3397_v13, %s5326_s18 }
0x2ac6   :  { %3490 = vrot.lane.b32.xlu0 %v3489_v12, %s5327_s3 }
0x2b30   :  { %v3445_v14 = vpop.permute.xlu0 %3444 }
0x2b31   :  { %v3447_v17 = vadd.f32 %v3445_v14, %v5909_v28 }
0x2b33   :  { %5183 = vtanh.f32 %v3447_v17 }
0x2b34   :  { %5185 = vpow2.f32 %v4189_v50  ;;  %v3399_v9 = vpop.permute.xlu0 %3398 }
0x2b35   :  { %v3401_v26 = vadd.f32 %v3399_v9, %v5909_v28 }
0x2b37   :  { %v4190_v10 = vmul.f32 -1.442695, %v3401_v26 }
0x2b38   :  { %v3491_v33 = vpop.permute.xlu0 %3490 }
0x2b39   :  { %v3493_v34 = vadd.f32 %v3491_v33, %v5909_v28 }
0x2b3b   :  { %v4191_v35 = vmul.f32 -1.442695, %v3493_v34 }
0x2b3d   :  { %v5184_v15 = vpop.eup %5183 }
0x2b3e   :  { %3518 = vrot.lane.b32.xlu1 %v5184_v15, %s5320_s19  ;;  %v5186_v7 = vpop.eup %5185 }
0x2b3f   :  { %v3497_v36 = vadd.f32 1.0, %v5186_v7 }
0x2b41   :  { %5187 = vrcp.f32 %v3497_v36 }
0x2b42   :  { %5189 = vpow2.f32 %v4190_v10 }
0x2b4b   :  { %v5188_v20 = vpop.eup %5187 }
0x2b4c   :  { %v5190_v3 = vpop.eup %5189 }
0x2b4d   :  { %v3503_v29 = vadd.f32 1.0, %v5190_v3 }
0x2b4f   :  { %5191 = vrcp.f32 %v3503_v29 }
0x2b59   :  { %v5192_v30 = vpop.eup %5191 }
0x2b5a   :  { %v3516_v2 = vmul.f32 %v5192_v30, %v3514_v31 }
0x2bb0   :  { %v3519_v22 = vpop.permute.xlu1 %3518 }
0x2bb1   :  { %v3521_v11 = vmul.f32 %v5188_v20, %v3519_v22 }
0x2bb3   :  { %3523 = vrot.lane.b32.xlu1 %v3521_v11, %s5326_s18 }
0x2c25   :  { %v3524_v32 = vpop.permute.xlu1 %3523 }
0x2c26   :  { %v6137_v54 = vadd.f32 %v3524_v32, %v3516_v2 }
0x2c28   :  { %5193 = vtanh.f32 %v6137_v54  ;;  %v3743_v10 = vrot.slane %v6137_v54, 6 }
0x2c29   :  { %5195 = vpow2.f32 %v4191_v35 }
0x2c32   :  { %v5194_v60 = vpop.eup %5193 }
0x2c33   :  { %3529 = vrot.lane.b32.xlu1 %v5194_v60, %s5320_s19  ;;  %v5196_v37 = vpop.eup %5195 }
0x2c34   :  { %v3510_v38 = vadd.f32 1.0, %v5196_v37 }
0x2c36   :  { %5197 = vrcp.f32 %v3510_v38 }
0x2c40   :  { %v5198_v39 = vpop.eup %5197 }
0x2ca5   :  { %v3530_v40 = vpop.permute.xlu1 %3529 }
0x2ca6   :  { %v3532_v41 = vmul.f32 %v5198_v39, %v3530_v40 }
0x2ca8   :  { %v3533_v42 = vpack.c.bf16 %v3532_v41, %v3532_v41 }
0x2caa   :  { %v3535_v43 = vrot.slane %v3533_v42, 1 }
0x2cac   :  { %3536 = vrot.lane.b32.xlu0 %v3535_v43, %s5326_s18 }
0x2d1e   :  { %v3537_v44 = vpop.permute.xlu0 %3536 }
0x2d1f   :  { %4877 = vmatmul.mubr.msk.bf16.vlgmr.msra.gmra.mrb[116].mxu0 %vm156_vm2, %v3537_v44  ;;  %4885 = vmatmul.mubr.msk.bf16.vlgmr.msra.gmra.mrb[116].mxu1 %vm156_vm2, %v3537_v44 }
0x2d20   :  { %4889 = vmatpush3.bf16.msra.mxu0 %v6145_v45  ;;  %4897 = vmatpush3.bf16.msra.mxu1 %v6148_v46 }
0x2d21   :  { %4890 = vmatprep.subr.bf16.mxu0 %v5323_v0  ;;  %4898 = vmatprep.subr.bf16.mxu1 %v5323_v0 }
0x2d22   :  { %4892 = vmatprep.mubr.msk.bf16.mxu0 %vm5324_vm0, %v5323_v0  ;;  %4900 = vmatprep.mubr.msk.bf16.mxu1 %vm5324_vm0, %v5323_v0 }
0x2d24   :  { %4891 = vmatpush3.bf16.msra.mxu0 %v6157_v47  ;;  %4899 = vmatpush3.bf16.msra.mxu1 %v6160_v51 }
0x2d25   :  { %4904 = vmatprep.subr.bf16.mxu0 %v5323_v0  ;;  %4912 = vmatprep.subr.bf16.mxu1 %v5323_v0 }
0x2d27   :  { %4893 = vmatmul.mubr.msk.bf16.vlgmr.msra.gmra.mrb[120].mxu0 %vm156_vm2, %v3537_v44  ;;  %4901 = vmatmul.mubr.msk.bf16.vlgmr.msra.gmra.mrb[120].mxu1 %vm156_vm2, %v3537_v44 }
0x2d28   :  { %4905 = vmatpush3.bf16.msra.mxu0 %v6112_v56  ;;  %4913 = vmatpush3.bf16.msra.mxu1 %v5245_v62 }
0x2d29   :  { %4906 = vmatprep.subr.bf16.mxu0 %v5323_v0  ;;  %4914 = vmatprep.subr.bf16.mxu1 %v5323_v0 }
0x2d2a   :  { %4908 = vmatprep.mubr.msk.bf16.mxu0 %vm5324_vm0, %v5323_v0  ;;  %4916 = vmatprep.mubr.msk.bf16.mxu1 %vm5324_vm0, %v5323_v0 }
0x2d2c   :  { %4907 = vmatpush3.bf16.msra.mxu0 %v6122_v58  ;;  %4915 = vmatpush3.bf16.msra.mxu1 %v5246_v53 }
0x2d2d   :  { %4920 = vmatprep.subr.bf16.mxu0 %v5323_v0  ;;  %4928 = vmatprep.subr.bf16.mxu1 %v5323_v0 }
0x2df2   :  { %v3575_v4 = vpop.f32.mrb[116].mxu0  ;;  %v3619_v49 = vpop.f32.mrb[116].mxu1 }
0x2df3   :  { %v4878_v56 = vpop.f32.mrb[117].mxu0  ;;  %v4886_v21 = vpop.f32.mrb[117].mxu1  ;;  %v3626_v27 = vrot.slane %v3619_v49, 4  ;;  %v3582_v12 = vrot.slane %v3575_v4, 4 }
0x2df4   :  { %v3578_v24 = vpop.f32.mrb[118].mxu0  ;;  %v3622_v25 = vpop.f32.mrb[118].mxu1 }
0x2df5   :  { %v4879_v55 = vpop.f32.mrb[119].mxu0  ;;  %v4887_v19 = vpop.f32.mrb[119].mxu1  ;;  %v3584_v14 = vadd.f32 %v3582_v12, %v5909_v28 }
0x2df7   :  { %v4196_v17 = vmul.f32 -1.442695, %v3584_v14 }
0x2dfa   :  { %v3665_v57 = vpop.f32.mrb[120].mxu0  ;;  %v3711_v52 = vpop.f32.mrb[120].mxu1 }
0x2dfb   :  { %v3672_v5 = vrot.slane %v3665_v57, 4  ;;  %v4894_v59 = vpop.f32.mrb[121].mxu0  ;;  %v4902_v61 = vpop.f32.mrb[121].mxu1  ;;  %v3718_v8 = vrot.slane %v3711_v52, 4 }
0x2dfc   :  { %v3668_v58 = vpop.f32.mrb[122].mxu0  ;;  %v3714_v63 = vpop.f32.mrb[122].mxu1 }
0x2dfd   :  { %v4903_v16 = vpop.f32.mrb[123].mxu1  ;;  %3673 = vrot.lane.b32.xlu1 %v3672_v5, %s5320_s19  ;;  %v4895_v48 = vpop.f32.mrb[123].mxu0 }
0x2e01   :  { %3627 = vrot.lane.b32.xlu1 %v3626_v27, %s5326_s18 }
0x2e05   :  { %3719 = vrot.lane.b32.xlu1 %v3718_v8, %s5327_s3 }
0x2e6f   :  { %v3674_v23 = vpop.permute.xlu1 %3673 }
0x2e70   :  { %v3676_v6 = vadd.f32 %v3674_v23, %v5909_v28 }
0x2e72   :  { %5199 = vtanh.f32 %v3676_v6 }
0x2e73   :  { %5201 = vpow2.f32 %v4196_v17  ;;  %v3628_v36 = vpop.permute.xlu1 %3627 }
0x2e74   :  { %v3630_v20 = vadd.f32 %v3628_v36, %v5909_v28  ;;  %v4973_v36 = vld [vmem:[%s6252_s7] sm:$0xff]  }
0x2e76   :  { %v4197_v22 = vmul.f32 -1.442695, %v3630_v20  ;;  %v4974_v20 = vld [vmem:[%s6252_s7 + $0x8] sm:$0xff]  }
0x2e77   :  { %v3720_v2 = vpop.permute.xlu1 %3719 }
0x2e78   :  { %v3722_v32 = vadd.f32 %v3720_v2, %v5909_v28 }
0x2e7a   :  { %v4198_v60 = vmul.f32 -1.442695, %v3722_v32 }
0x2e7c   :  { %v5200_v13 = vpop.eup %5199 }
0x2e7d   :  { %3747 = vrot.lane.b32.xlu0 %v5200_v13, %s5320_s19  ;;  %v5202_v15 = vpop.eup %5201 }
0x2e7e   :  { %v3726_v18 = vadd.f32 1.0, %v5202_v15 }
0x2e80   :  { %5203 = vrcp.f32 %v3726_v18 }
0x2e81   :  { %5205 = vpow2.f32 %v4197_v22 }
0x2e8a   :  { %v5204_v1 = vpop.eup %5203 }
0x2e8b   :  { %v5206_v11 = vpop.eup %5205 }
0x2e8c   :  { %v3732_v9 = vadd.f32 1.0, %v5206_v11 }
0x2e8e   :  { %5207 = vrcp.f32 %v3732_v9 }
0x2e98   :  { %v5208_v26 = vpop.eup %5207 }
0x2e99   :  { %v3745_v3 = vmul.f32 %v5208_v26, %v3743_v10 }
0x2eef   :  { %v3748_v50 = vpop.permute.xlu0 %3747 }
0x2ef0   :  { %v3750_v7 = vmul.f32 %v5204_v1, %v3748_v50 }
0x2ef2   :  { %3752 = vrot.lane.b32.xlu0 %v3750_v7, %s5326_s18 }
0x2f64   :  { %v3753_v29 = vpop.permute.xlu0 %3752 }
0x2f65   :  { %v6186_v30 = vadd.f32 %v3753_v29, %v3745_v3 }
0x2f67   :  { %5209 = vtanh.f32 %v6186_v30  ;;  %v3972_v18 = vrot.slane %v6186_v30, 6 }
0x2f68   :  { %5211 = vpow2.f32 %v4198_v60  ;;  %v4206_v60 = vld [vmem:[%s6253_s8] ss:$0 sm:$0xff] }
0x2f71   :  { %v5210_v31 = vpop.eup %5209 }
0x2f72   :  { %3758 = vrot.lane.b32.xlu0 %v5210_v31, %s5320_s19  ;;  %v5212_v33 = vpop.eup %5211 }
0x2f73   :  { %v3739_v34 = vadd.f32 1.0, %v5212_v33 }
0x2f75   :  { %5213 = vrcp.f32 %v3739_v34 }
0x2f7f   :  { %v5214_v35 = vpop.eup %5213 }
0x2fe4   :  { %v3759_v37 = vpop.permute.xlu0 %3758 }
0x2fe5   :  { %v3761_v54 = vmul.f32 %v5214_v35, %v3759_v37 }
0x2fe7   :  { %v3762_v38 = vpack.c.bf16 %v3761_v54, %v3761_v54 }
0x2fe9   :  { %v3764_v39 = vrot.slane %v3762_v38, 2 }
0x2feb   :  { %3765 = vrot.lane.b32.xlu1 %v3764_v39, %s5326_s18 }
0x305d   :  { %v3766_v40 = vpop.permute.xlu1 %3765 }
0x305e   :  { %4909 = vmatmul.mubr.msk.bf16.vlgmr.msra.gmra.mrb[124].mxu0 %vm156_vm2, %v3766_v40  ;;  %4917 = vmatmul.mubr.msk.bf16.vlgmr.msra.gmra.mrb[124].mxu1 %vm156_vm2, %v3766_v40 }
0x305f   :  { %4921 = vmatpush3.bf16.msra.mxu0 %v6145_v45  ;;  %4929 = vmatpush3.bf16.msra.mxu1 %v6148_v46 }
0x3060   :  { %4922 = vmatprep.subr.bf16.mxu0 %v5323_v0  ;;  %4930 = vmatprep.subr.bf16.mxu1 %v5323_v0 }
0x3061   :  { %4924 = vmatprep.mubr.msk.bf16.mxu0 %vm5324_vm0, %v5323_v0  ;;  %4932 = vmatprep.mubr.msk.bf16.mxu1 %vm5324_vm0, %v5323_v0 }
0x3063   :  { %4923 = vmatpush3.bf16.msra.mxu0 %v6157_v47  ;;  %4931 = vmatpush3.bf16.msra.mxu1 %v6160_v51 }
0x3064   :  { %4936 = vmatprep.subr.bf16.mxu0 %v5323_v0 }
0x3066   :  { %4925 = vmatmul.mubr.msk.bf16.vlgmr.msra.gmra.mrb[128].mxu0 %vm156_vm2, %v3766_v40  ;;  %4933 = vmatmul.mubr.msk.bf16.vlgmr.msra.gmra.mrb[128].mxu1 %vm156_vm2, %v3766_v40 }
0x3067   :  { %4940 = vmatprep.mubr.msk.bf16.mxu0 %vm5324_vm0, %v5323_v0  ;;  %4937 = vmatpush3.bf16.msra.mxu0 %v4973_v36 }
0x3068   :  { %4938 = vmatprep.subr.bf16.mxu0 %v5323_v0 }
0x306b   :  { %4939 = vmatpush3.bf16.msra.mxu0 %v4974_v20 }
0x3131   :  { %v3804_v41 = vpop.f32.mrb[124].mxu0  ;;  %v3848_v42 = vpop.f32.mrb[124].mxu1 }
0x3132   :  { %v4910_v43 = vpop.f32.mrb[125].mxu0  ;;  %v4918_v44 = vpop.f32.mrb[125].mxu1  ;;  %v3855_v19 = vrot.slane %v3848_v42, 2  ;;  %v3811_v61 = vrot.slane %v3804_v41, 2 }
0x3133   :  { %v3807_v45 = vpop.f32.mrb[126].mxu0  ;;  %v3851_v46 = vpop.f32.mrb[126].mxu1 }
0x3134   :  { %v4911_v62 = vpop.f32.mrb[127].mxu0  ;;  %v4919_v53 = vpop.f32.mrb[127].mxu1  ;;  %v3813_v58 = vadd.f32 %v3811_v61, %v5909_v28 }
0x3136   :  { %v4203_v63 = vmul.f32 -1.442695, %v3813_v58 }
0x3139   :  { %v3894_v47 = vpop.f32.mrb[128].mxu0  ;;  %v3940_v4 = vpop.f32.mrb[128].mxu1 }
0x313a   :  { %v3901_v51 = vrot.slane %v3894_v47, 2  ;;  %v4926_v49 = vpop.f32.mrb[129].mxu0  ;;  %v4934_v56 = vpop.f32.mrb[129].mxu1  ;;  %v3947_v57 = vrot.slane %v3940_v4, 2 }
0x313b   :  { %v3897_v21 = vpop.f32.mrb[130].mxu0  ;;  %v3943_v24 = vpop.f32.mrb[130].mxu1 }
0x313c   :  { %v4935_v25 = vpop.f32.mrb[131].mxu1  ;;  %3902 = vrot.lane.b32.xlu0 %v3901_v51, %s5320_s19  ;;  %v4927_v55 = vpop.f32.mrb[131].mxu0 }
0x3140   :  { %3856 = vrot.lane.b32.xlu0 %v3855_v19, %s5326_s18 }
0x3144   :  { %3948 = vrot.lane.b32.xlu0 %v3947_v57, %s5327_s3 }
0x31ae   :  { %v3903_v52 = vpop.permute.xlu0 %3902 }
0x31af   :  { %v3905_v5 = vadd.f32 %v3903_v52, %v5909_v28 }
0x31b1   :  { %5215 = vtanh.f32 %v3905_v5 }
0x31b2   :  { %5217 = vpow2.f32 %v4203_v63  ;;  %v3857_v6 = vpop.permute.xlu0 %3856 }
0x31b3   :  { %v3859_v13 = vadd.f32 %v3857_v6, %v5909_v28 }
0x31b5   :  { %v4204_v12 = vmul.f32 -1.442695, %v3859_v13 }
0x31b6   :  { %v3949_v11 = vpop.permute.xlu0 %3948 }
0x31b7   :  { %v3951_v9 = vadd.f32 %v3949_v11, %v5909_v28 }
0x31b9   :  { %v4205_v26 = vmul.f32 -1.442695, %v3951_v9 }
0x31bb   :  { %v5216_v59 = vpop.eup %5215 }
0x31bc   :  { %3976 = vrot.lane.b32.xlu1 %v5216_v59, %s5320_s19  ;;  %v5218_v16 = vpop.eup %5217 }
0x31bd   :  { %v3955_v48 = vadd.f32 1.0, %v5218_v16 }
0x31bf   :  { %5219 = vrcp.f32 %v3955_v48 }
0x31c0   :  { %5221 = vpow2.f32 %v4204_v12 }
0x31c9   :  { %v5220_v27 = vpop.eup %5219 }
0x31ca   :  { %v5222_v14 = vpop.eup %5221 }
0x31cb   :  { %v3961_v17 = vadd.f32 1.0, %v5222_v14 }
0x31cd   :  { %5223 = vrcp.f32 %v3961_v17 }
0x31d7   :  { %v5224_v15 = vpop.eup %5223 }
0x31d8   :  { %v3974_v1 = vmul.f32 %v5224_v15, %v3972_v18 }
0x322e   :  { %v3977_v8 = vpop.permute.xlu1 %3976 }
0x322f   :  { %v3979_v23 = vmul.f32 %v5220_v27, %v3977_v8 }
0x3231   :  { %3981 = vrot.lane.b32.xlu1 %v3979_v23, %s5326_s18 }
0x32a3   :  { %v3982_v50 = vpop.permute.xlu1 %3981 }
0x32a4   :  { %v3984_v7 = vadd.f32 %v3982_v50, %v3974_v1 }
0x32a6   :  { %5225 = vtanh.f32 %v3984_v7 }
0x32a7   :  { %5227 = vpow2.f32 %v4205_v26 }
0x32b0   :  { %v5226_v22 = vpop.eup %5225 }
0x32b1   :  { %3987 = vrot.lane.b32.xlu1 %v5226_v22, %s5320_s19  ;;  %v5228_v10 = vpop.eup %5227 }
0x32b2   :  { %v3968_v3 = vadd.f32 1.0, %v5228_v10 }
0x32b4   :  { %5229 = vrcp.f32 %v3968_v3 }
0x32be   :  { %v5230_v29 = vpop.eup %5229 }
0x3323   :  { %v3988_v30 = vpop.permute.xlu1 %3987 }
0x3324   :  { %v3990_v31 = vmul.f32 %v5230_v29, %v3988_v30 }
0x3326   :  { %v3991_v2 = vpack.c.bf16 %v3990_v31, %v3990_v31 }
0x3328   :  { %v4004_v32 = vrot.slane %v3991_v2, 3 }
0x332a   :  { %4005 = vrot.lane.b32.xlu0 %v4004_v32, %s5326_s18 }
0x339c   :  { %v4006_v0 = vpop.permute.xlu0 %4005 }
0x339d   :  { %4941 = vmatmul.mubr.msk.bf16.vlgmr.msra.gmra.mrb[132].mxu0 %vm156_vm2, %v4006_v0 }
0x3470   :  { %v4056_v28 = vpop.f32.mrb[132].mxu0 }
0x3471   :  { %v4057_v33 = vadd.f32 %v4206_v60, %v4056_v28  ;;  %v4942_v34 = vpop.f32.mrb[133].mxu0 }
0x3472   :  { %v4059_v35 = vpop.f32.mrb[134].mxu0 }
0x3473   :  { %4062 = vst.msk [vmem:[#allocation8] sm:$0x3] %vm412_vm3, %v4057_v33  ;;  %v4943_v37 = vpop.f32.mrb[135].mxu0 }
0x3474   :  { %5302 = shalt.err (!%p5299_p6)
}
0x3475   :  { %s5303_s8 = scalar_lea.hbm %s6254_s9, 32 }
0x3476   :  { %p5304_p7 = scmp.ne.s32.totalorder %s6254_s9, %s5303_s8  ;;  %p5307_p8 = scmp.lt.u32.totalorder %s5303_s8, %s6254_s9 }
0x3478   :  { %p5309_p9 = pnand %p5307_p8, %p5304_p7 }
0x347a   :  { %5312 = shalt.err (!%p5309_p9)
}
0x347b   :  { %4072 = dma.vmem_to_hbm [thread:$0]  %s4070_s29, 32, %s6254_s9, [#allocation5]  }
0x347c   :  { %5317 = dma.done.wait [#allocation5], 32  }
0x347d   :  { %5318 = vsyncadd [#allocation5], 4294967264 }
0x347e   :  { %4076 = vsyncpa [#allocation4], 1 }
0x347f   :  { %4077 = vsyncpa [#allocation7], 1 }
0x3480   :  { %4078 = vsyncpa [#allocation5], 1 }

</bundles_post_ra>
